<compile_context>
chip_gen: v6e
topology: v6e:2x2x1
jax: 0.10.0
libtpu: 0.0.40
codegen_flags: <defaults>
</compile_context>

<pallas_src>
import functools

import numpy as np
import jax
import jax.numpy as jnp
from jax import lax
from jax.experimental import pallas as pl
from jax.experimental.pallas import tpu as pltpu

BN_EPS = 1e-5


# ----------------------------------------------------------------------------
# Pallas kernel: (M,K)-tiled matmul, bf16 operands, f32 accumulation directly
# in the output block, fused per-channel scale/bias, optional residual + ReLU.
# ----------------------------------------------------------------------------
def _mm_body(a_ref, b_ref, s_ref, bi_ref, r_ref, o_ref, relu):
    k = pl.program_id(1)

    @pl.when(k == 0)
    def _():
        o_ref[...] = jnp.zeros_like(o_ref)

    o_ref[...] += jnp.dot(a_ref[...], b_ref[...],
                          preferred_element_type=jnp.float32)

    @pl.when(k == pl.num_programs(1) - 1)
    def _():
        y = o_ref[...] * s_ref[...] + bi_ref[...]
        if r_ref is not None:
            y = y + r_ref[...]
        if relu:
            y = jnp.maximum(y, 0.0)
        o_ref[...] = y


def _make_mm_kernel(relu: bool, has_res: bool):
    if has_res:
        def kernel(a_ref, b_ref, s_ref, bi_ref, r_ref, o_ref):
            _mm_body(a_ref, b_ref, s_ref, bi_ref, r_ref, o_ref, relu)
    else:
        def kernel(a_ref, b_ref, s_ref, bi_ref, o_ref):
            _mm_body(a_ref, b_ref, s_ref, bi_ref, None, o_ref, relu)
    return kernel


def _pick_tile(n, candidates):
    for cand in candidates:
        if n % cand == 0:
            return cand
    return n  # fall back to the full dimension (always legal)


def fused_matmul(a, b, scale, bias, residual=None, relu=False):
    """out = maybe_relu((a @ b) * scale + bias [+ residual]).

    a: (M, K), b: (K, N) -- cast to bf16 for the MXU; accumulation and the
    epilogue (scale/bias/residual/ReLU) run in f32. Output f32.
    """
    M, K = a.shape
    K2, N = b.shape
    assert K == K2

    tk = _pick_tile(K, (512, 256, 128))
    tm = _pick_tile(M, (512, 256, 128, 64, 32, 16, 8))
    gk = K // tk
    gm = M // tm

    a = a.astype(jnp.bfloat16)
    b = b.astype(jnp.bfloat16)
    scale = scale.reshape(1, N).astype(jnp.float32)
    bias = bias.reshape(1, N).astype(jnp.float32)

    in_specs = [
        pl.BlockSpec((tm, tk), lambda m, k: (m, k)),
        pl.BlockSpec((tk, N), lambda m, k: (k, 0)),
        pl.BlockSpec((1, N), lambda m, k: (0, 0)),
        pl.BlockSpec((1, N), lambda m, k: (0, 0)),
    ]
    args = [a, b, scale, bias]
    if residual is not None:
        # Per-M-tile residual: block index constant along K -> one DMA per tile.
        in_specs.append(pl.BlockSpec((tm, N), lambda m, k: (m, 0)))
        args.append(residual.astype(jnp.float32))

    kernel = _make_mm_kernel(relu=relu, has_res=residual is not None)
    return pl.pallas_call(
        kernel,
        out_shape=jax.ShapeDtypeStruct((M, N), jnp.float32),
        grid_spec=pltpu.PrefetchScalarGridSpec(
            num_scalar_prefetch=0,
            grid=(gm, gk),
            in_specs=in_specs,
            # Output block index constant across K -> VMEM-resident accumulator.
            out_specs=pl.BlockSpec((tm, N), lambda m, k: (m, 0)),
        ),
        compiler_params=pltpu.CompilerParams(
            dimension_semantics=("parallel", "arbitrary"),
            vmem_limit_bytes=48 * 1024 * 1024,  # < v7x's 64 MiB physical VMEM
        ),
    )(*args)


# ----------------------------------------------------------------------------
# Glue: im2col, BN folding, parameter init / packing
# ----------------------------------------------------------------------------
def im2col3x3(x, stride):
    """x: (N,H,W,C) NHWC, 3x3 window, pad=1 -> (N*Ho*Wo, 9*C). Keeps dtype."""
    N, H, W, C = x.shape
    Ho = (H + 2 - 3) // stride + 1
    Wo = (W + 2 - 3) // stride + 1
    xp = jnp.pad(x, ((0, 0), (1, 1), (1, 1), (0, 0)))
    patches = []
    for kh in range(3):
        for kw in range(3):
            patches.append(
                xp[:, kh:kh + Ho * stride:stride, kw:kw + Wo * stride:stride, :])
    p = jnp.stack(patches, axis=3)  # (N, Ho, Wo, 9, C)
    return p.reshape(N * Ho * Wo, 9 * C), Ho, Wo


def conv_w_to_mat(w):
    """w: (Cout, Cin, kh, kw) torch layout -> (kh*kw*Cin, Cout)."""
    cout, cin, kh, kw = w.shape
    return jnp.transpose(w, (2, 3, 1, 0)).reshape(kh * kw * cin, cout)


def bn_fold(p):
    s = p["gamma"] / jnp.sqrt(p["var"] + BN_EPS)
    b = p["beta"] - p["mean"] * s
    return s, b


def init_params(key):
    C_in, C = 256, 512
    ks = jax.random.split(key, 6)

    def conv_w(k, cout, cin, kh, kw):
        std = (2.0 / (cin * kh * kw)) ** 0.5
        return jax.random.normal(k, (cout, cin, kh, kw), jnp.float32) * std

    def bn(c):
        return dict(gamma=jnp.ones((c,), jnp.float32),
                    beta=jnp.zeros((c,), jnp.float32),
                    mean=jnp.zeros((c,), jnp.float32),
                    var=jnp.ones((c,), jnp.float32))

    return dict(
        b1_conv1=conv_w(ks[0], C, C_in, 3, 3), b1_bn1=bn(C),
        b1_conv2=conv_w(ks[1], C, C, 3, 3), b1_bn2=bn(C),
        b1_ds_conv=conv_w(ks[2], C, C_in, 1, 1), b1_ds_bn=bn(C),
        b2_conv1=conv_w(ks[3], C, C, 3, 3), b2_bn1=bn(C),
        b2_conv2=conv_w(ks[4], C, C, 3, 3), b2_bn2=bn(C),
        fc_w=jax.random.normal(ks[5], (C, C), jnp.float32) * 0.005,  # normal_(0,0.005)
        fc_b=jnp.full((C,), 0.1, jnp.float32),                       # fill_(0.1)
    )


def prepare_params(params):
    """One-time weight packing: conv->matrix, BN folding, bf16 cast, FC.T.

    Hoisted out of the forward path so the kernels only see ready HBM arrays.
    """
    def conv_pack(w, bn_p):
        s, b = bn_fold(bn_p)
        return dict(w=conv_w_to_mat(w).astype(jnp.bfloat16),
                    scale=s.astype(jnp.float32),
                    bias=b.astype(jnp.float32))

    return dict(
        b1_c1=conv_pack(params["b1_conv1"], params["b1_bn1"]),
        b1_c2=conv_pack(params["b1_conv2"], params["b1_bn2"]),
        b1_ds=conv_pack(params["b1_ds_conv"], params["b1_ds_bn"]),
        b2_c1=conv_pack(params["b2_conv1"], params["b2_bn1"]),
        b2_c2=conv_pack(params["b2_conv2"], params["b2_bn2"]),
        fc_w=jnp.transpose(params["fc_w"]).astype(jnp.bfloat16),  # (512 in, 512 out)
        fc_b=params["fc_b"].astype(jnp.float32),
        fc_ones=jnp.ones((params["fc_w"].shape[0],), jnp.float32),
    )


# ----------------------------------------------------------------------------
# Forward pass built from the Pallas kernels
# ----------------------------------------------------------------------------
def basic_block(x, c1, c2, stride, ds=None):
    """x: (N,H,W,Cin) f32.  Returns (N,Ho,Wo,Cout) f32."""
    N, H, W, Cin = x.shape
    Cout = c1["w"].shape[1]
    x_bf16 = x.astype(jnp.bfloat16)

    a1, Ho, Wo = im2col3x3(x_bf16, stride)
    if ds is not None:
        a_ds = x_bf16[:, ::stride, ::stride, :].reshape(N * Ho * Wo, Cin)
        res = fused_matmul(a_ds, ds["w"], ds["scale"], ds["bias"], relu=False)
    else:
        res = x.reshape(N * H * W, Cin)

    h = fused_matmul(a1, c1["w"], c1["scale"], c1["bias"], relu=True)
    h = h.reshape(N, Ho, Wo, Cout)

    a2, _, _ = im2col3x3(h.astype(jnp.bfloat16), 1)
    out = fused_matmul(a2, c2["w"], c2["scale"], c2["bias"],
                       residual=res, relu=True)
    return out.reshape(N, Ho, Wo, Cout)


def feature_embedder_forward(x_nchw, prep, norm_flag=True):
    del norm_flag  # unused, as in the reference forward()
    x = jnp.transpose(x_nchw, (0, 2, 3, 1)).astype(jnp.float32)  # NCHW -> NHWC

    # layer4, block 0 (stride 2, with downsample)
    x = basic_block(x, prep["b1_c1"], prep["b1_c2"], stride=2, ds=prep["b1_ds"])
    # layer4, block 1
    x = basic_block(x, prep["b2_c1"], prep["b2_c2"], stride=1)

    # AdaptiveAvgPool2d(1) + flatten: tiny spatial mean, then one fused
    # (N,512) x (512,512) Pallas matmul for Linear(512,512) + ReLU.
    feat = jnp.mean(x, axis=(1, 2))  # (N, 512)
    out = fused_matmul(feat, prep["fc_w"], prep["fc_ones"], prep["fc_b"],
                       relu=True)
    # Dropout(0.5): identity (see TODO(synk) above).
    return out


# ----------------------------------------------------------------------------
# Pure-JAX reference (for correctness check)
# ----------------------------------------------------------------------------
def _ref_forward(x_nchw, params):
    x = jnp.transpose(x_nchw, (0, 2, 3, 1)).astype(jnp.float32)

    def conv(x, w, stride, pad):
        return lax.conv_general_dilated(
            x, jnp.transpose(w, (2, 3, 1, 0)),
            window_strides=(stride, stride), padding=[(pad, pad), (pad, pad)],
            dimension_numbers=("NHWC", "HWIO", "NHWC"),
            precision=lax.Precision.HIGHEST)

    def bn(x, p):
        s = p["gamma"] / jnp.sqrt(p["var"] + BN_EPS)
        return x * s + (p["beta"] - p["mean"] * s)

    def block(x, w1, p1, w2, p2, stride, dsw=None, dsp=None):
        res = x if dsw is None else bn(conv(x, dsw, stride, 0), dsp)
        h = jnp.maximum(bn(conv(x, w1, stride, 1), p1), 0.0)
        h = bn(conv(h, w2, 1, 1), p2)
        return jnp.maximum(h + res, 0.0)

    x = block(x, params["b1_conv1"], params["b1_bn1"],
              params["b1_conv2"], params["b1_bn2"], 2,
              params["b1_ds_conv"], params["b1_ds_bn"])
    x = block(x, params["b2_conv1"], params["b2_bn1"],
              params["b2_conv2"], params["b2_bn2"], 1)
    feat = jnp.mean(x, axis=(1, 2))
    out = jnp.dot(feat, params["fc_w"].T,
                  precision=lax.Precision.HIGHEST) + params["fc_b"]
    return jnp.maximum(out, 0.0)


if __name__ == "__main__":
    key = jax.random.PRNGKey(0)
    kx, kp = jax.random.split(key)

    # layer4 requires 256 input channels; small batch/spatial for the demo.
    x = jax.random.normal(kx, (2, 256, 8, 8), jnp.float32)  # NCHW like PyTorch
    params = init_params(kp)
    prep = prepare_params(params)  # one-time weight packing (hoisted)

    fwd = jax.jit(functools.partial(feature_embedder_forward, norm_flag=True))
    out = jax.block_until_ready(fwd(x, prep))
    assert out.shape == (2, 512)

    ref = jax.block_until_ready(_ref_forward(x, params))
    # bf16 operands (f32 accumulation) vs. HIGHEST-precision f32 reference.
    np.testing.assert_allclose(np.asarray(out), np.asarray(ref),
                               rtol=5e-2, atol=5e-2)
    print("KERNEL_OK")
</pallas_src>

<mosaic_0001>
module attributes {stable_mosaic.version = 11 : i64} {
  func.func @kernel(%arg0: i32, %arg1: i32, %arg2: memref<32x256xbf16, #tpu.memory_space<vmem>>, %arg3: memref<256x512xbf16, #tpu.memory_space<vmem>>, %arg4: memref<1x512xf32, #tpu.memory_space<vmem>>, %arg5: memref<1x512xf32, #tpu.memory_space<vmem>>, %arg6: memref<32x512xf32, #tpu.memory_space<vmem>>) attributes {dimension_semantics = [#tpu.dimension_semantics<parallel>, #tpu.dimension_semantics<arbitrary>], iteration_bounds = array<i64: 1, 1>, scalar_prefetch = 0 : i64, scratch_operands = 0 : i64, tpu.core_type = #tpu.core_type<tc>, window_params = [{transform_indices = @transform_0, window_bounds = array<i64: 32, 256>}, {transform_indices = @transform_1, window_bounds = array<i64: 256, 512>}, {pipeline_mode = #tpu.pipeline_mode<synchronous>, transform_indices = @transform_2, window_bounds = array<i64: 1, 512>}, {pipeline_mode = #tpu.pipeline_mode<synchronous>, transform_indices = @transform_3, window_bounds = array<i64: 1, 512>}, {transform_indices = @transform_4, window_bounds = array<i64: 32, 512>}]} {
    %c0_i32 = arith.constant 0 : i32
    %0 = arith.cmpi eq, %arg1, %c0_i32 : i32
    %1 = arith.extui %0 : i1 to i32
    %c0_i32_0 = arith.constant 0 : i32
    %2 = arith.cmpi ne, %1, %c0_i32_0 : i32
    scf.if %2 {
      %cst_10 = arith.constant 0.000000e+00 : f32
      %12 = vector.broadcast %cst_10 : f32 to vector<32x512xf32>
      %c0_11 = arith.constant 0 : index
      %c0_12 = arith.constant 0 : index
      %13 = vector.load %arg6[%c0_11, %c0_12] : memref<32x512xf32, #tpu.memory_space<vmem>>, vector<32x512xf32>
      tpu.vector_store %arg6[%c0_11, %c0_12], %12 {strides = array<i32>} : memref<32x512xf32, #tpu.memory_space<vmem>>, vector<32x512xf32>,
    } else {
    }
    %c0 = arith.constant 0 : index
    %c0_1 = arith.constant 0 : index
    %3 = vector.load %arg6[%c0, %c0_1] : memref<32x512xf32, #tpu.memory_space<vmem>>, vector<32x512xf32>
    %c0_2 = arith.constant 0 : index
    %c0_3 = arith.constant 0 : index
    %4 = vector.load %arg2[%c0_2, %c0_3] : memref<32x256xbf16, #tpu.memory_space<vmem>>, vector<32x256xbf16>
    %c0_4 = arith.constant 0 : index
    %c0_5 = arith.constant 0 : index
    %5 = vector.load %arg3[%c0_4, %c0_5] : memref<256x512xbf16, #tpu.memory_space<vmem>>, vector<256x512xbf16>
    %cst = arith.constant dense<0.000000e+00> : vector<32x512xf32>
    %6 = tpu.matmul %4, %5, %cst {dimension_numbers = #tpu.dot_dimension_numbers<[1], [0], [0], [1], [0, 0, 1, 1], [], []>} : vector<32x256xbf16>, vector<256x512xbf16>, vector<32x512xf32> -> vector<32x512xf32>
    %7 = arith.addf %3, %6 : vector<32x512xf32>
    %c0_6 = arith.constant 0 : index
    %c0_7 = arith.constant 0 : index
    %8 = vector.load %arg6[%c0_6, %c0_7] : memref<32x512xf32, #tpu.memory_space<vmem>>, vector<32x512xf32>
    tpu.vector_store %arg6[%c0_6, %c0_7], %7 {strides = array<i32>} : memref<32x512xf32, #tpu.memory_space<vmem>>, vector<32x512xf32>,
    %c0_i32_8 = arith.constant 0 : i32
    %9 = arith.cmpi eq, %arg1, %c0_i32_8 : i32
    %10 = arith.extui %9 : i1 to i32
    %c0_i32_9 = arith.constant 0 : i32
    %11 = arith.cmpi ne, %10, %c0_i32_9 : i32
    scf.if %11 {
      %c0_10 = arith.constant 0 : index
      %c0_11 = arith.constant 0 : index
      %12 = vector.load %arg6[%c0_10, %c0_11] : memref<32x512xf32, #tpu.memory_space<vmem>>, vector<32x512xf32>
      %c0_12 = arith.constant 0 : index
      %c0_13 = arith.constant 0 : index
      %13 = vector.load %arg4[%c0_12, %c0_13] : memref<1x512xf32, #tpu.memory_space<vmem>>, vector<1x512xf32>
      %14 = vector.broadcast %13 : vector<1x512xf32> to vector<32x512xf32>
      %15 = arith.mulf %12, %14 : vector<32x512xf32>
      %c0_14 = arith.constant 0 : index
      %c0_15 = arith.constant 0 : index
      %16 = vector.load %arg5[%c0_14, %c0_15] : memref<1x512xf32, #tpu.memory_space<vmem>>, vector<1x512xf32>
      %17 = vector.broadcast %16 : vector<1x512xf32> to vector<32x512xf32>
      %18 = arith.addf %15, %17 : vector<32x512xf32>
      %c0_16 = arith.constant 0 : index
      %c0_17 = arith.constant 0 : index
      %19 = vector.load %arg6[%c0_16, %c0_17] : memref<32x512xf32, #tpu.memory_space<vmem>>, vector<32x512xf32>
      tpu.vector_store %arg6[%c0_16, %c0_17], %18 {strides = array<i32>} : memref<32x512xf32, #tpu.memory_space<vmem>>, vector<32x512xf32>,
    } else {
    }
    return
  }
  func.func @transform_0(%arg0: i32, %arg1: i32) -> (i32, i32) {
    %c0_i32 = arith.constant 0 : i32
    return %arg0, %arg1 : i32, i32
  }
  func.func @transform_1(%arg0: i32, %arg1: i32) -> (i32, i32) {
    %c0_i32 = arith.constant 0 : i32
    %c0_i32_0 = arith.constant 0 : i32
    return %arg1, %c0_i32 : i32, i32
  }
  func.func @transform_2(%arg0: i32, %arg1: i32) -> (i32, i32) {
    %c0_i32 = arith.constant 0 : i32
    %c0_i32_0 = arith.constant 0 : i32
    %c0_i32_1 = arith.constant 0 : i32
    return %c0_i32, %c0_i32_0 : i32, i32
  }
  func.func @transform_3(%arg0: i32, %arg1: i32) -> (i32, i32) {
    %c0_i32 = arith.constant 0 : i32
    %c0_i32_0 = arith.constant 0 : i32
    %c0_i32_1 = arith.constant 0 : i32
    return %c0_i32, %c0_i32_0 : i32, i32
  }
  func.func @transform_4(%arg0: i32, %arg1: i32) -> (i32, i32) {
    %c0_i32 = arith.constant 0 : i32
    %c0_i32_0 = arith.constant 0 : i32
    return %arg0, %c0_i32 : i32, i32
  }
}

module attributes {stable_mosaic.version = 11 : i64} {
  func.func @kernel(%arg0: i32, %arg1: i32, %arg2: memref<32x256xbf16, #tpu.memory_space<vmem>>, %arg3: memref<256x512xbf16, #tpu.memory_space<vmem>>, %arg4: memref<1x512xf32, #tpu.memory_space<vmem>>, %arg5: memref<1x512xf32, #tpu.memory_space<vmem>>, %arg6: memref<32x512xf32, #tpu.memory_space<vmem>>) attributes {dimension_semantics = [#tpu.dimension_semantics<parallel>, #tpu.dimension_semantics<arbitrary>], iteration_bounds = array<i64: 1, 9>, scalar_prefetch = 0 : i64, scratch_operands = 0 : i64, tpu.core_type = #tpu.core_type<tc>, window_params = [{transform_indices = @transform_0, window_bounds = array<i64: 32, 256>}, {transform_indices = @transform_1, window_bounds = array<i64: 256, 512>}, {pipeline_mode = #tpu.pipeline_mode<synchronous>, transform_indices = @transform_2, window_bounds = array<i64: 1, 512>}, {pipeline_mode = #tpu.pipeline_mode<synchronous>, transform_indices = @transform_3, window_bounds = array<i64: 1, 512>}, {transform_indices = @transform_4, window_bounds = array<i64: 32, 512>}]} {
    %c0_i32 = arith.constant 0 : i32
    %0 = arith.cmpi eq, %arg1, %c0_i32 : i32
    %1 = arith.extui %0 : i1 to i32
    %c0_i32_0 = arith.constant 0 : i32
    %2 = arith.cmpi ne, %1, %c0_i32_0 : i32
    scf.if %2 {
      %cst_9 = arith.constant 0.000000e+00 : f32
      %12 = vector.broadcast %cst_9 : f32 to vector<32x512xf32>
      %c0_10 = arith.constant 0 : index
      %c0_11 = arith.constant 0 : index
      %13 = vector.load %arg6[%c0_10, %c0_11] : memref<32x512xf32, #tpu.memory_space<vmem>>, vector<32x512xf32>
      tpu.vector_store %arg6[%c0_10, %c0_11], %12 {strides = array<i32>} : memref<32x512xf32, #tpu.memory_space<vmem>>, vector<32x512xf32>,
    } else {
    }
    %c0 = arith.constant 0 : index
    %c0_1 = arith.constant 0 : index
    %3 = vector.load %arg6[%c0, %c0_1] : memref<32x512xf32, #tpu.memory_space<vmem>>, vector<32x512xf32>
    %c0_2 = arith.constant 0 : index
    %c0_3 = arith.constant 0 : index
    %4 = vector.load %arg2[%c0_2, %c0_3] : memref<32x256xbf16, #tpu.memory_space<vmem>>, vector<32x256xbf16>
    %c0_4 = arith.constant 0 : index
    %c0_5 = arith.constant 0 : index
    %5 = vector.load %arg3[%c0_4, %c0_5] : memref<256x512xbf16, #tpu.memory_space<vmem>>, vector<256x512xbf16>
    %cst = arith.constant dense<0.000000e+00> : vector<32x512xf32>
    %6 = tpu.matmul %4, %5, %cst {dimension_numbers = #tpu.dot_dimension_numbers<[1], [0], [0], [1], [0, 0, 1, 1], [], []>} : vector<32x256xbf16>, vector<256x512xbf16>, vector<32x512xf32> -> vector<32x512xf32>
    %7 = arith.addf %3, %6 : vector<32x512xf32>
    %c0_6 = arith.constant 0 : index
    %c0_7 = arith.constant 0 : index
    %8 = vector.load %arg6[%c0_6, %c0_7] : memref<32x512xf32, #tpu.memory_space<vmem>>, vector<32x512xf32>
    tpu.vector_store %arg6[%c0_6, %c0_7], %7 {strides = array<i32>} : memref<32x512xf32, #tpu.memory_space<vmem>>, vector<32x512xf32>,
    %c8_i32 = arith.constant 8 : i32
    %9 = arith.cmpi eq, %arg1, %c8_i32 : i32
    %10 = arith.extui %9 : i1 to i32
    %c0_i32_8 = arith.constant 0 : i32
    %11 = arith.cmpi ne, %10, %c0_i32_8 : i32
    scf.if %11 {
      %c0_9 = arith.constant 0 : index
      %c0_10 = arith.constant 0 : index
      %12 = vector.load %arg6[%c0_9, %c0_10] : memref<32x512xf32, #tpu.memory_space<vmem>>, vector<32x512xf32>
      %c0_11 = arith.constant 0 : index
      %c0_12 = arith.constant 0 : index
      %13 = vector.load %arg4[%c0_11, %c0_12] : memref<1x512xf32, #tpu.memory_space<vmem>>, vector<1x512xf32>
      %14 = vector.broadcast %13 : vector<1x512xf32> to vector<32x512xf32>
      %15 = arith.mulf %12, %14 : vector<32x512xf32>
      %c0_13 = arith.constant 0 : index
      %c0_14 = arith.constant 0 : index
      %16 = vector.load %arg5[%c0_13, %c0_14] : memref<1x512xf32, #tpu.memory_space<vmem>>, vector<1x512xf32>
      %17 = vector.broadcast %16 : vector<1x512xf32> to vector<32x512xf32>
      %18 = arith.addf %15, %17 : vector<32x512xf32>
      %cst_15 = arith.constant 0.000000e+00 : f32
      %19 = vector.broadcast %cst_15 : f32 to vector<32x512xf32>
      %20 = arith.maximumf %18, %19 : vector<32x512xf32>
      %c0_16 = arith.constant 0 : index
      %c0_17 = arith.constant 0 : index
      %21 = vector.load %arg6[%c0_16, %c0_17] : memref<32x512xf32, #tpu.memory_space<vmem>>, vector<32x512xf32>
      tpu.vector_store %arg6[%c0_16, %c0_17], %20 {strides = array<i32>} : memref<32x512xf32, #tpu.memory_space<vmem>>, vector<32x512xf32>,
    } else {
    }
    return
  }
  func.func @transform_0(%arg0: i32, %arg1: i32) -> (i32, i32) {
    %c0_i32 = arith.constant 0 : i32
    return %arg0, %arg1 : i32, i32
  }
  func.func @transform_1(%arg0: i32, %arg1: i32) -> (i32, i32) {
    %c0_i32 = arith.constant 0 : i32
    %c0_i32_0 = arith.constant 0 : i32
    return %arg1, %c0_i32 : i32, i32
  }
  func.func @transform_2(%arg0: i32, %arg1: i32) -> (i32, i32) {
    %c0_i32 = arith.constant 0 : i32
    %c0_i32_0 = arith.constant 0 : i32
    %c0_i32_1 = arith.constant 0 : i32
    return %c0_i32, %c0_i32_0 : i32, i32
  }
  func.func @transform_3(%arg0: i32, %arg1: i32) -> (i32, i32) {
    %c0_i32 = arith.constant 0 : i32
    %c0_i32_0 = arith.constant 0 : i32
    %c0_i32_1 = arith.constant 0 : i32
    return %c0_i32, %c0_i32_0 : i32, i32
  }
  func.func @transform_4(%arg0: i32, %arg1: i32) -> (i32, i32) {
    %c0_i32 = arith.constant 0 : i32
    %c0_i32_0 = arith.constant 0 : i32
    return %arg0, %c0_i32 : i32, i32
  }
}

module attributes {stable_mosaic.version = 11 : i64} {
  func.func @kernel(%arg0: i32, %arg1: i32, %arg2: memref<32x512xbf16, #tpu.memory_space<vmem>>, %arg3: memref<512x512xbf16, #tpu.memory_space<vmem>>, %arg4: memref<1x512xf32, #tpu.memory_space<vmem>>, %arg5: memref<1x512xf32, #tpu.memory_space<vmem>>, %arg6: memref<32x512xf32, #tpu.memory_space<vmem>>, %arg7: memref<32x512xf32, #tpu.memory_space<vmem>>) attributes {dimension_semantics = [#tpu.dimension_semantics<parallel>, #tpu.dimension_semantics<arbitrary>], iteration_bounds = array<i64: 1, 9>, scalar_prefetch = 0 : i64, scratch_operands = 0 : i64, tpu.core_type = #tpu.core_type<tc>, window_params = [{transform_indices = @transform_0, window_bounds = array<i64: 32, 512>}, {transform_indices = @transform_1, window_bounds = array<i64: 512, 512>}, {pipeline_mode = #tpu.pipeline_mode<synchronous>, transform_indices = @transform_2, window_bounds = array<i64: 1, 512>}, {pipeline_mode = #tpu.pipeline_mode<synchronous>, transform_indices = @transform_3, window_bounds = array<i64: 1, 512>}, {transform_indices = @transform_4, window_bounds = array<i64: 32, 512>}, {transform_indices = @transform_5, window_bounds = array<i64: 32, 512>}]} {
    %c0_i32 = arith.constant 0 : i32
    %0 = arith.cmpi eq, %arg1, %c0_i32 : i32
    %1 = arith.extui %0 : i1 to i32
    %c0_i32_0 = arith.constant 0 : i32
    %2 = arith.cmpi ne, %1, %c0_i32_0 : i32
    scf.if %2 {
      %cst_9 = arith.constant 0.000000e+00 : f32
      %12 = vector.broadcast %cst_9 : f32 to vector<32x512xf32>
      %c0_10 = arith.constant 0 : index
      %c0_11 = arith.constant 0 : index
      %13 = vector.load %arg7[%c0_10, %c0_11] : memref<32x512xf32, #tpu.memory_space<vmem>>, vector<32x512xf32>
      tpu.vector_store %arg7[%c0_10, %c0_11], %12 {strides = array<i32>} : memref<32x512xf32, #tpu.memory_space<vmem>>, vector<32x512xf32>,
    } else {
    }
    %c0 = arith.constant 0 : index
    %c0_1 = arith.constant 0 : index
    %3 = vector.load %arg7[%c0, %c0_1] : memref<32x512xf32, #tpu.memory_space<vmem>>, vector<32x512xf32>
    %c0_2 = arith.constant 0 : index
    %c0_3 = arith.constant 0 : index
    %4 = vector.load %arg2[%c0_2, %c0_3] : memref<32x512xbf16, #tpu.memory_space<vmem>>, vector<32x512xbf16>
    %c0_4 = arith.constant 0 : index
    %c0_5 = arith.constant 0 : index
    %5 = vector.load %arg3[%c0_4, %c0_5] : memref<512x512xbf16, #tpu.memory_space<vmem>>, vector<512x512xbf16>
    %cst = arith.constant dense<0.000000e+00> : vector<32x512xf32>
    %6 = tpu.matmul %4, %5, %cst {dimension_numbers = #tpu.dot_dimension_numbers<[1], [0], [0], [1], [0, 0, 1, 1], [], []>} : vector<32x512xbf16>, vector<512x512xbf16>, vector<32x512xf32> -> vector<32x512xf32>
    %7 = arith.addf %3, %6 : vector<32x512xf32>
    %c0_6 = arith.constant 0 : index
    %c0_7 = arith.constant 0 : index
    %8 = vector.load %arg7[%c0_6, %c0_7] : memref<32x512xf32, #tpu.memory_space<vmem>>, vector<32x512xf32>
    tpu.vector_store %arg7[%c0_6, %c0_7], %7 {strides = array<i32>} : memref<32x512xf32, #tpu.memory_space<vmem>>, vector<32x512xf32>,
    %c8_i32 = arith.constant 8 : i32
    %9 = arith.cmpi eq, %arg1, %c8_i32 : i32
    %10 = arith.extui %9 : i1 to i32
    %c0_i32_8 = arith.constant 0 : i32
    %11 = arith.cmpi ne, %10, %c0_i32_8 : i32
    scf.if %11 {
      %c0_9 = arith.constant 0 : index
      %c0_10 = arith.constant 0 : index
      %12 = vector.load %arg7[%c0_9, %c0_10] : memref<32x512xf32, #tpu.memory_space<vmem>>, vector<32x512xf32>
      %c0_11 = arith.constant 0 : index
      %c0_12 = arith.constant 0 : index
      %13 = vector.load %arg4[%c0_11, %c0_12] : memref<1x512xf32, #tpu.memory_space<vmem>>, vector<1x512xf32>
      %14 = vector.broadcast %13 : vector<1x512xf32> to vector<32x512xf32>
      %15 = arith.mulf %12, %14 : vector<32x512xf32>
      %c0_13 = arith.constant 0 : index
      %c0_14 = arith.constant 0 : index
      %16 = vector.load %arg5[%c0_13, %c0_14] : memref<1x512xf32, #tpu.memory_space<vmem>>, vector<1x512xf32>
      %17 = vector.broadcast %16 : vector<1x512xf32> to vector<32x512xf32>
      %18 = arith.addf %15, %17 : vector<32x512xf32>
      %c0_15 = arith.constant 0 : index
      %c0_16 = arith.constant 0 : index
      %19 = vector.load %arg6[%c0_15, %c0_16] : memref<32x512xf32, #tpu.memory_space<vmem>>, vector<32x512xf32>
      %20 = arith.addf %18, %19 : vector<32x512xf32>
      %cst_17 = arith.constant 0.000000e+00 : f32
      %21 = vector.broadcast %cst_17 : f32 to vector<32x512xf32>
      %22 = arith.maximumf %20, %21 : vector<32x512xf32>
      %c0_18 = arith.constant 0 : index
      %c0_19 = arith.constant 0 : index
      %23 = vector.load %arg7[%c0_18, %c0_19] : memref<32x512xf32, #tpu.memory_space<vmem>>, vector<32x512xf32>
      tpu.vector_store %arg7[%c0_18, %c0_19], %22 {strides = array<i32>} : memref<32x512xf32, #tpu.memory_space<vmem>>, vector<32x512xf32>,
    } else {
    }
    return
  }
  func.func @transform_0(%arg0: i32, %arg1: i32) -> (i32, i32) {
    %c0_i32 = arith.constant 0 : i32
    return %arg0, %arg1 : i32, i32
  }
  func.func @transform_1(%arg0: i32, %arg1: i32) -> (i32, i32) {
    %c0_i32 = arith.constant 0 : i32
    %c0_i32_0 = arith.constant 0 : i32
    return %arg1, %c0_i32 : i32, i32
  }
  func.func @transform_2(%arg0: i32, %arg1: i32) -> (i32, i32) {
    %c0_i32 = arith.constant 0 : i32
    %c0_i32_0 = arith.constant 0 : i32
    %c0_i32_1 = arith.constant 0 : i32
    return %c0_i32, %c0_i32_0 : i32, i32
  }
  func.func @transform_3(%arg0: i32, %arg1: i32) -> (i32, i32) {
    %c0_i32 = arith.constant 0 : i32
    %c0_i32_0 = arith.constant 0 : i32
    %c0_i32_1 = arith.constant 0 : i32
    return %c0_i32, %c0_i32_0 : i32, i32
  }
  func.func @transform_4(%arg0: i32, %arg1: i32) -> (i32, i32) {
    %c0_i32 = arith.constant 0 : i32
    %c0_i32_0 = arith.constant 0 : i32
    return %arg0, %c0_i32 : i32, i32
  }
  func.func @transform_5(%arg0: i32, %arg1: i32) -> (i32, i32) {
    %c0_i32 = arith.constant 0 : i32
    %c0_i32_0 = arith.constant 0 : i32
    return %arg0, %c0_i32 : i32, i32
  }
}

module attributes {stable_mosaic.version = 11 : i64} {
  func.func @kernel(%arg0: i32, %arg1: i32, %arg2: memref<32x512xbf16, #tpu.memory_space<vmem>>, %arg3: memref<512x512xbf16, #tpu.memory_space<vmem>>, %arg4: memref<1x512xf32, #tpu.memory_space<vmem>>, %arg5: memref<1x512xf32, #tpu.memory_space<vmem>>, %arg6: memref<32x512xf32, #tpu.memory_space<vmem>>) attributes {dimension_semantics = [#tpu.dimension_semantics<parallel>, #tpu.dimension_semantics<arbitrary>], iteration_bounds = array<i64: 1, 9>, scalar_prefetch = 0 : i64, scratch_operands = 0 : i64, tpu.core_type = #tpu.core_type<tc>, window_params = [{transform_indices = @transform_0, window_bounds = array<i64: 32, 512>}, {transform_indices = @transform_1, window_bounds = array<i64: 512, 512>}, {pipeline_mode = #tpu.pipeline_mode<synchronous>, transform_indices = @transform_2, window_bounds = array<i64: 1, 512>}, {pipeline_mode = #tpu.pipeline_mode<synchronous>, transform_indices = @transform_3, window_bounds = array<i64: 1, 512>}, {transform_indices = @transform_4, window_bounds = array<i64: 32, 512>}]} {
    %c0_i32 = arith.constant 0 : i32
    %0 = arith.cmpi eq, %arg1, %c0_i32 : i32
    %1 = arith.extui %0 : i1 to i32
    %c0_i32_0 = arith.constant 0 : i32
    %2 = arith.cmpi ne, %1, %c0_i32_0 : i32
    scf.if %2 {
      %cst_9 = arith.constant 0.000000e+00 : f32
      %12 = vector.broadcast %cst_9 : f32 to vector<32x512xf32>
      %c0_10 = arith.constant 0 : index
      %c0_11 = arith.constant 0 : index
      %13 = vector.load %arg6[%c0_10, %c0_11] : memref<32x512xf32, #tpu.memory_space<vmem>>, vector<32x512xf32>
      tpu.vector_store %arg6[%c0_10, %c0_11], %12 {strides = array<i32>} : memref<32x512xf32, #tpu.memory_space<vmem>>, vector<32x512xf32>,
    } else {
    }
    %c0 = arith.constant 0 : index
    %c0_1 = arith.constant 0 : index
    %3 = vector.load %arg6[%c0, %c0_1] : memref<32x512xf32, #tpu.memory_space<vmem>>, vector<32x512xf32>
    %c0_2 = arith.constant 0 : index
    %c0_3 = arith.constant 0 : index
    %4 = vector.load %arg2[%c0_2, %c0_3] : memref<32x512xbf16, #tpu.memory_space<vmem>>, vector<32x512xbf16>
    %c0_4 = arith.constant 0 : index
    %c0_5 = arith.constant 0 : index
    %5 = vector.load %arg3[%c0_4, %c0_5] : memref<512x512xbf16, #tpu.memory_space<vmem>>, vector<512x512xbf16>
    %cst = arith.constant dense<0.000000e+00> : vector<32x512xf32>
    %6 = tpu.matmul %4, %5, %cst {dimension_numbers = #tpu.dot_dimension_numbers<[1], [0], [0], [1], [0, 0, 1, 1], [], []>} : vector<32x512xbf16>, vector<512x512xbf16>, vector<32x512xf32> -> vector<32x512xf32>
    %7 = arith.addf %3, %6 : vector<32x512xf32>
    %c0_6 = arith.constant 0 : index
    %c0_7 = arith.constant 0 : index
    %8 = vector.load %arg6[%c0_6, %c0_7] : memref<32x512xf32, #tpu.memory_space<vmem>>, vector<32x512xf32>
    tpu.vector_store %arg6[%c0_6, %c0_7], %7 {strides = array<i32>} : memref<32x512xf32, #tpu.memory_space<vmem>>, vector<32x512xf32>,
    %c8_i32 = arith.constant 8 : i32
    %9 = arith.cmpi eq, %arg1, %c8_i32 : i32
    %10 = arith.extui %9 : i1 to i32
    %c0_i32_8 = arith.constant 0 : i32
    %11 = arith.cmpi ne, %10, %c0_i32_8 : i32
    scf.if %11 {
      %c0_9 = arith.constant 0 : index
      %c0_10 = arith.constant 0 : index
      %12 = vector.load %arg6[%c0_9, %c0_10] : memref<32x512xf32, #tpu.memory_space<vmem>>, vector<32x512xf32>
      %c0_11 = arith.constant 0 : index
      %c0_12 = arith.constant 0 : index
      %13 = vector.load %arg4[%c0_11, %c0_12] : memref<1x512xf32, #tpu.memory_space<vmem>>, vector<1x512xf32>
      %14 = vector.broadcast %13 : vector<1x512xf32> to vector<32x512xf32>
      %15 = arith.mulf %12, %14 : vector<32x512xf32>
      %c0_13 = arith.constant 0 : index
      %c0_14 = arith.constant 0 : index
      %16 = vector.load %arg5[%c0_13, %c0_14] : memref<1x512xf32, #tpu.memory_space<vmem>>, vector<1x512xf32>
      %17 = vector.broadcast %16 : vector<1x512xf32> to vector<32x512xf32>
      %18 = arith.addf %15, %17 : vector<32x512xf32>
      %cst_15 = arith.constant 0.000000e+00 : f32
      %19 = vector.broadcast %cst_15 : f32 to vector<32x512xf32>
      %20 = arith.maximumf %18, %19 : vector<32x512xf32>
      %c0_16 = arith.constant 0 : index
      %c0_17 = arith.constant 0 : index
      %21 = vector.load %arg6[%c0_16, %c0_17] : memref<32x512xf32, #tpu.memory_space<vmem>>, vector<32x512xf32>
      tpu.vector_store %arg6[%c0_16, %c0_17], %20 {strides = array<i32>} : memref<32x512xf32, #tpu.memory_space<vmem>>, vector<32x512xf32>,
    } else {
    }
    return
  }
  func.func @transform_0(%arg0: i32, %arg1: i32) -> (i32, i32) {
    %c0_i32 = arith.constant 0 : i32
    return %arg0, %arg1 : i32, i32
  }
  func.func @transform_1(%arg0: i32, %arg1: i32) -> (i32, i32) {
    %c0_i32 = arith.constant 0 : i32
    %c0_i32_0 = arith.constant 0 : i32
    return %arg1, %c0_i32 : i32, i32
  }
  func.func @transform_2(%arg0: i32, %arg1: i32) -> (i32, i32) {
    %c0_i32 = arith.constant 0 : i32
    %c0_i32_0 = arith.constant 0 : i32
    %c0_i32_1 = arith.constant 0 : i32
    return %c0_i32, %c0_i32_0 : i32, i32
  }
  func.func @transform_3(%arg0: i32, %arg1: i32) -> (i32, i32) {
    %c0_i32 = arith.constant 0 : i32
    %c0_i32_0 = arith.constant 0 : i32
    %c0_i32_1 = arith.constant 0 : i32
    return %c0_i32, %c0_i32_0 : i32, i32
  }
  func.func @transform_4(%arg0: i32, %arg1: i32) -> (i32, i32) {
    %c0_i32 = arith.constant 0 : i32
    %c0_i32_0 = arith.constant 0 : i32
    return %arg0, %c0_i32 : i32, i32
  }
}

module attributes {stable_mosaic.version = 11 : i64} {
  func.func @kernel(%arg0: i32, %arg1: i32, %arg2: memref<2x512xbf16, #tpu.memory_space<vmem>>, %arg3: memref<512x512xbf16, #tpu.memory_space<vmem>>, %arg4: memref<1x512xf32, #tpu.memory_space<vmem>>, %arg5: memref<1x512xf32, #tpu.memory_space<vmem>>, %arg6: memref<2x512xf32, #tpu.memory_space<vmem>>) attributes {dimension_semantics = [#tpu.dimension_semantics<parallel>, #tpu.dimension_semantics<arbitrary>], iteration_bounds = array<i64: 1, 1>, scalar_prefetch = 0 : i64, scratch_operands = 0 : i64, tpu.core_type = #tpu.core_type<tc>, window_params = [{transform_indices = @transform_0, window_bounds = array<i64: 2, 512>}, {transform_indices = @transform_1, window_bounds = array<i64: 512, 512>}, {pipeline_mode = #tpu.pipeline_mode<synchronous>, transform_indices = @transform_2, window_bounds = array<i64: 1, 512>}, {pipeline_mode = #tpu.pipeline_mode<synchronous>, transform_indices = @transform_3, window_bounds = array<i64: 1, 512>}, {transform_indices = @transform_4, window_bounds = array<i64: 2, 512>}]} {
    %c0_i32 = arith.constant 0 : i32
    %0 = arith.cmpi eq, %arg1, %c0_i32 : i32
    %1 = arith.extui %0 : i1 to i32
    %c0_i32_0 = arith.constant 0 : i32
    %2 = arith.cmpi ne, %1, %c0_i32_0 : i32
    scf.if %2 {
      %cst_10 = arith.constant 0.000000e+00 : f32
      %12 = vector.broadcast %cst_10 : f32 to vector<2x512xf32>
      %c0_11 = arith.constant 0 : index
      %c0_12 = arith.constant 0 : index
      %13 = vector.load %arg6[%c0_11, %c0_12] : memref<2x512xf32, #tpu.memory_space<vmem>>, vector<2x512xf32>
      tpu.vector_store %arg6[%c0_11, %c0_12], %12 {strides = array<i32>} : memref<2x512xf32, #tpu.memory_space<vmem>>, vector<2x512xf32>,
    } else {
    }
    %c0 = arith.constant 0 : index
    %c0_1 = arith.constant 0 : index
    %3 = vector.load %arg6[%c0, %c0_1] : memref<2x512xf32, #tpu.memory_space<vmem>>, vector<2x512xf32>
    %c0_2 = arith.constant 0 : index
    %c0_3 = arith.constant 0 : index
    %4 = vector.load %arg2[%c0_2, %c0_3] : memref<2x512xbf16, #tpu.memory_space<vmem>>, vector<2x512xbf16>
    %c0_4 = arith.constant 0 : index
    %c0_5 = arith.constant 0 : index
    %5 = vector.load %arg3[%c0_4, %c0_5] : memref<512x512xbf16, #tpu.memory_space<vmem>>, vector<512x512xbf16>
    %cst = arith.constant dense<0.000000e+00> : vector<2x512xf32>
    %6 = tpu.matmul %4, %5, %cst {dimension_numbers = #tpu.dot_dimension_numbers<[1], [0], [0], [1], [0, 0, 1, 1], [], []>} : vector<2x512xbf16>, vector<512x512xbf16>, vector<2x512xf32> -> vector<2x512xf32>
    %7 = arith.addf %3, %6 : vector<2x512xf32>
    %c0_6 = arith.constant 0 : index
    %c0_7 = arith.constant 0 : index
    %8 = vector.load %arg6[%c0_6, %c0_7] : memref<2x512xf32, #tpu.memory_space<vmem>>, vector<2x512xf32>
    tpu.vector_store %arg6[%c0_6, %c0_7], %7 {strides = array<i32>} : memref<2x512xf32, #tpu.memory_space<vmem>>, vector<2x512xf32>,
    %c0_i32_8 = arith.constant 0 : i32
    %9 = arith.cmpi eq, %arg1, %c0_i32_8 : i32
    %10 = arith.extui %9 : i1 to i32
    %c0_i32_9 = arith.constant 0 : i32
    %11 = arith.cmpi ne, %10, %c0_i32_9 : i32
    scf.if %11 {
      %c0_10 = arith.constant 0 : index
      %c0_11 = arith.constant 0 : index
      %12 = vector.load %arg6[%c0_10, %c0_11] : memref<2x512xf32, #tpu.memory_space<vmem>>, vector<2x512xf32>
      %c0_12 = arith.constant 0 : index
      %c0_13 = arith.constant 0 : index
      %13 = vector.load %arg4[%c0_12, %c0_13] : memref<1x512xf32, #tpu.memory_space<vmem>>, vector<1x512xf32>
      %14 = vector.broadcast %13 : vector<1x512xf32> to vector<2x512xf32>
      %15 = arith.mulf %12, %14 : vector<2x512xf32>
      %c0_14 = arith.constant 0 : index
      %c0_15 = arith.constant 0 : index
      %16 = vector.load %arg5[%c0_14, %c0_15] : memref<1x512xf32, #tpu.memory_space<vmem>>, vector<1x512xf32>
      %17 = vector.broadcast %16 : vector<1x512xf32> to vector<2x512xf32>
      %18 = arith.addf %15, %17 : vector<2x512xf32>
      %cst_16 = arith.constant 0.000000e+00 : f32
      %19 = vector.broadcast %cst_16 : f32 to vector<2x512xf32>
      %20 = arith.maximumf %18, %19 : vector<2x512xf32>
      %c0_17 = arith.constant 0 : index
      %c0_18 = arith.constant 0 : index
      %21 = vector.load %arg6[%c0_17, %c0_18] : memref<2x512xf32, #tpu.memory_space<vmem>>, vector<2x512xf32>
      tpu.vector_store %arg6[%c0_17, %c0_18], %20 {strides = array<i32>} : memref<2x512xf32, #tpu.memory_space<vmem>>, vector<2x512xf32>,
    } else {
    }
    return
  }
  func.func @transform_0(%arg0: i32, %arg1: i32) -> (i32, i32) {
    %c0_i32 = arith.constant 0 : i32
    return %arg0, %arg1 : i32, i32
  }
  func.func @transform_1(%arg0: i32, %arg1: i32) -> (i32, i32) {
    %c0_i32 = arith.constant 0 : i32
    %c0_i32_0 = arith.constant 0 : i32
    return %arg1, %c0_i32 : i32, i32
  }
  func.func @transform_2(%arg0: i32, %arg1: i32) -> (i32, i32) {
    %c0_i32 = arith.constant 0 : i32
    %c0_i32_0 = arith.constant 0 : i32
    %c0_i32_1 = arith.constant 0 : i32
    return %c0_i32, %c0_i32_0 : i32, i32
  }
  func.func @transform_3(%arg0: i32, %arg1: i32) -> (i32, i32) {
    %c0_i32 = arith.constant 0 : i32
    %c0_i32_0 = arith.constant 0 : i32
    %c0_i32_1 = arith.constant 0 : i32
    return %c0_i32, %c0_i32_0 : i32, i32
  }
  func.func @transform_4(%arg0: i32, %arg1: i32) -> (i32, i32) {
    %c0_i32 = arith.constant 0 : i32
    %c0_i32_0 = arith.constant 0 : i32
    return %arg0, %c0_i32 : i32, i32
  }
}

</mosaic_0001>

<bundles_post_ra>
// kernel: feature_embedder_forward.6
= control target key start
LH: loop header
LB: loop body
LE: loop exit
PB: predicated region body
PF: predicated region fallthrough
CT: control target
= control target key end

     0   :  { %9 = vsyncpa [#allocation3], 0  ;;  %s1092_s0 = inlined_call_operand.vmem [shape: bf16[32,256], index: 0, kind: input, shape index: {}]   ;;  %s1093_s1 = inlined_call_operand.hbm [shape: bf16[256,512], index: 1, kind: input, shape index: {}]   ;;  %s1094_s2 = inlined_call_operand.hbm [shape: f32[1,512], index: 2, kind: input, shape index: {}]   ;;  %s1095_s3 = inlined_call_operand.hbm [shape: f32[1,512], index: 3, kind: input, shape index: {}]   ;;  %s1096_s4 = inlined_call_operand.vmem [shape: f32[32,512], index: 4, kind: output, shape index: {}]  }
   0x1   :  { %10 = vsyncpa [#allocation5], 0  ;;  %s993_s15 = smov [#allocation4]   ;;  %s994_s17 = smov [#allocation2]  }
   0x2   :  { %s31_s16 = sshll.u32 %s993_s15, 4  ;;  %s18_s18 = sshll.u32 %s994_s17, 4  ;;  %s32_s16 = int_to_ptr.vmem [resolvable:$true] %s31_s16  ;;  %s19_s18 = int_to_ptr.vmem [resolvable:$true] %s18_s18 }
   0x3   :  { %s937_s19 = scalar_lea.vmem %s32_s16, 64  ;;  %p942_p1 = scmp.lt.s32.totalorder %s32_s16, %s32_s16 }
   0x4   :  { %p938_p0 = scmp.ne.s32.totalorder %s32_s16, %s937_s19  ;;  %p943_p2 = scmp.lt.s32.totalorder %s937_s19, %s937_s19 }
   0x6   :  { %p944_p3 = por %p943_p2, %p942_p1 }
   0x8   :  { %p945_p4 = pnand %p944_p3, %p938_p0 }
   0xa   :  { %948 = shalt.err (!%p945_p4)
}
   0xb   :  { %34 = dma.hbm_to_vmem [thread:$0]  %s1094_s2, 64, %s32_s16, [#allocation5]  }
   0xc   :  { %s957_s22 = scalar_lea.vmem %s19_s18, 8192  ;;  %p962_p6 = scmp.lt.s32.totalorder %s19_s18, %s19_s18 }
   0xd   :  { %p958_p5 = scmp.ne.s32.totalorder %s19_s18, %s957_s22  ;;  %p963_p7 = scmp.lt.s32.totalorder %s957_s22, %s957_s22 }
   0xf   :  { %p964_p8 = por %p963_p7, %p962_p6 }
  0x11   :  { %p965_p9 = pnand %p964_p8, %p958_p5 }
  0x13   :  { %968 = shalt.err (!%p965_p9)
}
  0x14   :  { %s995_s23 = smov 256   ;;  %s996_s24 = smov 16  }
  0x15   :  { %24 = dma.hbm_to_vmem [thread:$0]  %s1093_s1, 8192, %s19_s18, [#allocation3], %s995_s23, %s995_s23, %s996_s24  }
  0x16   :  { %s997_s27 = smov [#allocation6]  }
  0x17   :  { %s41_s28 = sshll.u32 %s997_s27, 4  ;;  %s42_s28 = int_to_ptr.vmem [resolvable:$true] %s41_s28 }
  0x18   :  { %s977_s29 = scalar_lea.vmem %s42_s28, 64  ;;  %p982_p11 = scmp.lt.s32.totalorder %s42_s28, %s42_s28 }
  0x19   :  { %p978_p10 = scmp.ne.s32.totalorder %s42_s28, %s977_s29  ;;  %p983_p12 = scmp.lt.s32.totalorder %s977_s29, %s977_s29 }
  0x1b   :  { %p984_p13 = por %p983_p12, %p982_p11 }
  0x1d   :  { %p985_p0 = pnand %p984_p13, %p978_p10 }
  0x1f   :  { %988 = shalt.err (!%p985_p0)
}
  0x20   :  { %44 = dma.hbm_to_vmem [thread:$0]  %s1095_s3, 64, %s42_s28, [#allocation5]  }
  0x21   :  { %989 = dma.done.wait [#allocation3], 8192  }
  0x22   :  { %990 = vsyncadd [#allocation3], 4294959104 }
  0x23   :  { %991 = dma.done.wait [#allocation5], 128  }
  0x24   :  { %992 = vsyncadd [#allocation5], 4294967168  ;;  %v827_v0 = vld [vmem:[#allocation2 + $0xe4] ss:$16 sps:$4 sm:$0xff]   ;;  %v829_v1 = vld [vmem:[#allocation2 + $0xec] ss:$16 sps:$4 sm:$0xff]  }
  0x25   :  { %498 = vmatprep.subr.bf16.mxu0 %v827_v0  ;;  %v831_v2 = vld [vmem:[#allocation2 + $0xe0] ss:$16 sps:$4 sm:$0xff]   ;;  %v832_v3 = vld [vmem:[#allocation2 + $0xe8] ss:$16 sps:$4 sm:$0xff]   ;;  %551 = vmatprep.subr.bf16.mxu1 %v829_v1  ;;  %v833_v4 = vld [vmem:[#allocation2 + $0xc4] ss:$16 sps:$4 sm:$0xff]  }
  0x26   :  { %499 = vmatpush1.bf16.msra.mxu0 %v831_v2  ;;  %552 = vmatpush1.bf16.msra.mxu1 %v832_v3  ;;  %v835_v5 = vld [vmem:[#allocation2 + $0xcc] ss:$16 sps:$4 sm:$0xff]   ;;  %v837_v6 = vld [vmem:[#allocation2 + $0xc0] ss:$16 sps:$4 sm:$0xff]   ;;  %v838_v7 = vld [vmem:[#allocation2 + $0xc8] ss:$16 sps:$4 sm:$0xff]  }
  0x27   :  { %500 = vmatprep.subr.bf16.mxu0 %v833_v4  ;;  %553 = vmatprep.subr.bf16.mxu1 %v835_v5  ;;  %v839_v8 = vld [vmem:[#allocation2 + $0xa4] ss:$16 sps:$4 sm:$0xff]   ;;  %v841_v9 = vld [vmem:[#allocation2 + $0xac] ss:$16 sps:$4 sm:$0xff]   ;;  %v843_v10 = vld [vmem:[#allocation2 + $0xa0] ss:$16 sps:$4 sm:$0xff]   ;;  %v657_v4 = vlaneseq }
  0x28   :  { %v844_v11 = vld [vmem:[#allocation2 + $0xa8] ss:$16 sps:$4 sm:$0xff]   ;;  %v845_v12 = vld [vmem:[#allocation2 + $0x84] ss:$16 sps:$4 sm:$0xff]   ;;  %v847_v13 = vld [vmem:[#allocation2 + $0x8c] ss:$16 sps:$4 sm:$0xff]  }
  0x29   :  { %v849_v14 = vld [vmem:[#allocation2 + $0x80] ss:$16 sps:$4 sm:$0xff]   ;;  %v850_v15 = vld [vmem:[#allocation2 + $0x88] ss:$16 sps:$4 sm:$0xff]   ;;  %v851_v16 = vld [vmem:[#allocation2 + $0x64] ss:$16 sps:$4 sm:$0xff]  }
  0x2a   :  { %501 = vmatpush1.bf16.msra.mxu0 %v837_v6  ;;  %554 = vmatpush1.bf16.msra.mxu1 %v838_v7  ;;  %v853_v17 = vld [vmem:[#allocation2 + $0x6c] ss:$16 sps:$4 sm:$0xff]   ;;  %v855_v18 = vld [vmem:[#allocation2 + $0x60] ss:$16 sps:$4 sm:$0xff]   ;;  %v856_v19 = vld [vmem:[#allocation2 + $0x68] ss:$16 sps:$4 sm:$0xff]  }
  0x2b   :  { %502 = vmatprep.subr.bf16.mxu0 %v839_v8  ;;  %555 = vmatprep.subr.bf16.mxu1 %v841_v9  ;;  %v857_v20 = vld [vmem:[#allocation2 + $0x44] ss:$16 sps:$4 sm:$0xff]   ;;  %v859_v21 = vld [vmem:[#allocation2 + $0x4c] ss:$16 sps:$4 sm:$0xff]   ;;  %v861_v22 = vld [vmem:[#allocation2 + $0x40] ss:$16 sps:$4 sm:$0xff]  }
  0x2c   :  { %v862_v23 = vld [vmem:[#allocation2 + $0x48] ss:$16 sps:$4 sm:$0xff]   ;;  %v863_v24 = vld [vmem:[#allocation2 + $0x24] ss:$16 sps:$4 sm:$0xff]   ;;  %v865_v25 = vld [vmem:[#allocation2 + $0x2c] ss:$16 sps:$4 sm:$0xff]  }
  0x2d   :  { %v867_v26 = vld [vmem:[#allocation2 + $0x20] ss:$16 sps:$4 sm:$0xff]   ;;  %v868_v27 = vld [vmem:[#allocation2 + $0x28] ss:$16 sps:$4 sm:$0xff]   ;;  %v869_v28 = vld [vmem:[#allocation2 + $0x4] ss:$16 sps:$4 sm:$0xff]  }
  0x2e   :  { %503 = vmatpush1.bf16.msra.mxu0 %v843_v10  ;;  %556 = vmatpush1.bf16.msra.mxu1 %v844_v11  ;;  %v871_v29 = vld [vmem:[#allocation2 + $0xc] ss:$16 sps:$4 sm:$0xff]   ;;  %v873_v30 = vld [vmem:[#allocation2] ss:$16 sps:$4 sm:$0xff]   ;;  %v874_v31 = vld [vmem:[#allocation2 + $0x8] ss:$16 sps:$4 sm:$0xff]  }
  0x2f   :  { %504 = vmatprep.subr.bf16.mxu0 %v845_v12  ;;  %557 = vmatprep.subr.bf16.mxu1 %v847_v13  ;;  %v875_v32 = vld [vmem:[#allocation2 + $0x1e4] ss:$16 sps:$4 sm:$0xff]   ;;  %v877_v33 = vld [vmem:[#allocation2 + $0x1ec] ss:$16 sps:$4 sm:$0xff]   ;;  %v879_v34 = vld [vmem:[#allocation2 + $0x1e0] ss:$16 sps:$4 sm:$0xff]  }
  0x30   :  { %v880_v35 = vld [vmem:[#allocation2 + $0x1e8] ss:$16 sps:$4 sm:$0xff]   ;;  %v881_v36 = vld [vmem:[#allocation2 + $0x1c4] ss:$16 sps:$4 sm:$0xff]   ;;  %v883_v37 = vld [vmem:[#allocation2 + $0x1cc] ss:$16 sps:$4 sm:$0xff]  }
  0x31   :  { %v885_v38 = vld [vmem:[#allocation2 + $0x1c0] ss:$16 sps:$4 sm:$0xff]   ;;  %v886_v39 = vld [vmem:[#allocation2 + $0x1c8] ss:$16 sps:$4 sm:$0xff]   ;;  %v887_v40 = vld [vmem:[#allocation2 + $0x1a4] ss:$16 sps:$4 sm:$0xff]  }
  0x32   :  { %505 = vmatpush1.bf16.msra.mxu0 %v849_v14  ;;  %558 = vmatpush1.bf16.msra.mxu1 %v850_v15  ;;  %v889_v41 = vld [vmem:[#allocation2 + $0x1ac] ss:$16 sps:$4 sm:$0xff]   ;;  %v891_v42 = vld [vmem:[#allocation2 + $0x1a0] ss:$16 sps:$4 sm:$0xff]   ;;  %v892_v43 = vld [vmem:[#allocation2 + $0x1a8] ss:$16 sps:$4 sm:$0xff]  }
  0x33   :  { %506 = vmatprep.subr.bf16.mxu0 %v851_v16  ;;  %559 = vmatprep.subr.bf16.mxu1 %v853_v17  ;;  %v893_v44 = vld [vmem:[#allocation2 + $0x184] ss:$16 sps:$4 sm:$0xff]   ;;  %v895_v45 = vld [vmem:[#allocation2 + $0x18c] ss:$16 sps:$4 sm:$0xff]   ;;  %v897_v46 = vld [vmem:[#allocation2 + $0x180] ss:$16 sps:$4 sm:$0xff]  }
  0x34   :  { %v925_v47 = vld [vmem:[%s1092_s0 + $0x4] ss:$8 sps:$4 sm:$0xff]   ;;  %v898_v48 = vld [vmem:[#allocation2 + $0x188] ss:$16 sps:$4 sm:$0xff]   ;;  %v903_v51 = vld [vmem:[#allocation2 + $0x160] ss:$16 sps:$4 sm:$0xff]  }
  0x35   :  { %v899_v49 = vld [vmem:[#allocation2 + $0x164] ss:$16 sps:$4 sm:$0xff]   ;;  %v901_v50 = vld [vmem:[#allocation2 + $0x16c] ss:$16 sps:$4 sm:$0xff]   ;;  %530 = vmatprep.mubr.bf16.mxu0 %v925_v47  ;;  %583 = vmatprep.mubr.bf16.mxu1 %v925_v47  ;;  %v904_v52 = vld [vmem:[#allocation2 + $0x168] ss:$16 sps:$4 sm:$0xff]  }
  0x36   :  { %507 = vmatpush1.bf16.msra.mxu0 %v855_v18  ;;  %560 = vmatpush1.bf16.msra.mxu1 %v856_v19  ;;  %v905_v53 = vld [vmem:[#allocation2 + $0x144] ss:$16 sps:$4 sm:$0xff]   ;;  %v907_v54 = vld [vmem:[#allocation2 + $0x14c] ss:$16 sps:$4 sm:$0xff]   ;;  %v909_v55 = vld [vmem:[#allocation2 + $0x140] ss:$16 sps:$4 sm:$0xff]  }
  0x37   :  { %508 = vmatprep.subr.bf16.mxu0 %v857_v20  ;;  %561 = vmatprep.subr.bf16.mxu1 %v859_v21  ;;  %v910_v56 = vld [vmem:[#allocation2 + $0x148] ss:$16 sps:$4 sm:$0xff]   ;;  %v911_v57 = vld [vmem:[#allocation2 + $0x124] ss:$16 sps:$4 sm:$0xff]   ;;  %v913_v58 = vld [vmem:[#allocation2 + $0x12c] ss:$16 sps:$4 sm:$0xff]  }
  0x38   :  { %v915_v59 = vld [vmem:[#allocation2 + $0x120] ss:$16 sps:$4 sm:$0xff]   ;;  %v916_v60 = vld [vmem:[#allocation2 + $0x128] ss:$16 sps:$4 sm:$0xff]   ;;  %v917_v61 = vld [vmem:[#allocation2 + $0x104] ss:$16 sps:$4 sm:$0xff]  }
  0x39   :  { %v919_v62 = vld [vmem:[#allocation2 + $0x10c] ss:$16 sps:$4 sm:$0xff]   ;;  %v921_v63 = vld [vmem:[#allocation2 + $0x100] ss:$16 sps:$4 sm:$0xff]   ;;  %v922_v0 = vld [vmem:[#allocation2 + $0x108] ss:$16 sps:$4 sm:$0xff]  }
  0x3a   :  { %509 = vmatpush1.bf16.msra.mxu0 %v861_v22  ;;  %562 = vmatpush1.bf16.msra.mxu1 %v862_v23  ;;  %v923_v1 = vld [vmem:[%s1092_s0] ss:$8 sps:$4 sm:$0xff]   ;;  %v926_v2 = vld [vmem:[%s1092_s0 + $0x14] ss:$8 sps:$4 sm:$0xff]   ;;  %v928_v3 = vld [vmem:[%s1092_s0 + $0x10] ss:$8 sps:$4 sm:$0xff]  }
  0x3b   :  { %510 = vmatprep.subr.bf16.mxu0 %v863_v24  ;;  %563 = vmatprep.subr.bf16.mxu1 %v865_v25  ;;  %v658_v5 = vshrl.u32 %v657_v4, 7  ;;  %v655_v8 = vld [vmem:[#allocation4] sm:$0xf]  ;;  %v693_v9 = vld [vmem:[#allocation6] sm:$0xf] }
  0x3d   :  { %v659_v6 = vsub.s32 0, %v658_v5  ;;  %v667_v7 = vsub.s32 2, %v658_v5  ;;  %v663_v10 = vsub.s32 1, %v658_v5  ;;  %v671_v11 = vsub.s32 3, %v658_v5 }
  0x3e   :  { %511 = vmatpush1.bf16.msra.mxu0 %v867_v26  ;;  %564 = vmatpush1.bf16.msra.mxu1 %v868_v27 }
  0x3f   :  { %512 = vmatprep.subr.bf16.mxu0 %v869_v28  ;;  %565 = vmatprep.subr.bf16.mxu1 %v871_v29  ;;  %v660_v12 = vrot.slane %v655_v8, %v659_v6  ;;  %v668_v13 = vrot.slane %v655_v8, %v667_v7  ;;  %v698_v15 = vrot.slane %v693_v9, %v659_v6 }
  0x40   :  { %v706_v17 = vrot.slane %v693_v9, %v667_v7  ;;  %v664_v18 = vrot.slane %v655_v8, %v663_v10  ;;  %v672_v19 = vrot.slane %v655_v8, %v671_v11  ;;  %v702_v21 = vrot.slane %v693_v9, %v663_v10 }
  0x41   :  { %v710_v23 = vrot.slane %v693_v9, %v671_v11 }
  0x42   :  { %513 = vmatpush1.bf16.msra.mxu0 %v873_v30  ;;  %566 = vmatpush1.bf16.msra.mxu1 %v874_v31 }
  0x43   :  { %514 = vmatprep.subr.bf16.mxu0 %v875_v32  ;;  %567 = vmatprep.subr.bf16.mxu1 %v877_v33 }
  0x46   :  { %515 = vmatpush2.bf16.msra.mxu0 %v879_v34  ;;  %568 = vmatpush2.bf16.msra.mxu1 %v880_v35 }
  0x47   :  { %516 = vmatprep.subr.bf16.mxu0 %v881_v36  ;;  %569 = vmatprep.subr.bf16.mxu1 %v883_v37 }
  0x4a   :  { %517 = vmatpush2.bf16.msra.mxu0 %v885_v38  ;;  %570 = vmatpush2.bf16.msra.mxu1 %v886_v39 }
  0x4b   :  { %518 = vmatprep.subr.bf16.mxu0 %v887_v40  ;;  %571 = vmatprep.subr.bf16.mxu1 %v889_v41 }
  0x4e   :  { %519 = vmatpush2.bf16.msra.mxu0 %v891_v42  ;;  %572 = vmatpush2.bf16.msra.mxu1 %v892_v43 }
  0x4f   :  { %520 = vmatprep.subr.bf16.mxu0 %v893_v44  ;;  %573 = vmatprep.subr.bf16.mxu1 %v895_v45 }
  0x52   :  { %521 = vmatpush2.bf16.msra.mxu0 %v897_v46  ;;  %574 = vmatpush2.bf16.msra.mxu1 %v898_v48 }
  0x53   :  { %522 = vmatprep.subr.bf16.mxu0 %v899_v49  ;;  %575 = vmatprep.subr.bf16.mxu1 %v901_v50 }
  0x56   :  { %523 = vmatpush2.bf16.msra.mxu0 %v903_v51  ;;  %576 = vmatpush2.bf16.msra.mxu1 %v904_v52 }
  0x57   :  { %524 = vmatprep.subr.bf16.mxu0 %v905_v53  ;;  %577 = vmatprep.subr.bf16.mxu1 %v907_v54 }
  0x5a   :  { %525 = vmatpush2.bf16.msra.mxu0 %v909_v55  ;;  %578 = vmatpush2.bf16.msra.mxu1 %v910_v56 }
  0x5b   :  { %526 = vmatprep.subr.bf16.mxu0 %v911_v57  ;;  %579 = vmatprep.subr.bf16.mxu1 %v913_v58 }
  0x5e   :  { %527 = vmatpush2.bf16.msra.mxu0 %v915_v59  ;;  %580 = vmatpush2.bf16.msra.mxu1 %v916_v60 }
  0x5f   :  { %528 = vmatprep.subr.bf16.mxu0 %v917_v61  ;;  %581 = vmatprep.subr.bf16.mxu1 %v919_v62 }
  0x62   :  { %529 = vmatpush2.bf16.msra.mxu0 %v921_v63  ;;  %582 = vmatpush2.bf16.msra.mxu1 %v922_v0 }
  0x65   :  { %531 = vmatmul.mubr.bf16.vlgmr.msra.gmra.mxu0 %v923_v1  ;;  %584 = vmatmul.mubr.bf16.vlgmr.msra.gmra.mxu1 %v923_v1 }
  0x66   :  { %540 = vmatprep.mubr.bf16.mxu0 %v926_v2  ;;  %593 = vmatprep.mubr.bf16.mxu1 %v926_v2 }
  0x6d   :  { %541 = vmatmul.mubr.bf16.gmra.mxu0 %v928_v3  ;;  %594 = vmatmul.mubr.bf16.gmra.mxu1 %v928_v3 }
 0x125   :  { %v532_v14 = vpop.f32.mrf.mxu0  ;;  %v585_v16 = vpop.f32.mrf.mxu1 }
 0x126   :  { %v677_v24 = vmul.f32 %v660_v12, %v532_v14  ;;  %v679_v25 = vmul.f32 %v668_v13, %v585_v16 }
 0x127   :  { %v534_v20 = vpop.f32.mrf.mxu0  ;;  %v587_v22 = vpop.f32.mrf.mxu1 }
 0x128   :  { %v715_v28 = vadd.f32 %v698_v15, %v677_v24  ;;  %v717_v29 = vadd.f32 %v706_v17, %v679_v25  ;;  %v678_v30 = vmul.f32 %v664_v18, %v534_v20  ;;  %v680_v31 = vmul.f32 %v672_v19, %v587_v22 }
 0x129   :  { %v536_v26 = vpop.f32.mrf.mxu0  ;;  %v589_v27 = vpop.f32.mrf.mxu1 }
 0x12a   :  { %731 = vst [vmem:[%s1096_s4] sm:$0xff] %v715_v28  ;;  %733 = vst [vmem:[%s1096_s4 + $0x10] sm:$0xff] %v717_v29  ;;  %v716_v34 = vadd.f32 %v702_v21, %v678_v30  ;;  %v718_v35 = vadd.f32 %v710_v23, %v680_v31  ;;  %v681_v36 = vmul.f32 %v660_v12, %v536_v26 }
 0x12b   :  { %v538_v32 = vpop.f32.mrf.mxu0  ;;  %v591_v33 = vpop.f32.mrf.mxu1  ;;  %v683_v37 = vmul.f32 %v668_v13, %v589_v27 }
 0x12c   :  { %732 = vst [vmem:[%s1096_s4 + $0x8] sm:$0xff] %v716_v34  ;;  %734 = vst [vmem:[%s1096_s4 + $0x18] sm:$0xff] %v718_v35  ;;  %v682_v40 = vmul.f32 %v664_v18, %v538_v32  ;;  %v684_v41 = vmul.f32 %v672_v19, %v591_v33  ;;  %v719_v42 = vadd.f32 %v698_v15, %v681_v36 }
 0x12d   :  { %v542_v38 = vpop.f32.mrf.mxu0  ;;  %v595_v39 = vpop.f32.mrf.mxu1  ;;  %v721_v43 = vadd.f32 %v706_v17, %v683_v37 }
 0x12e   :  { %v720_v46 = vadd.f32 %v702_v21, %v682_v40  ;;  %v722_v47 = vadd.f32 %v710_v23, %v684_v41  ;;  %v685_v48 = vmul.f32 %v660_v12, %v542_v38  ;;  %v687_v49 = vmul.f32 %v668_v13, %v595_v39  ;;  %735 = vst [vmem:[%s1096_s4 + $0x20] sm:$0xff] %v719_v42 }
 0x12f   :  { %v544_v44 = vpop.f32.mrf.mxu0  ;;  %v597_v45 = vpop.f32.mrf.mxu1  ;;  %737 = vst [vmem:[%s1096_s4 + $0x30] sm:$0xff] %v721_v43 }
 0x130   :  { %736 = vst [vmem:[%s1096_s4 + $0x28] sm:$0xff] %v720_v46  ;;  %738 = vst [vmem:[%s1096_s4 + $0x38] sm:$0xff] %v722_v47  ;;  %v723_v52 = vadd.f32 %v698_v15, %v685_v48  ;;  %v725_v53 = vadd.f32 %v706_v17, %v687_v49  ;;  %v686_v54 = vmul.f32 %v664_v18, %v544_v44 }
 0x131   :  { %v546_v50 = vpop.f32.mrf.mxu0  ;;  %v599_v51 = vpop.f32.mrf.mxu1  ;;  %v688_v55 = vmul.f32 %v672_v19, %v597_v45 }
 0x132   :  { %739 = vst [vmem:[%s1096_s4 + $0x40] sm:$0xff] %v723_v52  ;;  %741 = vst [vmem:[%s1096_s4 + $0x50] sm:$0xff] %v725_v53  ;;  %v689_v58 = vmul.f32 %v660_v12, %v546_v50  ;;  %v691_v59 = vmul.f32 %v668_v13, %v599_v51  ;;  %v724_v60 = vadd.f32 %v702_v21, %v686_v54 }
 0x133   :  { %v548_v56 = vpop.f32.mrf.mxu0  ;;  %v601_v57 = vpop.f32.mrf.mxu1  ;;  %v726_v61 = vadd.f32 %v710_v23, %v688_v55 }
 0x134   :  { %v727_v62 = vadd.f32 %v698_v15, %v689_v58  ;;  %v729_v63 = vadd.f32 %v706_v17, %v691_v59  ;;  %v690_v0 = vmul.f32 %v664_v18, %v548_v56  ;;  %v692_v1 = vmul.f32 %v672_v19, %v601_v57  ;;  %740 = vst [vmem:[%s1096_s4 + $0x48] sm:$0xff] %v724_v60 }
 0x135   :  { %742 = vst [vmem:[%s1096_s4 + $0x58] sm:$0xff] %v726_v61 }
 0x136   :  { %743 = vst [vmem:[%s1096_s4 + $0x60] sm:$0xff] %v727_v62  ;;  %745 = vst [vmem:[%s1096_s4 + $0x70] sm:$0xff] %v729_v63  ;;  %v728_v2 = vadd.f32 %v702_v21, %v690_v0  ;;  %v730_v3 = vadd.f32 %v710_v23, %v692_v1 }
 0x138   :  { %744 = vst [vmem:[%s1096_s4 + $0x68] sm:$0xff] %v728_v2  ;;  %746 = vst [vmem:[%s1096_s4 + $0x78] sm:$0xff] %v730_v3 }
 0x139   :  { %751 = vsyncpa [#allocation3], 1 }
 0x13a   :  { %752 = vsyncpa [#allocation5], 1 }

// kernel: feature_embedder_forward.7
= control target key start
LH: loop header
LB: loop body
LE: loop exit
PB: predicated region body
PF: predicated region fallthrough
CT: control target
= control target key end

     0   :  { %9 = vsyncpa [#allocation4], 0  ;;  %s2043_s0 = inlined_call_operand.vmem [shape: bf16[32,2304], index: 0, kind: input, shape index: {}]   ;;  %s2044_s1 = inlined_call_operand.hbm [shape: bf16[2304,512], index: 1, kind: input, shape index: {}]   ;;  %s2045_s2 = inlined_call_operand.hbm [shape: f32[1,512], index: 2, kind: input, shape index: {}]   ;;  %s2046_s3 = inlined_call_operand.hbm [shape: f32[1,512], index: 3, kind: input, shape index: {}]   ;;  %s2047_s4 = inlined_call_operand.vmem [shape: f32[32,512], index: 4, kind: output, shape index: {}]  }
   0x1   :  { %11 = vsyncpa [#allocation4 + $0x1], 0 }
   0x2   :  { %12 = vsyncpa [#allocation6], 0  ;;  %s1595_s15 = smov 0   ;;  %s1597_s16 = smov 0  }
   0x3   :  { %s1599_s17 = smov 0   ;;  %s1601_s18 = smov 0  }
   0x4   :  { %s1603_s19 = smov 0   ;;  %s1605_s20 = smov 0  }
   0x5 LB: > { %s1160_s21 = sadd.s32 4294967295, %s1562_s20   ;;  %s27_s22 = sadd.s32 1, %s1558_s19  ;;  %s1562_s20 = sphi %s1605_s20, %s18_s20   ;;  %s1558_s19 = sphi %s1603_s19, %s2067_s19   ;;  %s1554_s18 = sphi %s1601_s18, %s2066_s18   ;;  %s1550_s17 = sphi %s1599_s17, %s2065_s17   ;;  %s1546_s16 = sphi %s1597_s16, %s2064_s16   ;;  %s1542_s15 = sphi %s1595_s15, %s2063_s15  }
   0x6   : > { %p28_p0 = scmp.ge.s32.totalorder %s27_s22, 9  ;;  %s39_s23 = sadd.s32 1, %s1550_s17 }
   0x7   : > { %p46_p1 = scmp.ne.s32.totalorder %s1550_s17, %s1546_s16  ;;  %p47_p2 = scmp.eq.s32.totalorder %s1562_s20, 0 }
   0x8   : > { %s2069_s22 = smov (%p28_p0, %s27_s22), 0  ;;  %p78_p4 = scmp.ne.s32.totalorder %s1546_s16, %s1542_s15 }
   0x9   : > { %p1631_p3 = por %p47_p2, %p46_p1  ;;  %s35_s25 = ssub.s32 %s1558_s19, %s2069_s22 }
   0xa   : > { %p1638_p5 = scmp.eq.s32.totalorder %s1160_s21, 0  ;;  %p37_p6 = scmp.eq.s32.totalorder %s35_s25, 0 }
   0xb   : > { %s2053_s24 = scalar_select %p1631_p3, 1, 0 }
   0xc   : > { %s2054_s26 = scalar_select %p1638_p5, 1, 0 }
   0xd   : > { %p1161_p7 = scmp.ge.s32.totalorder %s1562_s20, 1  ;;  %p1645_p8 = por %p1638_p5, %p78_p4 }
   0xe   : > { %p157_p9 = scmp.lt.s32.totalorder %s1562_s20, 10  ;;  %s1564_s30 = smov [#allocation5]  }
   0xf   : > { %s2055_s27 = scalar_select %p1645_p8, 1, 0 }
  0x10   : > { %s1651_s28 = scalar_select %p37_p6, %s1550_s17, %s39_s23  }
  0x11   : > { %p1653_p10 = pnand %p1161_p7, %p157_p9  ;;  %s170_s5 = sshll.u32 %s1564_s30, 4  ;;  %s171_s5 = int_to_ptr.vmem [resolvable:$true] %s170_s5 }
  0x12   : > { %s1565_s6 = smov [#allocation7]   ;;  %s1441_s9 = scalar_lea.vmem %s171_s5, 64 }
  0x13   : > { %s2056_s29 = scalar_select %p1653_p10, 1, 0 }
  0x14   : > { %p1264_p11 = pneg %p1653_p10  ;;  %s181_s7 = sshll.u32 %s1565_s6, 4  ;;  %s182_s7 = int_to_ptr.vmem [resolvable:$true] %s181_s7 }
  0x15   : > { %p1442_p0 = scmp.ne.s32.totalorder %s171_s5, %s1441_s9  ;;  %p1449_p4 = scmp.lt.s32.totalorder %s171_s5, %s171_s5 }
  0x16   : > { %p1661_p12 = pnand %p1264_p11, %p1638_p5  ;;  %p1450_p6 = scmp.lt.s32.totalorder %s1441_s9, %s1441_s9 }
  0x18   : > { %p1432_p13 = pneg %p1661_p12  ;;  %p1451_p7 = por %p1450_p6, %p1449_p4 }
  0x1a   : > { %p1444_p1 = pnand %p1442_p0, %p1432_p13 }
  0x1c   : > { %p1445_p2 = pneg %p1444_p1 }
  0x1e   : > { %p1452_p9 = pnand %p1451_p7, %p1445_p2 }
  0x20   : > { %1455 = shalt.err (!%p1452_p9)
}
  0x21   : > { %1267 = dma.hbm_to_vmem [thread:$0]  (!%p1661_p12), %s2045_s2, 64, %s171_s5, [#allocation6]  }
  0x22   : > { %s1467_s12 = scalar_lea.vmem %s182_s7, 64  ;;  %p1475_p0 = scmp.lt.s32.totalorder %s182_s7, %s182_s7 }
  0x23   : > { %p1468_p11 = scmp.ne.s32.totalorder %s182_s7, %s1467_s12  ;;  %p1476_p1 = scmp.lt.s32.totalorder %s1467_s12, %s1467_s12 }
  0x25   : > { %p1470_p5 = pnand %p1468_p11, %p1432_p13  ;;  %p1477_p10 = por %p1476_p1, %p1475_p0 }
  0x27   : > { %p1471_p8 = pneg %p1470_p5 }
  0x29   : > { %p1478_p3 = pnand %p1477_p10, %p1471_p8 }
  0x2b   : > { %1481 = shalt.err (!%p1478_p3)
}
  0x2c   : > { %1270 = dma.hbm_to_vmem [thread:$0]  (!%p1661_p12), %s2046_s3, 64, %s182_s7, [#allocation6]  }
  0x2d   : > { %p1164_p2 = scmp.ge.s32.totalorder %s1562_s20, 9 }
  0x2e   : > { %p2058_p4 = scmp.ne.s32.totalorder (!%p1164_p2), %s2053_s24, 0 }
  0x2f   : > { %188 = sbr.rel (%p1164_p2) target bundleno = 74 (0x4a), region = 24 }
  0x34   : > { %191 = sbr.rel (!%p2058_p4) target bundleno = 58 (0x3a), region = 28  ;;  %s193_s15 = sand.u32 (%p2058_p4), 1, %s1550_s17  }
  0x35   : > { %s1251_s21 = sshll.u32 (%p2058_p4), %s1558_s19, 3  ;;  %s1165_s23 = sshll.u32 (%p2058_p4), %s193_s15, 5 }
  0x36   : > { %s201_s5 = scalar_lea.vmem (%p2058_p4), %s2043_s0, %s1251_s21  ;;  %s195_s6 = scalar_lea.vmem (%p2058_p4), [#allocation2], %s1165_s23 }
  0x37   : > { %v236_v0 = vld [vmem:[%s201_s5] sm:$0xff] (%p2058_p4)  ;;  %v238_v1 = vld [vmem:[%s201_s5 + $0x48] sm:$0xff] (%p2058_p4)  ;;  %v240_v2 = vld [vmem:[%s201_s5 + $0x90] sm:$0xff] (%p2058_p4) }
  0x38   : > { %237 = vst [vmem:[%s195_s6] sm:$0xff] (%p2058_p4), %v236_v0  ;;  %239 = vst [vmem:[%s195_s6 + $0x8] sm:$0xff] (%p2058_p4), %v238_v1  ;;  %v242_v3 = vld [vmem:[%s201_s5 + $0xd8] sm:$0xff] (%p2058_p4) }
  0x39   : > { %241 = vst [vmem:[%s195_s6 + $0x10] sm:$0xff] %v240_v2  ;;  %243 = vst [vmem:[%s195_s6 + $0x18] sm:$0xff] %v242_v3 }
  0x3a PF: > { %s250_s7 = sand.u32 1, %s1550_s17   ;;  %s1253_s8 = sshll.u32 %s1558_s19, 13 }
  0x3b   : > { %s1168_s9 = sshll.u32 %s250_s7, 9  ;;  %s261_s12 = scalar_lea.hbm %s2044_s1, %s1253_s8 }
  0x3c   : > { %s254_s13 = scalar_lea.vmem [#allocation3], %s1168_s9  ;;  %s251_s15 = scalar_lea.sflag [#allocation4], %s250_s7 }
  0x3d   : > { %s262_s14 = sshll.u32 %s254_s13, 4  ;;  %p2059_p5 = scmp.ne.s32.totalorder %s2053_s24, 0  ;;  %s263_s14 = int_to_ptr.vmem [resolvable:$true] %s262_s14 }
  0x3e   : > { %s1494_s21 = scalar_lea.vmem %s263_s14, 8192  ;;  %s1566_s23 = smov [#allocation3]  }
  0x3f   : > { %p1495_p3 = scmp.ne.s32.totalorder %s263_s14, %s1494_s21  ;;  %s1498_s25 = sshll.u32 %s1566_s23, 4  ;;  %s1499_s25 = int_to_ptr.vmem [resolvable:$false] %s1498_s25 }
  0x40   : > { %s1500_s30 = scalar_lea.vmem %s1499_s25, 16384  ;;  %p1501_p12 = scmp.lt.s32.totalorder %s263_s14, %s1499_s25 }
  0x41   : > { %p1496_p8 = pnand %p1495_p3, %p2059_p5  ;;  %p1502_p13 = scmp.lt.s32.totalorder %s1500_s30, %s1494_s21 }
  0x43   : > { %p1497_p10 = pneg %p1496_p8  ;;  %p1503_p6 = por %p1502_p13, %p1501_p12 }
  0x45   : > { %p1504_p7 = pnand %p1503_p6, %p1497_p10 }
  0x47   : > { %1507 = shalt.err (!%p1504_p7)
}
  0x48   : > { %s1567_s5 = smov 256   ;;  %s1568_s6 = smov 16  }
  0x49   : > { %1258 = dma.hbm_to_vmem [thread:$0]  (%p2059_p5), %s261_s12, 8192, %s263_s14, %s251_s15, %s1567_s5, %s1567_s5, %s1568_s6  }
  0x4a PF: > { %p2060_p9 = scmp.ne.s32.totalorder %s2056_s29, 0 }
  0x4b   : > { %s277_s7 = sand.u32 (!%p2060_p9), 1, %s1546_s16   ;;  %p2061_p11 = scmp.ne.s32.totalorder (!%p2060_p9), %s2055_s27, 0 }
  0x4c   : > { %274 = sbr.rel (%p2060_p9) target bundleno = 401 (0x191), region = 70  ;;  %s1173_s8 = sshll.u32 (!%p2060_p9), %s277_s7, 5 }
  0x4d   : > { %s1174_s9 = sshll.u32 (!%p2060_p9), %s277_s7, 9  ;;  %s1703_s10 = scalar_lea.vmem (!%p2060_p9), [#allocation2], %s1173_s8 }
  0x4e   : > { %s284_s11 = scalar_lea.sflag (!%p2060_p9), [#allocation4], %s277_s7  ;;  %s1705_s13 = scalar_lea.vmem (!%p2060_p9), [#allocation3], %s1174_s9 }
  0x51   : > { %1533 = dma.done.wait (%p2061_p11), %s284_s11, 8192  }
  0x52   : > { %1535 = vsyncadd (%p2061_p11), %s284_s11, 4294959104  ;;  %p2062_p0 = scmp.ne.s32.totalorder %s2054_s26, 0 }
  0x54   : > { %1537 = dma.done.wait (%p2062_p0), [#allocation6], 128  }
  0x55   : > { %1539 = vsyncadd (%p2062_p0), [#allocation6], 4294967168  ;;  %p1177_p1 = scmp.ne.s32.totalorder %s1554_s18, 0 }
  0x57   : > { %338 = sbr.rel (%p1177_p1) target bundleno = 101 (0x65), region = 90 }
  0x5c   : > { %v1569_v4 = vmov 0.0  }
  0x5d   : > { %339 = vst [vmem:[%s2047_s4] sm:$0xff] %v1569_v4  ;;  %340 = vst [vmem:[%s2047_s4 + $0x8] sm:$0xff] %v1569_v4 }
  0x5e   : > { %341 = vst [vmem:[%s2047_s4 + $0x10] sm:$0xff] %v1569_v4  ;;  %342 = vst [vmem:[%s2047_s4 + $0x18] sm:$0xff] %v1569_v4 }
  0x5f   : > { %343 = vst [vmem:[%s2047_s4 + $0x20] sm:$0xff] %v1569_v4  ;;  %344 = vst [vmem:[%s2047_s4 + $0x28] sm:$0xff] %v1569_v4 }
  0x60   : > { %345 = vst [vmem:[%s2047_s4 + $0x30] sm:$0xff] %v1569_v4  ;;  %346 = vst [vmem:[%s2047_s4 + $0x38] sm:$0xff] %v1569_v4 }
  0x61   : > { %347 = vst [vmem:[%s2047_s4 + $0x40] sm:$0xff] %v1569_v4  ;;  %348 = vst [vmem:[%s2047_s4 + $0x48] sm:$0xff] %v1569_v4 }
  0x62   : > { %349 = vst [vmem:[%s2047_s4 + $0x50] sm:$0xff] %v1569_v4  ;;  %350 = vst [vmem:[%s2047_s4 + $0x58] sm:$0xff] %v1569_v4 }
  0x63   : > { %351 = vst [vmem:[%s2047_s4 + $0x60] sm:$0xff] %v1569_v4  ;;  %352 = vst [vmem:[%s2047_s4 + $0x68] sm:$0xff] %v1569_v4 }
  0x64   : > { %353 = vst [vmem:[%s2047_s4 + $0x70] sm:$0xff] %v1569_v4  ;;  %354 = vst [vmem:[%s2047_s4 + $0x78] sm:$0xff] %v1569_v4 }
  0x65 PF: > { %v1328_v5 = vld [vmem:[%s1705_s13 + $0xe4] ss:$16 sps:$4 sm:$0xff]   ;;  %v1330_v6 = vld [vmem:[%s1705_s13 + $0xec] ss:$16 sps:$4 sm:$0xff]   ;;  %v1332_v7 = vld [vmem:[%s1705_s13 + $0xe0] ss:$16 sps:$4 sm:$0xff]  }
  0x66   : > { %779 = vmatprep.subr.bf16.mxu0 %v1328_v5  ;;  %v1333_v8 = vld [vmem:[%s1705_s13 + $0xe8] ss:$16 sps:$4 sm:$0xff]   ;;  %832 = vmatprep.subr.bf16.mxu1 %v1330_v6  ;;  %v1334_v9 = vld [vmem:[%s1705_s13 + $0xc4] ss:$16 sps:$4 sm:$0xff]   ;;  %v1336_v10 = vld [vmem:[%s1705_s13 + $0xcc] ss:$16 sps:$4 sm:$0xff]  }
  0x67   : > { %780 = vmatpush1.bf16.msra.mxu0 %v1332_v7  ;;  %833 = vmatpush1.bf16.msra.mxu1 %v1333_v8  ;;  %v1338_v11 = vld [vmem:[%s1705_s13 + $0xc0] ss:$16 sps:$4 sm:$0xff]   ;;  %v1339_v12 = vld [vmem:[%s1705_s13 + $0xc8] ss:$16 sps:$4 sm:$0xff]   ;;  %v1340_v13 = vld [vmem:[%s1705_s13 + $0xa4] ss:$16 sps:$4 sm:$0xff]  }
  0x68   : > { %781 = vmatprep.subr.bf16.mxu0 %v1334_v9  ;;  %834 = vmatprep.subr.bf16.mxu1 %v1336_v10  ;;  %v1342_v14 = vld [vmem:[%s1705_s13 + $0xac] ss:$16 sps:$4 sm:$0xff]   ;;  %v1344_v15 = vld [vmem:[%s1705_s13 + $0xa0] ss:$16 sps:$4 sm:$0xff]   ;;  %v1345_v16 = vld [vmem:[%s1705_s13 + $0xa8] ss:$16 sps:$4 sm:$0xff]  }
  0x69   : > { %v1346_v17 = vld [vmem:[%s1705_s13 + $0x84] ss:$16 sps:$4 sm:$0xff]   ;;  %v1348_v18 = vld [vmem:[%s1705_s13 + $0x8c] ss:$16 sps:$4 sm:$0xff]   ;;  %v1350_v19 = vld [vmem:[%s1705_s13 + $0x80] ss:$16 sps:$4 sm:$0xff]  }
  0x6a   : > { %v1351_v20 = vld [vmem:[%s1705_s13 + $0x88] ss:$16 sps:$4 sm:$0xff]   ;;  %v1352_v21 = vld [vmem:[%s1705_s13 + $0x64] ss:$16 sps:$4 sm:$0xff]   ;;  %v1354_v22 = vld [vmem:[%s1705_s13 + $0x6c] ss:$16 sps:$4 sm:$0xff]  }
  0x6b   : > { %782 = vmatpush1.bf16.msra.mxu0 %v1338_v11  ;;  %835 = vmatpush1.bf16.msra.mxu1 %v1339_v12  ;;  %v1356_v23 = vld [vmem:[%s1705_s13 + $0x60] ss:$16 sps:$4 sm:$0xff]   ;;  %v1357_v24 = vld [vmem:[%s1705_s13 + $0x68] ss:$16 sps:$4 sm:$0xff]   ;;  %v1358_v25 = vld [vmem:[%s1705_s13 + $0x44] ss:$16 sps:$4 sm:$0xff]  }
  0x6c   : > { %783 = vmatprep.subr.bf16.mxu0 %v1340_v13  ;;  %836 = vmatprep.subr.bf16.mxu1 %v1342_v14  ;;  %v1360_v26 = vld [vmem:[%s1705_s13 + $0x4c] ss:$16 sps:$4 sm:$0xff]   ;;  %v1362_v27 = vld [vmem:[%s1705_s13 + $0x40] ss:$16 sps:$4 sm:$0xff]   ;;  %v1363_v28 = vld [vmem:[%s1705_s13 + $0x48] ss:$16 sps:$4 sm:$0xff]  }
  0x6d   : > { %v1364_v29 = vld [vmem:[%s1705_s13 + $0x24] ss:$16 sps:$4 sm:$0xff]   ;;  %v1366_v30 = vld [vmem:[%s1705_s13 + $0x2c] ss:$16 sps:$4 sm:$0xff]   ;;  %v1368_v31 = vld [vmem:[%s1705_s13 + $0x20] ss:$16 sps:$4 sm:$0xff]  }
  0x6e   : > { %v1369_v32 = vld [vmem:[%s1705_s13 + $0x28] ss:$16 sps:$4 sm:$0xff]   ;;  %v1370_v33 = vld [vmem:[%s1705_s13 + $0x4] ss:$16 sps:$4 sm:$0xff]   ;;  %v1372_v34 = vld [vmem:[%s1705_s13 + $0xc] ss:$16 sps:$4 sm:$0xff]  }
  0x6f   : > { %784 = vmatpush1.bf16.msra.mxu0 %v1344_v15  ;;  %837 = vmatpush1.bf16.msra.mxu1 %v1345_v16  ;;  %v1374_v35 = vld [vmem:[%s1705_s13] ss:$16 sps:$4 sm:$0xff]   ;;  %v1375_v36 = vld [vmem:[%s1705_s13 + $0x8] ss:$16 sps:$4 sm:$0xff]   ;;  %v1376_v37 = vld [vmem:[%s1705_s13 + $0x1e4] ss:$16 sps:$4 sm:$0xff]  }
  0x70   : > { %785 = vmatprep.subr.bf16.mxu0 %v1346_v17  ;;  %838 = vmatprep.subr.bf16.mxu1 %v1348_v18  ;;  %v1378_v38 = vld [vmem:[%s1705_s13 + $0x1ec] ss:$16 sps:$4 sm:$0xff]   ;;  %v1380_v39 = vld [vmem:[%s1705_s13 + $0x1e0] ss:$16 sps:$4 sm:$0xff]   ;;  %v1381_v40 = vld [vmem:[%s1705_s13 + $0x1e8] ss:$16 sps:$4 sm:$0xff]  }
  0x71   : > { %v1382_v41 = vld [vmem:[%s1705_s13 + $0x1c4] ss:$16 sps:$4 sm:$0xff]   ;;  %v1384_v42 = vld [vmem:[%s1705_s13 + $0x1cc] ss:$16 sps:$4 sm:$0xff]   ;;  %v1386_v43 = vld [vmem:[%s1705_s13 + $0x1c0] ss:$16 sps:$4 sm:$0xff]  }
  0x72   : > { %v1387_v44 = vld [vmem:[%s1705_s13 + $0x1c8] ss:$16 sps:$4 sm:$0xff]   ;;  %v1388_v45 = vld [vmem:[%s1705_s13 + $0x1a4] ss:$16 sps:$4 sm:$0xff]   ;;  %v1390_v46 = vld [vmem:[%s1705_s13 + $0x1ac] ss:$16 sps:$4 sm:$0xff]  }
  0x73   : > { %786 = vmatpush1.bf16.msra.mxu0 %v1350_v19  ;;  %839 = vmatpush1.bf16.msra.mxu1 %v1351_v20  ;;  %v1392_v47 = vld [vmem:[%s1705_s13 + $0x1a0] ss:$16 sps:$4 sm:$0xff]   ;;  %v1393_v48 = vld [vmem:[%s1705_s13 + $0x1a8] ss:$16 sps:$4 sm:$0xff]   ;;  %v1394_v49 = vld [vmem:[%s1705_s13 + $0x184] ss:$16 sps:$4 sm:$0xff]  }
  0x74   : > { %787 = vmatprep.subr.bf16.mxu0 %v1352_v21  ;;  %840 = vmatprep.subr.bf16.mxu1 %v1354_v22  ;;  %v1396_v50 = vld [vmem:[%s1705_s13 + $0x18c] ss:$16 sps:$4 sm:$0xff]   ;;  %v1398_v51 = vld [vmem:[%s1705_s13 + $0x180] ss:$16 sps:$4 sm:$0xff]   ;;  %v1399_v53 = vld [vmem:[%s1705_s13 + $0x188] ss:$16 sps:$4 sm:$0xff]  }
  0x75   : > { %v1426_v52 = vld [vmem:[%s1703_s10 + $0x4] ss:$8 sps:$4 sm:$0xff]   ;;  %v1404_v56 = vld [vmem:[%s1705_s13 + $0x160] ss:$16 sps:$4 sm:$0xff]   ;;  %v1405_v57 = vld [vmem:[%s1705_s13 + $0x168] ss:$16 sps:$4 sm:$0xff]  }
  0x76   : > { %v1400_v54 = vld [vmem:[%s1705_s13 + $0x164] ss:$16 sps:$4 sm:$0xff]   ;;  %v1402_v55 = vld [vmem:[%s1705_s13 + $0x16c] ss:$16 sps:$4 sm:$0xff]   ;;  %811 = vmatprep.mubr.bf16.mxu0 %v1426_v52  ;;  %864 = vmatprep.mubr.bf16.mxu1 %v1426_v52  ;;  %v1410_v60 = vld [vmem:[%s1705_s13 + $0x140] ss:$16 sps:$4 sm:$0xff]  }
  0x77   : > { %788 = vmatpush1.bf16.msra.mxu0 %v1356_v23  ;;  %841 = vmatpush1.bf16.msra.mxu1 %v1357_v24  ;;  %v1406_v58 = vld [vmem:[%s1705_s13 + $0x144] ss:$16 sps:$4 sm:$0xff]   ;;  %v1408_v59 = vld [vmem:[%s1705_s13 + $0x14c] ss:$16 sps:$4 sm:$0xff]   ;;  %v1411_v61 = vld [vmem:[%s1705_s13 + $0x148] ss:$16 sps:$4 sm:$0xff]  }
  0x78   : > { %789 = vmatprep.subr.bf16.mxu0 %v1358_v25  ;;  %842 = vmatprep.subr.bf16.mxu1 %v1360_v26  ;;  %v1412_v62 = vld [vmem:[%s1705_s13 + $0x124] ss:$16 sps:$4 sm:$0xff]   ;;  %v1414_v63 = vld [vmem:[%s1705_s13 + $0x12c] ss:$16 sps:$4 sm:$0xff]   ;;  %v1416_v0 = vld [vmem:[%s1705_s13 + $0x120] ss:$16 sps:$4 sm:$0xff]  }
  0x79   : > { %v1417_v1 = vld [vmem:[%s1705_s13 + $0x128] ss:$16 sps:$4 sm:$0xff]   ;;  %v1418_v2 = vld [vmem:[%s1705_s13 + $0x104] ss:$16 sps:$4 sm:$0xff]   ;;  %v1420_v3 = vld [vmem:[%s1705_s13 + $0x10c] ss:$16 sps:$4 sm:$0xff]  }
  0x7a   : > { %v1422_v4 = vld [vmem:[%s1705_s13 + $0x100] ss:$16 sps:$4 sm:$0xff]   ;;  %v1423_v5 = vld [vmem:[%s1705_s13 + $0x108] ss:$16 sps:$4 sm:$0xff]   ;;  %v1427_v7 = vld [vmem:[%s1703_s10 + $0x14] ss:$8 sps:$4 sm:$0xff]  }
  0x7b   : > { %790 = vmatpush1.bf16.msra.mxu0 %v1362_v27  ;;  %843 = vmatpush1.bf16.msra.mxu1 %v1363_v28  ;;  %v1424_v6 = vld [vmem:[%s1703_s10] ss:$8 sps:$4 sm:$0xff]   ;;  %v1429_v8 = vld [vmem:[%s1703_s10 + $0x10] ss:$8 sps:$4 sm:$0xff]   ;;  %p1246_p2 = scmp.ne.s32.totalorder %s1554_s18, 8 }
  0x7c   : > { %791 = vmatprep.subr.bf16.mxu0 %v1364_v29  ;;  %844 = vmatprep.subr.bf16.mxu1 %v1366_v30  ;;  %v355_v9 = vld [vmem:[%s2047_s4] sm:$0xff]  ;;  %v357_v10 = vld [vmem:[%s2047_s4 + $0x10] sm:$0xff]  ;;  %v356_v13 = vld [vmem:[%s2047_s4 + $0x8] sm:$0xff] }
  0x7d   : > { %v358_v14 = vld [vmem:[%s2047_s4 + $0x18] sm:$0xff]  ;;  %v359_v19 = vld [vmem:[%s2047_s4 + $0x20] sm:$0xff]  ;;  %v361_v20 = vld [vmem:[%s2047_s4 + $0x30] sm:$0xff] }
  0x7e   : > { %v360_v25 = vld [vmem:[%s2047_s4 + $0x28] sm:$0xff]  ;;  %v362_v26 = vld [vmem:[%s2047_s4 + $0x38] sm:$0xff] }
  0x7f   : > { %792 = vmatpush1.bf16.msra.mxu0 %v1368_v31  ;;  %845 = vmatpush1.bf16.msra.mxu1 %v1369_v32  ;;  %v363_v31 = vld [vmem:[%s2047_s4 + $0x40] sm:$0xff]  ;;  %v365_v32 = vld [vmem:[%s2047_s4 + $0x50] sm:$0xff] }
  0x80   : > { %793 = vmatprep.subr.bf16.mxu0 %v1370_v33  ;;  %846 = vmatprep.subr.bf16.mxu1 %v1372_v34 }
  0x83   : > { %794 = vmatpush1.bf16.msra.mxu0 %v1374_v35  ;;  %847 = vmatpush1.bf16.msra.mxu1 %v1375_v36 }
  0x84   : > { %795 = vmatprep.subr.bf16.mxu0 %v1376_v37  ;;  %848 = vmatprep.subr.bf16.mxu1 %v1378_v38  ;;  %v364_v37 = vld [vmem:[%s2047_s4 + $0x48] sm:$0xff]  ;;  %v366_v38 = vld [vmem:[%s2047_s4 + $0x58] sm:$0xff] }
  0x87   : > { %796 = vmatpush2.bf16.msra.mxu0 %v1380_v39  ;;  %849 = vmatpush2.bf16.msra.mxu1 %v1381_v40 }
  0x88   : > { %797 = vmatprep.subr.bf16.mxu0 %v1382_v41  ;;  %850 = vmatprep.subr.bf16.mxu1 %v1384_v42 }
  0x8b   : > { %798 = vmatpush2.bf16.msra.mxu0 %v1386_v43  ;;  %851 = vmatpush2.bf16.msra.mxu1 %v1387_v44  ;;  %v367_v43 = vld [vmem:[%s2047_s4 + $0x60] sm:$0xff]  ;;  %v369_v44 = vld [vmem:[%s2047_s4 + $0x70] sm:$0xff] }
  0x8c   : > { %799 = vmatprep.subr.bf16.mxu0 %v1388_v45  ;;  %852 = vmatprep.subr.bf16.mxu1 %v1390_v46 }
  0x8f   : > { %800 = vmatpush2.bf16.msra.mxu0 %v1392_v47  ;;  %853 = vmatpush2.bf16.msra.mxu1 %v1393_v48 }
  0x90   : > { %801 = vmatprep.subr.bf16.mxu0 %v1394_v49  ;;  %854 = vmatprep.subr.bf16.mxu1 %v1396_v50  ;;  %v368_v49 = vld [vmem:[%s2047_s4 + $0x68] sm:$0xff]  ;;  %v370_v50 = vld [vmem:[%s2047_s4 + $0x78] sm:$0xff] }
  0x93   : > { %802 = vmatpush2.bf16.msra.mxu0 %v1398_v51  ;;  %855 = vmatpush2.bf16.msra.mxu1 %v1399_v53 }
  0x94   : > { %803 = vmatprep.subr.bf16.mxu0 %v1400_v54  ;;  %856 = vmatprep.subr.bf16.mxu1 %v1402_v55 }
  0x97   : > { %804 = vmatpush2.bf16.msra.mxu0 %v1404_v56  ;;  %857 = vmatpush2.bf16.msra.mxu1 %v1405_v57 }
  0x98   : > { %805 = vmatprep.subr.bf16.mxu0 %v1406_v58  ;;  %858 = vmatprep.subr.bf16.mxu1 %v1408_v59 }
  0x9b   : > { %806 = vmatpush2.bf16.msra.mxu0 %v1410_v60  ;;  %859 = vmatpush2.bf16.msra.mxu1 %v1411_v61 }
  0x9c   : > { %807 = vmatprep.subr.bf16.mxu0 %v1412_v62  ;;  %860 = vmatprep.subr.bf16.mxu1 %v1414_v63 }
  0x9f   : > { %808 = vmatpush2.bf16.msra.mxu0 %v1416_v0  ;;  %861 = vmatpush2.bf16.msra.mxu1 %v1417_v1 }
  0xa0   : > { %809 = vmatprep.subr.bf16.mxu0 %v1418_v2  ;;  %862 = vmatprep.subr.bf16.mxu1 %v1420_v3 }
  0xa3   : > { %810 = vmatpush2.bf16.msra.mxu0 %v1422_v4  ;;  %863 = vmatpush2.bf16.msra.mxu1 %v1423_v5 }
  0xa6   : > { %812 = vmatmul.mubr.bf16.vlgmr.msra.gmra.mxu0 %v1424_v6  ;;  %865 = vmatmul.mubr.bf16.vlgmr.msra.gmra.mxu1 %v1424_v6 }
  0xa7   : > { %821 = vmatprep.mubr.bf16.mxu0 %v1427_v7  ;;  %874 = vmatprep.mubr.bf16.mxu1 %v1427_v7 }
  0xae   : > { %822 = vmatmul.mubr.bf16.gmra.mxu0 %v1429_v8  ;;  %875 = vmatmul.mubr.bf16.gmra.mxu1 %v1429_v8 }
 0x166   : > { %v813_v11 = vpop.f32.mrf.mxu0  ;;  %v866_v12 = vpop.f32.mrf.mxu1 }
 0x167   : > { %v885_v15 = vadd.f32 %v813_v11, %v355_v9  ;;  %v887_v16 = vadd.f32 %v866_v12, %v357_v10 }
 0x168   : > { %v815_v17 = vpop.f32.mrf.mxu0  ;;  %v868_v18 = vpop.f32.mrf.mxu1 }
 0x169   : > { %901 = vst [vmem:[%s2047_s4] sm:$0xff] %v885_v15  ;;  %903 = vst [vmem:[%s2047_s4 + $0x10] sm:$0xff] %v887_v16  ;;  %v886_v21 = vadd.f32 %v815_v17, %v356_v13  ;;  %v888_v22 = vadd.f32 %v868_v18, %v358_v14 }
 0x16a   : > { %v817_v23 = vpop.f32.mrf.mxu0  ;;  %v870_v24 = vpop.f32.mrf.mxu1 }
 0x16b   : > { %902 = vst [vmem:[%s2047_s4 + $0x8] sm:$0xff] %v886_v21  ;;  %904 = vst [vmem:[%s2047_s4 + $0x18] sm:$0xff] %v888_v22  ;;  %v889_v27 = vadd.f32 %v817_v23, %v359_v19  ;;  %v891_v28 = vadd.f32 %v870_v24, %v361_v20 }
 0x16c   : > { %v819_v29 = vpop.f32.mrf.mxu0  ;;  %v872_v30 = vpop.f32.mrf.mxu1 }
 0x16d   : > { %905 = vst [vmem:[%s2047_s4 + $0x20] sm:$0xff] %v889_v27  ;;  %907 = vst [vmem:[%s2047_s4 + $0x30] sm:$0xff] %v891_v28  ;;  %v890_v33 = vadd.f32 %v819_v29, %v360_v25  ;;  %v892_v34 = vadd.f32 %v872_v30, %v362_v26 }
 0x16e   : > { %v823_v35 = vpop.f32.mrf.mxu0  ;;  %v876_v36 = vpop.f32.mrf.mxu1 }
 0x16f   : > { %906 = vst [vmem:[%s2047_s4 + $0x28] sm:$0xff] %v890_v33  ;;  %908 = vst [vmem:[%s2047_s4 + $0x38] sm:$0xff] %v892_v34  ;;  %v893_v39 = vadd.f32 %v823_v35, %v363_v31  ;;  %v895_v40 = vadd.f32 %v876_v36, %v365_v32 }
 0x170   : > { %v825_v41 = vpop.f32.mrf.mxu0  ;;  %v878_v42 = vpop.f32.mrf.mxu1 }
 0x171   : > { %909 = vst [vmem:[%s2047_s4 + $0x40] sm:$0xff] %v893_v39  ;;  %911 = vst [vmem:[%s2047_s4 + $0x50] sm:$0xff] %v895_v40  ;;  %v894_v45 = vadd.f32 %v825_v41, %v364_v37  ;;  %v896_v46 = vadd.f32 %v878_v42, %v366_v38 }
 0x172   : > { %v827_v47 = vpop.f32.mrf.mxu0  ;;  %v880_v48 = vpop.f32.mrf.mxu1 }
 0x173   : > { %910 = vst [vmem:[%s2047_s4 + $0x48] sm:$0xff] %v894_v45  ;;  %912 = vst [vmem:[%s2047_s4 + $0x58] sm:$0xff] %v896_v46  ;;  %v897_v51 = vadd.f32 %v827_v47, %v367_v43  ;;  %v899_v52 = vadd.f32 %v880_v48, %v369_v44  ;;  %920 = sbr.rel (%p1246_p2) target bundleno = 401 (0x191), region = 94 }
 0x174   : > { %v829_v53 = vpop.f32.mrf.mxu0  ;;  %v882_v54 = vpop.f32.mrf.mxu1 }
 0x175   : > { %913 = vst [vmem:[%s2047_s4 + $0x60] sm:$0xff] %v897_v51  ;;  %915 = vst [vmem:[%s2047_s4 + $0x70] sm:$0xff] %v899_v52  ;;  %v898_v55 = vadd.f32 %v829_v53, %v368_v49  ;;  %v900_v56 = vadd.f32 %v882_v54, %v370_v50 }
 0x177   : > { %914 = vst [vmem:[%s2047_s4 + $0x68] sm:$0xff] %v898_v55  ;;  %916 = vst [vmem:[%s2047_s4 + $0x78] sm:$0xff] %v900_v56 }
 0x178   : > { %v939_v57 = vlaneseq  ;;  %v937_v59 = vld [vmem:[#allocation5] sm:$0xf]  ;;  %v975_v60 = vld [vmem:[#allocation7] sm:$0xf]  ;;  %v922_v63 = vld [vmem:[%s2047_s4 + $0x8] sm:$0xff] }
 0x179   : > { %v921_v61 = vld [vmem:[%s2047_s4] sm:$0xff]  ;;  %v923_v3 = vld [vmem:[%s2047_s4 + $0x10] sm:$0xff]  ;;  %v926_v5 = vld [vmem:[%s2047_s4 + $0x28] sm:$0xff] }
 0x17a   : > { %v940_v58 = vshrl.u32 %v939_v57, 7  ;;  %v925_v4 = vld [vmem:[%s2047_s4 + $0x20] sm:$0xff]  ;;  %v924_v10 = vld [vmem:[%s2047_s4 + $0x18] sm:$0xff]  ;;  %v927_v11 = vld [vmem:[%s2047_s4 + $0x30] sm:$0xff] }
 0x17b   : > { %v928_v12 = vld [vmem:[%s2047_s4 + $0x38] sm:$0xff]  ;;  %v929_v29 = vld [vmem:[%s2047_s4 + $0x40] sm:$0xff]  ;;  %v930_v30 = vld [vmem:[%s2047_s4 + $0x48] sm:$0xff] }
 0x17c   : > { %v941_v62 = vsub.s32 0, %v940_v58  ;;  %v945_v0 = vsub.s32 1, %v940_v58  ;;  %v949_v1 = vsub.s32 2, %v940_v58  ;;  %v953_v2 = vsub.s32 3, %v940_v58  ;;  %v931_v31 = vld [vmem:[%s2047_s4 + $0x50] sm:$0xff]  ;;  %v932_v36 = vld [vmem:[%s2047_s4 + $0x58] sm:$0xff] }
 0x17d   : > { %v933_v37 = vld [vmem:[%s2047_s4 + $0x60] sm:$0xff]  ;;  %v935_v43 = vld [vmem:[%s2047_s4 + $0x70] sm:$0xff] }
 0x17e   : > { %v942_v6 = vrot.slane %v937_v59, %v941_v62  ;;  %v980_v7 = vrot.slane %v975_v60, %v941_v62  ;;  %v946_v8 = vrot.slane %v937_v59, %v945_v0  ;;  %v984_v9 = vrot.slane %v975_v60, %v945_v0  ;;  %v934_v38 = vld [vmem:[%s2047_s4 + $0x68] sm:$0xff]  ;;  %v936_v44 = vld [vmem:[%s2047_s4 + $0x78] sm:$0xff] }
 0x17f   : > { %v950_v13 = vrot.slane %v937_v59, %v949_v1  ;;  %v988_v14 = vrot.slane %v975_v60, %v949_v1  ;;  %v954_v15 = vrot.slane %v937_v59, %v953_v2  ;;  %v992_v16 = vrot.slane %v975_v60, %v953_v2 }
 0x180   : > { %v959_v17 = vmul.f32 %v942_v6, %v921_v61  ;;  %v960_v18 = vmul.f32 %v946_v8, %v922_v63  ;;  %v963_v19 = vmul.f32 %v942_v6, %v925_v4  ;;  %v964_v20 = vmul.f32 %v946_v8, %v926_v5 }
 0x181   : > { %v961_v21 = vmul.f32 %v950_v13, %v923_v3  ;;  %v962_v22 = vmul.f32 %v954_v15, %v924_v10  ;;  %v965_v23 = vmul.f32 %v950_v13, %v927_v11  ;;  %v966_v24 = vmul.f32 %v954_v15, %v928_v12 }
 0x182   : > { %v997_v25 = vadd.f32 %v980_v7, %v959_v17  ;;  %v998_v26 = vadd.f32 %v984_v9, %v960_v18  ;;  %v1001_v27 = vadd.f32 %v980_v7, %v963_v19  ;;  %v1002_v28 = vadd.f32 %v984_v9, %v964_v20 }
 0x183   : > { %v999_v32 = vadd.f32 %v988_v14, %v961_v21  ;;  %v1000_v33 = vadd.f32 %v992_v16, %v962_v22  ;;  %v1003_v34 = vadd.f32 %v988_v14, %v965_v23  ;;  %v1004_v35 = vadd.f32 %v992_v16, %v966_v24 }
 0x184   : > { %v1013_v39 = vmax.f32 %v997_v25, 0.0  ;;  %v1014_v40 = vmax.f32 %v998_v26, 0.0  ;;  %v1017_v41 = vmax.f32 %v1001_v27, 0.0  ;;  %v1018_v42 = vmax.f32 %v1002_v28, 0.0 }
 0x185   : > { %v1015_v45 = vmax.f32 %v999_v32, 0.0  ;;  %v1016_v46 = vmax.f32 %v1000_v33, 0.0  ;;  %v1019_v47 = vmax.f32 %v1003_v34, 0.0  ;;  %v1020_v48 = vmax.f32 %v1004_v35, 0.0 }
 0x186   : > { %1029 = vst [vmem:[%s2047_s4] sm:$0xff] %v1013_v39  ;;  %1030 = vst [vmem:[%s2047_s4 + $0x8] sm:$0xff] %v1014_v40  ;;  %v967_v49 = vmul.f32 %v942_v6, %v929_v29  ;;  %v968_v50 = vmul.f32 %v946_v8, %v930_v30  ;;  %v969_v51 = vmul.f32 %v950_v13, %v931_v31 }
 0x187   : > { %1033 = vst [vmem:[%s2047_s4 + $0x20] sm:$0xff] %v1017_v41  ;;  %1034 = vst [vmem:[%s2047_s4 + $0x28] sm:$0xff] %v1018_v42  ;;  %v970_v52 = vmul.f32 %v954_v15, %v932_v36  ;;  %v971_v53 = vmul.f32 %v942_v6, %v933_v37  ;;  %v972_v54 = vmul.f32 %v946_v8, %v934_v38 }
 0x188   : > { %1031 = vst [vmem:[%s2047_s4 + $0x10] sm:$0xff] %v1015_v45  ;;  %1032 = vst [vmem:[%s2047_s4 + $0x18] sm:$0xff] %v1016_v46  ;;  %v973_v55 = vmul.f32 %v950_v13, %v935_v43  ;;  %v974_v56 = vmul.f32 %v954_v15, %v936_v44  ;;  %v1005_v57 = vadd.f32 %v980_v7, %v967_v49 }
 0x189   : > { %1035 = vst [vmem:[%s2047_s4 + $0x30] sm:$0xff] %v1019_v47  ;;  %1036 = vst [vmem:[%s2047_s4 + $0x38] sm:$0xff] %v1020_v48  ;;  %v1006_v58 = vadd.f32 %v984_v9, %v968_v50  ;;  %v1007_v59 = vadd.f32 %v988_v14, %v969_v51  ;;  %v1008_v60 = vadd.f32 %v992_v16, %v970_v52 }
 0x18a   : > { %v1009_v61 = vadd.f32 %v980_v7, %v971_v53  ;;  %v1010_v62 = vadd.f32 %v984_v9, %v972_v54  ;;  %v1011_v63 = vadd.f32 %v988_v14, %v973_v55  ;;  %v1012_v0 = vadd.f32 %v992_v16, %v974_v56 }
 0x18b   : > { %v1021_v1 = vmax.f32 %v1005_v57, 0.0  ;;  %v1022_v2 = vmax.f32 %v1006_v58, 0.0  ;;  %v1023_v3 = vmax.f32 %v1007_v59, 0.0  ;;  %v1024_v4 = vmax.f32 %v1008_v60, 0.0 }
 0x18c   : > { %v1025_v5 = vmax.f32 %v1009_v61, 0.0  ;;  %v1026_v10 = vmax.f32 %v1010_v62, 0.0  ;;  %v1027_v11 = vmax.f32 %v1011_v63, 0.0  ;;  %v1028_v12 = vmax.f32 %v1012_v0, 0.0 }
 0x18d   : > { %1037 = vst [vmem:[%s2047_s4 + $0x40] sm:$0xff] %v1021_v1  ;;  %1038 = vst [vmem:[%s2047_s4 + $0x48] sm:$0xff] %v1022_v2 }
 0x18e   : > { %1039 = vst [vmem:[%s2047_s4 + $0x50] sm:$0xff] %v1023_v3  ;;  %1040 = vst [vmem:[%s2047_s4 + $0x58] sm:$0xff] %v1024_v4 }
 0x18f   : > { %1041 = vst [vmem:[%s2047_s4 + $0x60] sm:$0xff] %v1025_v5  ;;  %1042 = vst [vmem:[%s2047_s4 + $0x68] sm:$0xff] %v1026_v10 }
 0x190   : > { %1043 = vst [vmem:[%s2047_s4 + $0x70] sm:$0xff] %v1027_v11  ;;  %1044 = vst [vmem:[%s2047_s4 + $0x78] sm:$0xff] %v1028_v12 }
 0x191 PF: > { %s18_s20 = sadd.s32 1, %s1562_s20   ;;  %s2063_s15 = smov %s1546_s16 }
 0x192   : > { %p15_p4 = scmp.ge.s32.totalorder %s18_s20, 11   ;;  %s2064_s16 = smov %s1550_s17 }
 0x193   : > { %s2065_s17 = smov %s1651_s28  ;;  %s2066_s18 = smov %s1558_s19 }
 0x194   : > { %s2067_s19 = smov %s2069_s22  ;;  %17 = sbr.rel (!%p15_p4) target bundleno = 5 (0x5), region = 138 }
 0x199   :  { %1069 = vsyncpa [#allocation4], 1 }
 0x19a   :  { %1071 = vsyncpa [#allocation4 + $0x1], 1 }
 0x19b   :  { %1072 = vsyncpa [#allocation6], 1 }

// kernel: feature_embedder_forward.9
= control target key start
LH: loop header
LB: loop body
LE: loop exit
PB: predicated region body
PF: predicated region fallthrough
CT: control target
= control target key end

     0   :  { %s2054_s15 = smov 0   ;;  %s2056_s16 = smov 0   ;;  %s2539_s0 = inlined_call_operand.vmem [shape: bf16[32,4608], index: 0, kind: input, shape index: {}]   ;;  %s2540_s1 = inlined_call_operand.vmem [shape: bf16[4608,512], index: 1, kind: input, shape index: {}]   ;;  %s2541_s2 = inlined_call_operand.vmem [shape: f32[1,512], index: 2, kind: input, shape index: {}]   ;;  %s2542_s3 = inlined_call_operand.vmem [shape: f32[1,512], index: 3, kind: input, shape index: {}]   ;;  %s2543_s4 = inlined_call_operand.vmem [shape: f32[32,512], index: 4, kind: output, shape index: {}]  }
   0x1   :  { %s2058_s17 = smov 0   ;;  %s2060_s18 = smov 0  }
   0x2   :  { %s2062_s19 = smov 0  }
   0x3 LB: > { %s23_s20 = sadd.s32 1, %s2022_s18  ;;  %p42_p1 = scmp.ne.s32.totalorder %s2014_s16, %s2010_s15  ;;  %s2026_s19 = sphi %s2062_s19, %s14_s19   ;;  %s2022_s18 = sphi %s2060_s18, %s2547_s18   ;;  %s2018_s17 = sphi %s2058_s17, %s2546_s17   ;;  %s2014_s16 = sphi %s2056_s16, %s2545_s16   ;;  %s2010_s15 = sphi %s2054_s15, %s2544_s15  }
   0x4   : > { %p24_p0 = scmp.ge.s32.totalorder %s23_s20, 9  ;;  %p43_p2 = scmp.eq.s32.totalorder %s2026_s19, 0 }
   0x5   : > { %s35_s22 = sadd.s32 1, %s2014_s16  ;;  %p1590_p5 = scmp.ge.s32.totalorder %s2026_s19, 9 }
   0x6   : > { %s2549_s20 = smov (%p24_p0, %s23_s20), 0  ;;  %p44_p3 = por %p43_p2, %p42_p1 }
   0x7   : > { %s31_s21 = ssub.s32 %s2022_s18, %s2549_s20  ;;  %168 = sbr.rel (%p1590_p5) target bundleno = 20 (0x14), region = 24 }
   0x8   : > { %p33_p4 = scmp.eq.s32.totalorder %s31_s21, 0 }
   0xa   : > { %s2089_s23 = scalar_select %p33_p4, %s2014_s16, %s35_s22  }
   0xc   : > { %171 = sbr.rel (!%p44_p3) target bundleno = 20 (0x14), region = 28  ;;  %s173_s24 = sand.u32 (%p44_p3), 1, %s2014_s16  }
   0xd   : > { %s1741_s25 = sshll.u32 (%p44_p3), %s2022_s18, 4  ;;  %s1591_s26 = sshll.u32 (%p44_p3), %s173_s24, 6 }
   0xe   : > { %s181_s29 = scalar_lea.vmem (%p44_p3), %s2539_s0, %s1741_s25  ;;  %s175_s30 = scalar_lea.vmem (%p44_p3), [#allocation2], %s1591_s26 }
   0xf   : > { %v194_v0 = vld [vmem:[%s181_s29] sm:$0xff] (%p44_p3)  ;;  %v196_v1 = vld [vmem:[%s181_s29 + $0x8] sm:$0xff] (%p44_p3)  ;;  %v198_v2 = vld [vmem:[%s181_s29 + $0x90] sm:$0xff] (%p44_p3) }
  0x10   : > { %195 = vst [vmem:[%s175_s30] sm:$0xff] (%p44_p3), %v194_v0  ;;  %197 = vst [vmem:[%s175_s30 + $0x8] sm:$0xff] (%p44_p3), %v196_v1  ;;  %v200_v3 = vld [vmem:[%s181_s29 + $0x98] sm:$0xff] (%p44_p3)  ;;  %v202_v4 = vld [vmem:[%s181_s29 + $0x120] sm:$0xff] (%p44_p3) }
  0x11   : > { %199 = vst [vmem:[%s175_s30 + $0x10] sm:$0xff] %v198_v2  ;;  %v204_v5 = vld [vmem:[%s181_s29 + $0x128] sm:$0xff]  ;;  %201 = vst [vmem:[%s175_s30 + $0x18] sm:$0xff] %v200_v3  ;;  %v206_v6 = vld [vmem:[%s181_s29 + $0x1b0] sm:$0xff] }
  0x12   : > { %203 = vst [vmem:[%s175_s30 + $0x20] sm:$0xff] %v202_v4  ;;  %205 = vst [vmem:[%s175_s30 + $0x28] sm:$0xff] %v204_v5  ;;  %v208_v7 = vld [vmem:[%s181_s29 + $0x1b8] sm:$0xff] }
  0x13   : > { %207 = vst [vmem:[%s175_s30 + $0x30] sm:$0xff] %v206_v6  ;;  %209 = vst [vmem:[%s175_s30 + $0x38] sm:$0xff] %v208_v7 }
  0x14 PF: > { %p1594_p6 = scmp.ge.s32.totalorder %s2026_s19, 1  ;;  %p224_p7 = scmp.lt.s32.totalorder %s2026_s19, 10 }
  0x16   : > { %p225_p8 = pnand %p1594_p6, %p224_p7 }
  0x17   : > { %s231_s5 = sand.u32 (!%p225_p8), 1, %s2010_s15   ;;  %s1596_s6 = sshll.u32 (!%p225_p8), %s2018_s17, 6 }
  0x18   : > { %228 = sbr.rel (%p225_p8) target bundleno = 410 (0x19a), region = 55  ;;  %s1595_s7 = sshll.u32 (!%p225_p8), %s231_s5, 6 }
  0x19   : > { %p266_p9 = scmp.lt.s32.totalorder (!%p225_p8), %s1596_s6, 575  ;;  %s2106_s12 = scalar_lea.vmem (!%p225_p8), [#allocation2], %s1595_s7 }
  0x1a   : > { %p1599_p10 = scmp.ne.s32.totalorder (!%p225_p8), %s2018_s17, 0 }
  0x1d   : > { %s2551_s6 = smov (!%p266_p9, %s1596_s6), 575  ;;  %282 = sbr.rel (%p1599_p10) target bundleno = 43 (0x2b), region = 63 }
  0x1e   : > { %s1742_s8 = sshll.u32 %s2551_s6, 4 }
  0x1f   : > { %s2104_s11 = scalar_lea.vmem %s2540_s1, %s1742_s8 }
  0x22   : > { %v2028_v8 = vmov 0.0  }
  0x23   : > { %283 = vst [vmem:[%s2543_s4] sm:$0xff] %v2028_v8  ;;  %284 = vst [vmem:[%s2543_s4 + $0x8] sm:$0xff] %v2028_v8 }
  0x24   : > { %285 = vst [vmem:[%s2543_s4 + $0x10] sm:$0xff] %v2028_v8  ;;  %286 = vst [vmem:[%s2543_s4 + $0x18] sm:$0xff] %v2028_v8 }
  0x25   : > { %287 = vst [vmem:[%s2543_s4 + $0x20] sm:$0xff] %v2028_v8  ;;  %288 = vst [vmem:[%s2543_s4 + $0x28] sm:$0xff] %v2028_v8 }
  0x26   : > { %289 = vst [vmem:[%s2543_s4 + $0x30] sm:$0xff] %v2028_v8  ;;  %290 = vst [vmem:[%s2543_s4 + $0x38] sm:$0xff] %v2028_v8 }
  0x27   : > { %291 = vst [vmem:[%s2543_s4 + $0x40] sm:$0xff] %v2028_v8  ;;  %292 = vst [vmem:[%s2543_s4 + $0x48] sm:$0xff] %v2028_v8 }
  0x28   : > { %293 = vst [vmem:[%s2543_s4 + $0x50] sm:$0xff] %v2028_v8  ;;  %294 = vst [vmem:[%s2543_s4 + $0x58] sm:$0xff] %v2028_v8 }
  0x29   : > { %295 = vst [vmem:[%s2543_s4 + $0x60] sm:$0xff] %v2028_v8  ;;  %296 = vst [vmem:[%s2543_s4 + $0x68] sm:$0xff] %v2028_v8 }
  0x2a   : > { %297 = vst [vmem:[%s2543_s4 + $0x70] sm:$0xff] %v2028_v8  ;;  %298 = vst [vmem:[%s2543_s4 + $0x78] sm:$0xff] %v2028_v8 }
  0x2b PF: > { %v1784_v9 = vld [vmem:[%s2104_s11 + $0xe4] ss:$16 sps:$4 sm:$0xff]   ;;  %v1788_v11 = vld [vmem:[%s2104_s11 + $0xe0] ss:$16 sps:$4 sm:$0xff]   ;;  %v2211_v60 = vld [vmem:[%s2106_s12 + $0xc] ss:$16 sps:$4 sm:$0xff]  }
  0x2c   : > { %v1786_v10 = vld [vmem:[%s2104_s11 + $0x2e4] ss:$16 sps:$4 sm:$0xff]   ;;  %1131 = vmatprep.subr.bf16.mxu0 %v1784_v9  ;;  %v1789_v12 = vld [vmem:[%s2104_s11 + $0x2e0] ss:$16 sps:$4 sm:$0xff]   ;;  %1216 = vmatprep.mubr.bf16.mxu1 %v2211_v60  ;;  %p1736_p11 = scmp.ne.s32.totalorder %s2018_s17, 8 }
  0x2d   : > { %1184 = vmatprep.subr.bf16.mxu1 %v1786_v10  ;;  %v1790_v13 = vld [vmem:[%s2104_s11 + $0xc4] ss:$16 sps:$4 sm:$0xff]   ;;  %1132 = vmatpush1.bf16.msra.mxu0 %v1788_v11  ;;  %v1794_v15 = vld [vmem:[%s2104_s11 + $0xc0] ss:$16 sps:$4 sm:$0xff]   ;;  %v1888_v11 = vld [vmem:[%s2104_s11 + $0xec] ss:$16 sps:$4 sm:$0xff]  }
  0x2e   : > { %1185 = vmatpush1.bf16.msra.mxu1 %v1789_v12  ;;  %v1792_v14 = vld [vmem:[%s2104_s11 + $0x2c4] ss:$16 sps:$4 sm:$0xff]   ;;  %1133 = vmatprep.subr.bf16.mxu0 %v1790_v13  ;;  %v1795_v16 = vld [vmem:[%s2104_s11 + $0x2c0] ss:$16 sps:$4 sm:$0xff]   ;;  %v1891_v12 = vld [vmem:[%s2104_s11 + $0x2ec] ss:$16 sps:$4 sm:$0xff]  }
  0x2f   : > { %1186 = vmatprep.subr.bf16.mxu1 %v1792_v14  ;;  %v1796_v17 = vld [vmem:[%s2104_s11 + $0xa4] ss:$16 sps:$4 sm:$0xff]   ;;  %v1800_v19 = vld [vmem:[%s2104_s11 + $0xa0] ss:$16 sps:$4 sm:$0xff]   ;;  %v2235_v14 = vld [vmem:[%s2106_s12 + $0x8] ss:$16 sps:$4 sm:$0xff]  }
  0x30   : > { %v1798_v18 = vld [vmem:[%s2104_s11 + $0x2a4] ss:$16 sps:$4 sm:$0xff]   ;;  %v1801_v20 = vld [vmem:[%s2104_s11 + $0x2a0] ss:$16 sps:$4 sm:$0xff]  }
  0x31   : > { %1134 = vmatpush1.bf16.msra.mxu0 %v1794_v15  ;;  %v1802_v21 = vld [vmem:[%s2104_s11 + $0x84] ss:$16 sps:$4 sm:$0xff]   ;;  %v1806_v23 = vld [vmem:[%s2104_s11 + $0x80] ss:$16 sps:$4 sm:$0xff]   ;;  %v1886_v15 = vld [vmem:[%s2104_s11 + $0xe8] ss:$16 sps:$4 sm:$0xff]  }
  0x32   : > { %1187 = vmatpush1.bf16.msra.mxu1 %v1795_v16  ;;  %1135 = vmatprep.subr.bf16.mxu0 %v1796_v17  ;;  %v1804_v22 = vld [vmem:[%s2104_s11 + $0x284] ss:$16 sps:$4 sm:$0xff]   ;;  %v1807_v24 = vld [vmem:[%s2104_s11 + $0x280] ss:$16 sps:$4 sm:$0xff]   ;;  %v1889_v16 = vld [vmem:[%s2104_s11 + $0x2e8] ss:$16 sps:$4 sm:$0xff]  }
  0x33   : > { %1188 = vmatprep.subr.bf16.mxu1 %v1798_v18  ;;  %v1808_v25 = vld [vmem:[%s2104_s11 + $0x64] ss:$16 sps:$4 sm:$0xff]   ;;  %v1812_v27 = vld [vmem:[%s2104_s11 + $0x60] ss:$16 sps:$4 sm:$0xff]   ;;  %v1894_v17 = vld [vmem:[%s2104_s11 + $0xcc] ss:$16 sps:$4 sm:$0xff]  }
  0x34   : > { %v1810_v26 = vld [vmem:[%s2104_s11 + $0x264] ss:$16 sps:$4 sm:$0xff]   ;;  %v1813_v28 = vld [vmem:[%s2104_s11 + $0x260] ss:$16 sps:$4 sm:$0xff]   ;;  %v1897_v18 = vld [vmem:[%s2104_s11 + $0x2cc] ss:$16 sps:$4 sm:$0xff]  }
  0x35   : > { %1136 = vmatpush1.bf16.msra.mxu0 %v1800_v19  ;;  %v1814_v29 = vld [vmem:[%s2104_s11 + $0x44] ss:$16 sps:$4 sm:$0xff]   ;;  %v1818_v31 = vld [vmem:[%s2104_s11 + $0x40] ss:$16 sps:$4 sm:$0xff]   ;;  %v1892_v19 = vld [vmem:[%s2104_s11 + $0xc8] ss:$16 sps:$4 sm:$0xff]  }
  0x36   : > { %1189 = vmatpush1.bf16.msra.mxu1 %v1801_v20  ;;  %1137 = vmatprep.subr.bf16.mxu0 %v1802_v21  ;;  %v1816_v30 = vld [vmem:[%s2104_s11 + $0x244] ss:$16 sps:$4 sm:$0xff]   ;;  %v1819_v32 = vld [vmem:[%s2104_s11 + $0x240] ss:$16 sps:$4 sm:$0xff]   ;;  %v1895_v20 = vld [vmem:[%s2104_s11 + $0x2c8] ss:$16 sps:$4 sm:$0xff]  }
  0x37   : > { %1190 = vmatprep.subr.bf16.mxu1 %v1804_v22  ;;  %v1820_v33 = vld [vmem:[%s2104_s11 + $0x24] ss:$16 sps:$4 sm:$0xff]   ;;  %v1824_v35 = vld [vmem:[%s2104_s11 + $0x20] ss:$16 sps:$4 sm:$0xff]   ;;  %v1900_v21 = vld [vmem:[%s2104_s11 + $0xac] ss:$16 sps:$4 sm:$0xff]  }
  0x38   : > { %v1822_v34 = vld [vmem:[%s2104_s11 + $0x224] ss:$16 sps:$4 sm:$0xff]   ;;  %v1825_v36 = vld [vmem:[%s2104_s11 + $0x220] ss:$16 sps:$4 sm:$0xff]   ;;  %v1903_v22 = vld [vmem:[%s2104_s11 + $0x2ac] ss:$16 sps:$4 sm:$0xff]  }
  0x39   : > { %1138 = vmatpush1.bf16.msra.mxu0 %v1806_v23  ;;  %v1826_v37 = vld [vmem:[%s2104_s11 + $0x4] ss:$16 sps:$4 sm:$0xff]   ;;  %v1830_v39 = vld [vmem:[%s2104_s11] ss:$16 sps:$4 sm:$0xff]   ;;  %v1898_v23 = vld [vmem:[%s2104_s11 + $0xa8] ss:$16 sps:$4 sm:$0xff]  }
  0x3a   : > { %1191 = vmatpush1.bf16.msra.mxu1 %v1807_v24  ;;  %1139 = vmatprep.subr.bf16.mxu0 %v1808_v25  ;;  %v1828_v38 = vld [vmem:[%s2104_s11 + $0x204] ss:$16 sps:$4 sm:$0xff]   ;;  %v1831_v40 = vld [vmem:[%s2104_s11 + $0x200] ss:$16 sps:$4 sm:$0xff]   ;;  %v1901_v24 = vld [vmem:[%s2104_s11 + $0x2a8] ss:$16 sps:$4 sm:$0xff]  }
  0x3b   : > { %1192 = vmatprep.subr.bf16.mxu1 %v1810_v26  ;;  %v1832_v41 = vld [vmem:[%s2104_s11 + $0x1e4] ss:$16 sps:$4 sm:$0xff]   ;;  %v1836_v43 = vld [vmem:[%s2104_s11 + $0x1e0] ss:$16 sps:$4 sm:$0xff]   ;;  %v1906_v25 = vld [vmem:[%s2104_s11 + $0x8c] ss:$16 sps:$4 sm:$0xff]  }
  0x3c   : > { %v1834_v42 = vld [vmem:[%s2104_s11 + $0x3e4] ss:$16 sps:$4 sm:$0xff]   ;;  %v1837_v44 = vld [vmem:[%s2104_s11 + $0x3e0] ss:$16 sps:$4 sm:$0xff]   ;;  %v1909_v26 = vld [vmem:[%s2104_s11 + $0x28c] ss:$16 sps:$4 sm:$0xff]  }
  0x3d   : > { %1140 = vmatpush1.bf16.msra.mxu0 %v1812_v27  ;;  %v1838_v45 = vld [vmem:[%s2104_s11 + $0x1c4] ss:$16 sps:$4 sm:$0xff]   ;;  %v1842_v47 = vld [vmem:[%s2104_s11 + $0x1c0] ss:$16 sps:$4 sm:$0xff]   ;;  %v1904_v27 = vld [vmem:[%s2104_s11 + $0x88] ss:$16 sps:$4 sm:$0xff]  }
  0x3e   : > { %1193 = vmatpush1.bf16.msra.mxu1 %v1813_v28  ;;  %1141 = vmatprep.subr.bf16.mxu0 %v1814_v29  ;;  %v1840_v46 = vld [vmem:[%s2104_s11 + $0x3c4] ss:$16 sps:$4 sm:$0xff]   ;;  %v1843_v48 = vld [vmem:[%s2104_s11 + $0x3c0] ss:$16 sps:$4 sm:$0xff]   ;;  %v1907_v28 = vld [vmem:[%s2104_s11 + $0x288] ss:$16 sps:$4 sm:$0xff]  }
  0x3f   : > { %1194 = vmatprep.subr.bf16.mxu1 %v1816_v30  ;;  %v1844_v49 = vld [vmem:[%s2104_s11 + $0x1a4] ss:$16 sps:$4 sm:$0xff]   ;;  %v1848_v51 = vld [vmem:[%s2104_s11 + $0x1a0] ss:$16 sps:$4 sm:$0xff]   ;;  %v1912_v29 = vld [vmem:[%s2104_s11 + $0x6c] ss:$16 sps:$4 sm:$0xff]  }
  0x40   : > { %v1846_v50 = vld [vmem:[%s2104_s11 + $0x3a4] ss:$16 sps:$4 sm:$0xff]   ;;  %v1849_v52 = vld [vmem:[%s2104_s11 + $0x3a0] ss:$16 sps:$4 sm:$0xff]   ;;  %v1915_v30 = vld [vmem:[%s2104_s11 + $0x26c] ss:$16 sps:$4 sm:$0xff]  }
  0x41   : > { %1142 = vmatpush1.bf16.msra.mxu0 %v1818_v31  ;;  %v1850_v53 = vld [vmem:[%s2104_s11 + $0x184] ss:$16 sps:$4 sm:$0xff]   ;;  %v1854_v55 = vld [vmem:[%s2104_s11 + $0x180] ss:$16 sps:$4 sm:$0xff]   ;;  %v1910_v31 = vld [vmem:[%s2104_s11 + $0x68] ss:$16 sps:$4 sm:$0xff]  }
  0x42   : > { %1195 = vmatpush1.bf16.msra.mxu1 %v1819_v32  ;;  %1143 = vmatprep.subr.bf16.mxu0 %v1820_v33  ;;  %v1852_v54 = vld [vmem:[%s2104_s11 + $0x384] ss:$16 sps:$4 sm:$0xff]   ;;  %v1855_v56 = vld [vmem:[%s2104_s11 + $0x380] ss:$16 sps:$4 sm:$0xff]   ;;  %v1913_v32 = vld [vmem:[%s2104_s11 + $0x268] ss:$16 sps:$4 sm:$0xff]  }
  0x43   : > { %1196 = vmatprep.subr.bf16.mxu1 %v1822_v34  ;;  %v1856_v57 = vld [vmem:[%s2104_s11 + $0x164] ss:$16 sps:$4 sm:$0xff]   ;;  %v1860_v61 = vld [vmem:[%s2104_s11 + $0x160] ss:$16 sps:$4 sm:$0xff]   ;;  %v1918_v33 = vld [vmem:[%s2104_s11 + $0x4c] ss:$16 sps:$4 sm:$0xff]  }
  0x44   : > { %v2207_v58 = vld [vmem:[%s2106_s12 + $0x4] ss:$16 sps:$4 sm:$0xff]   ;;  %v1861_v62 = vld [vmem:[%s2104_s11 + $0x360] ss:$16 sps:$4 sm:$0xff]   ;;  %v1921_v34 = vld [vmem:[%s2104_s11 + $0x24c] ss:$16 sps:$4 sm:$0xff]  }
  0x45   : > { %1144 = vmatpush1.bf16.msra.mxu0 %v1824_v35  ;;  %v1858_v59 = vld [vmem:[%s2104_s11 + $0x364] ss:$16 sps:$4 sm:$0xff]   ;;  %1163 = vmatprep.mubr.bf16.mxu0 %v2207_v58  ;;  %v1866_v1 = vld [vmem:[%s2104_s11 + $0x140] ss:$16 sps:$4 sm:$0xff]  }
  0x46   : > { %1197 = vmatpush1.bf16.msra.mxu1 %v1825_v36  ;;  %1145 = vmatprep.subr.bf16.mxu0 %v1826_v37  ;;  %v1862_v63 = vld [vmem:[%s2104_s11 + $0x144] ss:$16 sps:$4 sm:$0xff]   ;;  %v1867_v2 = vld [vmem:[%s2104_s11 + $0x340] ss:$16 sps:$4 sm:$0xff]   ;;  %v2263_v36 = vld [vmem:[%s2106_s12 + $0x2c] ss:$16 sps:$4 sm:$0xff]  }
  0x47   : > { %1198 = vmatprep.subr.bf16.mxu1 %v1828_v38  ;;  %v1864_v0 = vld [vmem:[%s2104_s11 + $0x344] ss:$16 sps:$4 sm:$0xff]   ;;  %v1872_v5 = vld [vmem:[%s2104_s11 + $0x120] ss:$16 sps:$4 sm:$0xff]   ;;  %v2270_v38 = vld [vmem:[%s2106_s12 + $0x28] ss:$16 sps:$4 sm:$0xff]  }
  0x48   : > { %v1868_v3 = vld [vmem:[%s2104_s11 + $0x124] ss:$16 sps:$4 sm:$0xff]   ;;  %v1873_v6 = vld [vmem:[%s2104_s11 + $0x320] ss:$16 sps:$4 sm:$0xff]  }
  0x49   : > { %1146 = vmatpush1.bf16.msra.mxu0 %v1830_v39  ;;  %v1870_v4 = vld [vmem:[%s2104_s11 + $0x324] ss:$16 sps:$4 sm:$0xff]   ;;  %v1878_v9 = vld [vmem:[%s2104_s11 + $0x100] ss:$16 sps:$4 sm:$0xff]   ;;  %v1916_v39 = vld [vmem:[%s2104_s11 + $0x48] ss:$16 sps:$4 sm:$0xff]  }
  0x4a   : > { %1199 = vmatpush1.bf16.msra.mxu1 %v1831_v40  ;;  %1147 = vmatprep.subr.bf16.mxu0 %v1832_v41  ;;  %v1874_v7 = vld [vmem:[%s2104_s11 + $0x104] ss:$16 sps:$4 sm:$0xff]   ;;  %v1879_v10 = vld [vmem:[%s2104_s11 + $0x300] ss:$16 sps:$4 sm:$0xff]   ;;  %v1919_v40 = vld [vmem:[%s2104_s11 + $0x248] ss:$16 sps:$4 sm:$0xff]  }
  0x4b   : > { %1200 = vmatprep.subr.bf16.mxu1 %v1834_v42  ;;  %v1876_v8 = vld [vmem:[%s2104_s11 + $0x304] ss:$16 sps:$4 sm:$0xff]   ;;  %v2232_v13 = vld [vmem:[%s2106_s12] ss:$16 sps:$4 sm:$0xff]   ;;  %v1924_v41 = vld [vmem:[%s2104_s11 + $0x2c] ss:$16 sps:$4 sm:$0xff]  }
  0x4c   : > { %v2260_v35 = vld [vmem:[%s2106_s12 + $0x24] ss:$16 sps:$4 sm:$0xff]   ;;  %v2267_v37 = vld [vmem:[%s2106_s12 + $0x20] ss:$16 sps:$4 sm:$0xff]   ;;  %v1927_v42 = vld [vmem:[%s2104_s11 + $0x22c] ss:$16 sps:$4 sm:$0xff]  }
  0x4d   : > { %1148 = vmatpush2.bf16.msra.mxu0 %v1836_v43  ;;  %v1922_v43 = vld [vmem:[%s2104_s11 + $0x28] ss:$16 sps:$4 sm:$0xff]  }
  0x4e   : > { %1201 = vmatpush2.bf16.msra.mxu1 %v1837_v44  ;;  %1149 = vmatprep.subr.bf16.mxu0 %v1838_v45  ;;  %v1925_v44 = vld [vmem:[%s2104_s11 + $0x228] ss:$16 sps:$4 sm:$0xff]   ;;  %v1930_v45 = vld [vmem:[%s2104_s11 + $0xc] ss:$16 sps:$4 sm:$0xff]  }
  0x4f   : > { %1202 = vmatprep.subr.bf16.mxu1 %v1840_v46  ;;  %v1933_v46 = vld [vmem:[%s2104_s11 + $0x20c] ss:$16 sps:$4 sm:$0xff]  }
  0x51   : > { %1150 = vmatpush2.bf16.msra.mxu0 %v1842_v47  ;;  %v1928_v47 = vld [vmem:[%s2104_s11 + $0x8] ss:$16 sps:$4 sm:$0xff]  }
  0x52   : > { %1203 = vmatpush2.bf16.msra.mxu1 %v1843_v48  ;;  %1151 = vmatprep.subr.bf16.mxu0 %v1844_v49  ;;  %v1931_v48 = vld [vmem:[%s2104_s11 + $0x208] ss:$16 sps:$4 sm:$0xff]   ;;  %v1936_v49 = vld [vmem:[%s2104_s11 + $0x1ec] ss:$16 sps:$4 sm:$0xff]  }
  0x53   : > { %1204 = vmatprep.subr.bf16.mxu1 %v1846_v50  ;;  %v1939_v50 = vld [vmem:[%s2104_s11 + $0x3ec] ss:$16 sps:$4 sm:$0xff]  }
  0x55   : > { %1152 = vmatpush2.bf16.msra.mxu0 %v1848_v51  ;;  %v1934_v51 = vld [vmem:[%s2104_s11 + $0x1e8] ss:$16 sps:$4 sm:$0xff]  }
  0x56   : > { %1205 = vmatpush2.bf16.msra.mxu1 %v1849_v52  ;;  %1153 = vmatprep.subr.bf16.mxu0 %v1850_v53  ;;  %v1937_v52 = vld [vmem:[%s2104_s11 + $0x3e8] ss:$16 sps:$4 sm:$0xff]   ;;  %v1942_v53 = vld [vmem:[%s2104_s11 + $0x1cc] ss:$16 sps:$4 sm:$0xff]  }
  0x57   : > { %1206 = vmatprep.subr.bf16.mxu1 %v1852_v54  ;;  %v1945_v54 = vld [vmem:[%s2104_s11 + $0x3cc] ss:$16 sps:$4 sm:$0xff]  }
  0x59   : > { %1154 = vmatpush2.bf16.msra.mxu0 %v1854_v55  ;;  %v1940_v55 = vld [vmem:[%s2104_s11 + $0x1c8] ss:$16 sps:$4 sm:$0xff]  }
  0x5a   : > { %1207 = vmatpush2.bf16.msra.mxu1 %v1855_v56  ;;  %1155 = vmatprep.subr.bf16.mxu0 %v1856_v57  ;;  %v1943_v56 = vld [vmem:[%s2104_s11 + $0x3c8] ss:$16 sps:$4 sm:$0xff]   ;;  %v1948_v57 = vld [vmem:[%s2104_s11 + $0x1ac] ss:$16 sps:$4 sm:$0xff]  }
  0x5b   : > { %1208 = vmatprep.subr.bf16.mxu1 %v1858_v59  ;;  %v1946_v59 = vld [vmem:[%s2104_s11 + $0x1a8] ss:$16 sps:$4 sm:$0xff]  }
  0x5d   : > { %1156 = vmatpush2.bf16.msra.mxu0 %v1860_v61  ;;  %v1954_v61 = vld [vmem:[%s2104_s11 + $0x18c] ss:$16 sps:$4 sm:$0xff]  }
  0x5e   : > { %1209 = vmatpush2.bf16.msra.mxu1 %v1861_v62  ;;  %1157 = vmatprep.subr.bf16.mxu0 %v1862_v63  ;;  %v1957_v62 = vld [vmem:[%s2104_s11 + $0x38c] ss:$16 sps:$4 sm:$0xff]   ;;  %v1952_v63 = vld [vmem:[%s2104_s11 + $0x188] ss:$16 sps:$4 sm:$0xff]  }
  0x5f   : > { %1210 = vmatprep.subr.bf16.mxu1 %v1864_v0  ;;  %v1955_v0 = vld [vmem:[%s2104_s11 + $0x388] ss:$16 sps:$4 sm:$0xff]  }
  0x61   : > { %1158 = vmatpush2.bf16.msra.mxu0 %v1866_v1  ;;  %v1960_v1 = vld [vmem:[%s2104_s11 + $0x16c] ss:$16 sps:$4 sm:$0xff]  }
  0x62   : > { %1211 = vmatpush2.bf16.msra.mxu1 %v1867_v2  ;;  %1159 = vmatprep.subr.bf16.mxu0 %v1868_v3  ;;  %v1963_v2 = vld [vmem:[%s2104_s11 + $0x36c] ss:$16 sps:$4 sm:$0xff]   ;;  %v1958_v3 = vld [vmem:[%s2104_s11 + $0x168] ss:$16 sps:$4 sm:$0xff]  }
  0x63   : > { %1212 = vmatprep.subr.bf16.mxu1 %v1870_v4  ;;  %v1961_v4 = vld [vmem:[%s2104_s11 + $0x368] ss:$16 sps:$4 sm:$0xff]  }
  0x65   : > { %1160 = vmatpush2.bf16.msra.mxu0 %v1872_v5  ;;  %v1972_v5 = vld [vmem:[%s2104_s11 + $0x14c] ss:$16 sps:$4 sm:$0xff]  }
  0x66   : > { %1213 = vmatpush2.bf16.msra.mxu1 %v1873_v6  ;;  %1161 = vmatprep.subr.bf16.mxu0 %v1874_v7  ;;  %v1975_v6 = vld [vmem:[%s2104_s11 + $0x34c] ss:$16 sps:$4 sm:$0xff]   ;;  %v1970_v7 = vld [vmem:[%s2104_s11 + $0x148] ss:$16 sps:$4 sm:$0xff]  }
  0x67   : > { %1214 = vmatprep.subr.bf16.mxu1 %v1876_v8  ;;  %v1973_v8 = vld [vmem:[%s2104_s11 + $0x348] ss:$16 sps:$4 sm:$0xff]  }
  0x69   : > { %1162 = vmatpush2.bf16.msra.mxu0 %v1878_v9  ;;  %v1978_v9 = vld [vmem:[%s2104_s11 + $0x12c] ss:$16 sps:$4 sm:$0xff]  }
  0x6a   : > { %1215 = vmatpush2.bf16.msra.mxu1 %v1879_v10  ;;  %1237 = vmatprep.subr.bf16.mxu0 %v1888_v11  ;;  %v1981_v10 = vld [vmem:[%s2104_s11 + $0x32c] ss:$16 sps:$4 sm:$0xff]   ;;  %v1976_v11 = vld [vmem:[%s2104_s11 + $0x128] ss:$16 sps:$4 sm:$0xff]  }
  0x6b   : > { %1290 = vmatprep.subr.bf16.mxu1 %v1891_v12  ;;  %v1979_v12 = vld [vmem:[%s2104_s11 + $0x328] ss:$16 sps:$4 sm:$0xff]  }
  0x6c   : > { %1164 = vmatmul.mubr.bf16.vlgmr.msra.gmra.mxu0 %v2232_v13 }
  0x6d   : > { %1217 = vmatmul.mubr.bf16.vlgmr.msra.gmra.mxu1 %v2235_v14  ;;  %1238 = vmatpush1.bf16.msra.mxu0 %v1886_v15  ;;  %v1984_v15 = vld [vmem:[%s2104_s11 + $0x10c] ss:$16 sps:$4 sm:$0xff]  }
  0x6e   : > { %1291 = vmatpush1.bf16.msra.mxu1 %v1889_v16  ;;  %1239 = vmatprep.subr.bf16.mxu0 %v1894_v17  ;;  %v1987_v16 = vld [vmem:[%s2104_s11 + $0x30c] ss:$16 sps:$4 sm:$0xff]   ;;  %v1982_v17 = vld [vmem:[%s2104_s11 + $0x108] ss:$16 sps:$4 sm:$0xff]  }
  0x6f   : > { %1292 = vmatprep.subr.bf16.mxu1 %v1897_v18  ;;  %1173 = vmatprep.mubr.bf16.mxu0 %v2260_v35  ;;  %v1985_v18 = vld [vmem:[%s2104_s11 + $0x308] ss:$16 sps:$4 sm:$0xff]  }
  0x70   : > { %1226 = vmatprep.mubr.bf16.mxu1 %v2263_v36 }
  0x71   : > { %1240 = vmatpush1.bf16.msra.mxu0 %v1892_v19 }
  0x72   : > { %1293 = vmatpush1.bf16.msra.mxu1 %v1895_v20  ;;  %1241 = vmatprep.subr.bf16.mxu0 %v1900_v21  ;;  %v299_v20 = vld [vmem:[%s2543_s4] sm:$0xff] }
  0x73   : > { %1294 = vmatprep.subr.bf16.mxu1 %v1903_v22 }
  0x74   : > { %1174 = vmatmul.mubr.bf16.gmra.mxu0 %v2267_v37 }
  0x75   : > { %1242 = vmatpush1.bf16.msra.mxu0 %v1898_v23  ;;  %1227 = vmatmul.mubr.bf16.gmra.mxu1 %v2270_v38 }
  0x76   : > { %1295 = vmatpush1.bf16.msra.mxu1 %v1901_v24  ;;  %1243 = vmatprep.subr.bf16.mxu0 %v1906_v25 }
  0x77   : > { %1296 = vmatprep.subr.bf16.mxu1 %v1909_v26  ;;  %1269 = vmatprep.mubr.bf16.mxu0 %v2207_v58  ;;  %v1951_v58 = vld [vmem:[%s2104_s11 + $0x3ac] ss:$16 sps:$4 sm:$0xff]  }
  0x78   : > { %1322 = vmatprep.mubr.bf16.mxu1 %v2211_v60  ;;  %v1949_v60 = vld [vmem:[%s2104_s11 + $0x3a8] ss:$16 sps:$4 sm:$0xff]  }
  0x79   : > { %1244 = vmatpush1.bf16.msra.mxu0 %v1904_v27  ;;  %v303_v27 = vld [vmem:[%s2543_s4 + $0x20] sm:$0xff] }
  0x7a   : > { %1297 = vmatpush1.bf16.msra.mxu1 %v1907_v28  ;;  %1245 = vmatprep.subr.bf16.mxu0 %v1912_v29 }
  0x7b   : > { %1298 = vmatprep.subr.bf16.mxu1 %v1915_v30 }
  0x7d   : > { %1246 = vmatpush1.bf16.msra.mxu0 %v1910_v31 }
  0x7e   : > { %1299 = vmatpush1.bf16.msra.mxu1 %v1913_v32  ;;  %1247 = vmatprep.subr.bf16.mxu0 %v1918_v33  ;;  %v304_v32 = vld [vmem:[%s2543_s4 + $0x28] sm:$0xff] }
  0x7f   : > { %1300 = vmatprep.subr.bf16.mxu1 %v1921_v34 }
  0x81   : > { %1248 = vmatpush1.bf16.msra.mxu0 %v1916_v39 }
  0x82   : > { %1301 = vmatpush1.bf16.msra.mxu1 %v1919_v40  ;;  %1249 = vmatprep.subr.bf16.mxu0 %v1924_v41 }
  0x83   : > { %1302 = vmatprep.subr.bf16.mxu1 %v1927_v42  ;;  %v308_v42 = vld [vmem:[%s2543_s4 + $0x48] sm:$0xff] }
  0x85   : > { %1250 = vmatpush1.bf16.msra.mxu0 %v1922_v43 }
  0x86   : > { %1303 = vmatpush1.bf16.msra.mxu1 %v1925_v44  ;;  %1251 = vmatprep.subr.bf16.mxu0 %v1930_v45 }
  0x87   : > { %1304 = vmatprep.subr.bf16.mxu1 %v1933_v46 }
  0x89   : > { %1252 = vmatpush1.bf16.msra.mxu0 %v1928_v47  ;;  %v311_v47 = vld [vmem:[%s2543_s4 + $0x60] sm:$0xff] }
  0x8a   : > { %1305 = vmatpush1.bf16.msra.mxu1 %v1931_v48  ;;  %1253 = vmatprep.subr.bf16.mxu0 %v1936_v49 }
  0x8b   : > { %1306 = vmatprep.subr.bf16.mxu1 %v1939_v50 }
  0x8d   : > { %1254 = vmatpush2.bf16.msra.mxu0 %v1934_v51 }
  0x8e   : > { %1307 = vmatpush2.bf16.msra.mxu1 %v1937_v52  ;;  %1255 = vmatprep.subr.bf16.mxu0 %v1942_v53  ;;  %v312_v52 = vld [vmem:[%s2543_s4 + $0x68] sm:$0xff] }
  0x8f   : > { %1308 = vmatprep.subr.bf16.mxu1 %v1945_v54 }
  0x91   : > { %1256 = vmatpush2.bf16.msra.mxu0 %v1940_v55 }
  0x92   : > { %1309 = vmatpush2.bf16.msra.mxu1 %v1943_v56  ;;  %1257 = vmatprep.subr.bf16.mxu0 %v1948_v57 }
  0x93   : > { %1310 = vmatprep.subr.bf16.mxu1 %v1951_v58  ;;  %v301_v58 = vld [vmem:[%s2543_s4 + $0x10] sm:$0xff] }
  0x95   : > { %1258 = vmatpush2.bf16.msra.mxu0 %v1946_v59 }
  0x96   : > { %1311 = vmatpush2.bf16.msra.mxu1 %v1949_v60  ;;  %1259 = vmatprep.subr.bf16.mxu0 %v1954_v61 }
  0x97   : > { %1312 = vmatprep.subr.bf16.mxu1 %v1957_v62  ;;  %v302_v62 = vld [vmem:[%s2543_s4 + $0x18] sm:$0xff] }
  0x99   : > { %1260 = vmatpush2.bf16.msra.mxu0 %v1952_v63 }
  0x9a   : > { %1313 = vmatpush2.bf16.msra.mxu1 %v1955_v0  ;;  %1261 = vmatprep.subr.bf16.mxu0 %v1960_v1 }
  0x9b   : > { %1314 = vmatprep.subr.bf16.mxu1 %v1963_v2 }
  0x9d   : > { %1262 = vmatpush2.bf16.msra.mxu0 %v1958_v3  ;;  %v305_v3 = vld [vmem:[%s2543_s4 + $0x30] sm:$0xff] }
  0x9e   : > { %1315 = vmatpush2.bf16.msra.mxu1 %v1961_v4  ;;  %1263 = vmatprep.subr.bf16.mxu0 %v1972_v5 }
  0x9f   : > { %1316 = vmatprep.subr.bf16.mxu1 %v1975_v6 }
  0xa1   : > { %1264 = vmatpush2.bf16.msra.mxu0 %v1970_v7 }
  0xa2   : > { %1317 = vmatpush2.bf16.msra.mxu1 %v1973_v8  ;;  %1265 = vmatprep.subr.bf16.mxu0 %v1978_v9  ;;  %v306_v8 = vld [vmem:[%s2543_s4 + $0x38] sm:$0xff] }
  0xa3   : > { %1318 = vmatprep.subr.bf16.mxu1 %v1981_v10 }
  0xa5   : > { %1266 = vmatpush2.bf16.msra.mxu0 %v1976_v11 }
  0xa6   : > { %1319 = vmatpush2.bf16.msra.mxu1 %v1979_v12  ;;  %1267 = vmatprep.subr.bf16.mxu0 %v1984_v15  ;;  %v309_v15 = vld [vmem:[%s2543_s4 + $0x50] sm:$0xff] }
  0xa7   : > { %1320 = vmatprep.subr.bf16.mxu1 %v1987_v16 }
  0xa9   : > { %1268 = vmatpush2.bf16.msra.mxu0 %v1982_v17 }
  0xaa   : > { %1321 = vmatpush2.bf16.msra.mxu1 %v1985_v18 }
  0xac   : > { %1270 = vmatmul.mubr.bf16.vlgmr.msra.gmra.mxu0 %v2232_v13  ;;  %v300_v13 = vld [vmem:[%s2543_s4 + $0x8] sm:$0xff] }
  0xad   : > { %1323 = vmatmul.mubr.bf16.vlgmr.msra.gmra.mxu1 %v2235_v14  ;;  %1279 = vmatprep.mubr.bf16.mxu0 %v2260_v35 }
  0xae   : > { %1332 = vmatprep.mubr.bf16.mxu1 %v2263_v36 }
  0xb4   : > { %1280 = vmatmul.mubr.bf16.gmra.mxu0 %v2267_v37 }
  0xb5   : > { %1333 = vmatmul.mubr.bf16.gmra.mxu1 %v2270_v38  ;;  %v307_v38 = vld [vmem:[%s2543_s4 + $0x40] sm:$0xff] }
 0x12c   : > { %v1165_v19 = vpop.f32.mrf.mxu0 }
 0x12d   : > { %v1218_v21 = vpop.f32.mrf.mxu1 }
 0x12e   : > { %v1219_v22 = vadd.f32 %v1218_v21, %v1165_v19  ;;  %v1167_v23 = vpop.f32.mrf.mxu0 }
 0x12f   : > { %v1220_v14 = vpop.f32.mrf.mxu1 }
 0x130   : > { %v1343_v24 = vadd.f32 %v1219_v22, %v299_v20  ;;  %v1221_v25 = vadd.f32 %v1220_v14, %v1167_v23  ;;  %v1169_v26 = vpop.f32.mrf.mxu0  ;;  %v310_v20 = vld [vmem:[%s2543_s4 + $0x58] sm:$0xff]  ;;  %v313_v14 = vld [vmem:[%s2543_s4 + $0x70] sm:$0xff] }
 0x131   : > { %v1222_v28 = vpop.f32.mrf.mxu1 }
 0x132   : > { %1359 = vst [vmem:[%s2543_s4] sm:$0xff] %v1343_v24  ;;  %v1344_v29 = vadd.f32 %v1221_v25, %v300_v13  ;;  %v1223_v30 = vadd.f32 %v1222_v28, %v1169_v26  ;;  %v1171_v31 = vpop.f32.mrf.mxu0  ;;  %v314_v28 = vld [vmem:[%s2543_s4 + $0x78] sm:$0xff] }
 0x133   : > { %v1224_v33 = vpop.f32.mrf.mxu1 }
 0x134   : > { %1360 = vst [vmem:[%s2543_s4 + $0x8] sm:$0xff] %v1344_v29  ;;  %v1347_v34 = vadd.f32 %v1223_v30, %v303_v27  ;;  %v1225_v35 = vadd.f32 %v1224_v33, %v1171_v31  ;;  %v1175_v37 = vpop.f32.mrf.mxu0 }
 0x135   : > { %v1228_v39 = vpop.f32.mrf.mxu1 }
 0x136   : > { %1363 = vst [vmem:[%s2543_s4 + $0x20] sm:$0xff] %v1347_v34  ;;  %v1348_v36 = vadd.f32 %v1225_v35, %v304_v32  ;;  %v1229_v40 = vadd.f32 %v1228_v39, %v1175_v37  ;;  %v1177_v41 = vpop.f32.mrf.mxu0 }
 0x137   : > { %v1230_v43 = vpop.f32.mrf.mxu1 }
 0x138   : > { %1364 = vst [vmem:[%s2543_s4 + $0x28] sm:$0xff] %v1348_v36  ;;  %v1351_v44 = vadd.f32 %v1229_v40, %v307_v38  ;;  %v1231_v45 = vadd.f32 %v1230_v43, %v1177_v41  ;;  %v1179_v46 = vpop.f32.mrf.mxu0 }
 0x139   : > { %v1232_v48 = vpop.f32.mrf.mxu1 }
 0x13a   : > { %1367 = vst [vmem:[%s2543_s4 + $0x40] sm:$0xff] %v1351_v44  ;;  %v1352_v49 = vadd.f32 %v1231_v45, %v308_v42  ;;  %v1233_v50 = vadd.f32 %v1232_v48, %v1179_v46  ;;  %v1181_v51 = vpop.f32.mrf.mxu0 }
 0x13b   : > { %v1234_v53 = vpop.f32.mrf.mxu1 }
 0x13c   : > { %1368 = vst [vmem:[%s2543_s4 + $0x48] sm:$0xff] %v1352_v49  ;;  %v1355_v54 = vadd.f32 %v1233_v50, %v311_v47  ;;  %v1235_v55 = vadd.f32 %v1234_v53, %v1181_v51 }
 0x13e   : > { %1371 = vst [vmem:[%s2543_s4 + $0x60] sm:$0xff] %v1355_v54  ;;  %v1356_v56 = vadd.f32 %v1235_v55, %v312_v52 }
 0x140   : > { %1372 = vst [vmem:[%s2543_s4 + $0x68] sm:$0xff] %v1356_v56 }
 0x16c   : > { %v1271_v57 = vpop.f32.mrf.mxu0 }
 0x16d   : > { %v1324_v59 = vpop.f32.mrf.mxu1 }
 0x16e   : > { %v1325_v60 = vadd.f32 %v1324_v59, %v1271_v57  ;;  %v1273_v61 = vpop.f32.mrf.mxu0 }
 0x16f   : > { %v1326_v63 = vpop.f32.mrf.mxu1 }
 0x170   : > { %v1345_v0 = vadd.f32 %v1325_v60, %v301_v58  ;;  %v1327_v1 = vadd.f32 %v1326_v63, %v1273_v61  ;;  %v1275_v2 = vpop.f32.mrf.mxu0 }
 0x171   : > { %v1328_v4 = vpop.f32.mrf.mxu1 }
 0x172   : > { %1361 = vst [vmem:[%s2543_s4 + $0x10] sm:$0xff] %v1345_v0  ;;  %v1346_v5 = vadd.f32 %v1327_v1, %v302_v62  ;;  %v1329_v6 = vadd.f32 %v1328_v4, %v1275_v2  ;;  %v1277_v7 = vpop.f32.mrf.mxu0 }
 0x173   : > { %v1330_v9 = vpop.f32.mrf.mxu1 }
 0x174   : > { %1362 = vst [vmem:[%s2543_s4 + $0x18] sm:$0xff] %v1346_v5  ;;  %v1349_v10 = vadd.f32 %v1329_v6, %v305_v3  ;;  %v1331_v11 = vadd.f32 %v1330_v9, %v1277_v7  ;;  %v1281_v12 = vpop.f32.mrf.mxu0 }
 0x175   : > { %v1334_v16 = vpop.f32.mrf.mxu1 }
 0x176   : > { %1365 = vst [vmem:[%s2543_s4 + $0x30] sm:$0xff] %v1349_v10  ;;  %v1350_v17 = vadd.f32 %v1331_v11, %v306_v8  ;;  %v1335_v18 = vadd.f32 %v1334_v16, %v1281_v12  ;;  %v1283_v19 = vpop.f32.mrf.mxu0 }
 0x177   : > { %v1336_v21 = vpop.f32.mrf.mxu1 }
 0x178   : > { %1366 = vst [vmem:[%s2543_s4 + $0x38] sm:$0xff] %v1350_v17  ;;  %v1353_v22 = vadd.f32 %v1335_v18, %v309_v15  ;;  %v1337_v23 = vadd.f32 %v1336_v21, %v1283_v19  ;;  %v1285_v13 = vpop.f32.mrf.mxu0 }
 0x179   : > { %v1338_v24 = vpop.f32.mrf.mxu1 }
 0x17a   : > { %1369 = vst [vmem:[%s2543_s4 + $0x50] sm:$0xff] %v1353_v22  ;;  %v1354_v25 = vadd.f32 %v1337_v23, %v310_v20  ;;  %v1339_v26 = vadd.f32 %v1338_v24, %v1285_v13  ;;  %v1287_v27 = vpop.f32.mrf.mxu0 }
 0x17b   : > { %v1340_v29 = vpop.f32.mrf.mxu1 }
 0x17c   : > { %1370 = vst [vmem:[%s2543_s4 + $0x58] sm:$0xff] %v1354_v25  ;;  %v1357_v30 = vadd.f32 %v1339_v26, %v313_v14  ;;  %v1341_v31 = vadd.f32 %v1340_v29, %v1287_v27  ;;  %1378 = sbr.rel (%p1736_p11) target bundleno = 410 (0x19a), region = 67 }
 0x17e   : > { %1373 = vst [vmem:[%s2543_s4 + $0x70] sm:$0xff] %v1357_v30  ;;  %v1358_v32 = vadd.f32 %v1341_v31, %v314_v28 }
 0x180   : > { %1374 = vst [vmem:[%s2543_s4 + $0x78] sm:$0xff] %v1358_v32 }
 0x181   : > { %v1397_v33 = vlaneseq  ;;  %v1395_v35 = vld [vmem:[%s2541_s2] sm:$0xf]  ;;  %v1380_v39 = vld [vmem:[%s2543_s4 + $0x8] sm:$0xff]  ;;  %v1381_v43 = vld [vmem:[%s2543_s4 + $0x10] sm:$0xff] }
 0x182   : > { %v1433_v36 = vld [vmem:[%s2542_s3] sm:$0xf]  ;;  %v1384_v45 = vld [vmem:[%s2543_s4 + $0x28] sm:$0xff]  ;;  %v1382_v50 = vld [vmem:[%s2543_s4 + $0x18] sm:$0xff] }
 0x183   : > { %v1398_v34 = vshrl.u32 %v1397_v33, 7  ;;  %v1379_v37 = vld [vmem:[%s2543_s4] sm:$0xff]  ;;  %v1385_v51 = vld [vmem:[%s2543_s4 + $0x30] sm:$0xff]  ;;  %v1386_v52 = vld [vmem:[%s2543_s4 + $0x38] sm:$0xff] }
 0x184   : > { %v1383_v44 = vld [vmem:[%s2543_s4 + $0x20] sm:$0xff]  ;;  %v1388_v6 = vld [vmem:[%s2543_s4 + $0x48] sm:$0xff]  ;;  %v1389_v7 = vld [vmem:[%s2543_s4 + $0x50] sm:$0xff] }
 0x185   : > { %v1399_v38 = vsub.s32 0, %v1398_v34  ;;  %v1403_v40 = vsub.s32 1, %v1398_v34  ;;  %v1407_v41 = vsub.s32 2, %v1398_v34  ;;  %v1411_v42 = vsub.s32 3, %v1398_v34  ;;  %v1387_v5 = vld [vmem:[%s2543_s4 + $0x40] sm:$0xff]  ;;  %v1390_v12 = vld [vmem:[%s2543_s4 + $0x58] sm:$0xff] }
 0x186   : > { %v1391_v15 = vld [vmem:[%s2543_s4 + $0x60] sm:$0xff]  ;;  %v1392_v16 = vld [vmem:[%s2543_s4 + $0x68] sm:$0xff]  ;;  %v1393_v21 = vld [vmem:[%s2543_s4 + $0x70] sm:$0xff] }
 0x187   : > { %v1400_v46 = vrot.slane %v1395_v35, %v1399_v38  ;;  %v1438_v47 = vrot.slane %v1433_v36, %v1399_v38  ;;  %v1404_v48 = vrot.slane %v1395_v35, %v1403_v40  ;;  %v1442_v49 = vrot.slane %v1433_v36, %v1403_v40  ;;  %v1394_v22 = vld [vmem:[%s2543_s4 + $0x78] sm:$0xff] }
 0x188   : > { %v1408_v53 = vrot.slane %v1395_v35, %v1407_v41  ;;  %v1446_v54 = vrot.slane %v1433_v36, %v1407_v41  ;;  %v1412_v55 = vrot.slane %v1395_v35, %v1411_v42  ;;  %v1450_v56 = vrot.slane %v1433_v36, %v1411_v42 }
 0x189   : > { %v1417_v57 = vmul.f32 %v1400_v46, %v1379_v37  ;;  %v1418_v58 = vmul.f32 %v1404_v48, %v1380_v39  ;;  %v1421_v59 = vmul.f32 %v1400_v46, %v1383_v44  ;;  %v1422_v60 = vmul.f32 %v1404_v48, %v1384_v45 }
 0x18a   : > { %v1419_v61 = vmul.f32 %v1408_v53, %v1381_v43  ;;  %v1420_v62 = vmul.f32 %v1412_v55, %v1382_v50  ;;  %v1423_v63 = vmul.f32 %v1408_v53, %v1385_v51  ;;  %v1424_v0 = vmul.f32 %v1412_v55, %v1386_v52 }
 0x18b   : > { %v1455_v1 = vadd.f32 %v1438_v47, %v1417_v57  ;;  %v1456_v2 = vadd.f32 %v1442_v49, %v1418_v58  ;;  %v1459_v3 = vadd.f32 %v1438_v47, %v1421_v59  ;;  %v1460_v4 = vadd.f32 %v1442_v49, %v1422_v60 }
 0x18c   : > { %v1457_v8 = vadd.f32 %v1446_v54, %v1419_v61  ;;  %v1458_v9 = vadd.f32 %v1450_v56, %v1420_v62  ;;  %v1461_v10 = vadd.f32 %v1446_v54, %v1423_v63  ;;  %v1462_v11 = vadd.f32 %v1450_v56, %v1424_v0 }
 0x18d   : > { %v1471_v17 = vmax.f32 %v1455_v1, 0.0  ;;  %v1472_v18 = vmax.f32 %v1456_v2, 0.0  ;;  %v1475_v19 = vmax.f32 %v1459_v3, 0.0  ;;  %v1476_v20 = vmax.f32 %v1460_v4, 0.0 }
 0x18e   : > { %v1473_v23 = vmax.f32 %v1457_v8, 0.0  ;;  %v1474_v13 = vmax.f32 %v1458_v9, 0.0  ;;  %v1477_v14 = vmax.f32 %v1461_v10, 0.0  ;;  %v1478_v24 = vmax.f32 %v1462_v11, 0.0 }
 0x18f   : > { %1487 = vst [vmem:[%s2543_s4] sm:$0xff] %v1471_v17  ;;  %1488 = vst [vmem:[%s2543_s4 + $0x8] sm:$0xff] %v1472_v18  ;;  %v1425_v25 = vmul.f32 %v1400_v46, %v1387_v5  ;;  %v1426_v26 = vmul.f32 %v1404_v48, %v1388_v6  ;;  %v1427_v27 = vmul.f32 %v1408_v53, %v1389_v7 }
 0x190   : > { %1491 = vst [vmem:[%s2543_s4 + $0x20] sm:$0xff] %v1475_v19  ;;  %1492 = vst [vmem:[%s2543_s4 + $0x28] sm:$0xff] %v1476_v20  ;;  %v1428_v28 = vmul.f32 %v1412_v55, %v1390_v12  ;;  %v1429_v29 = vmul.f32 %v1400_v46, %v1391_v15  ;;  %v1430_v30 = vmul.f32 %v1404_v48, %v1392_v16 }
 0x191   : > { %1489 = vst [vmem:[%s2543_s4 + $0x10] sm:$0xff] %v1473_v23  ;;  %1490 = vst [vmem:[%s2543_s4 + $0x18] sm:$0xff] %v1474_v13  ;;  %v1431_v31 = vmul.f32 %v1408_v53, %v1393_v21  ;;  %v1432_v32 = vmul.f32 %v1412_v55, %v1394_v22  ;;  %v1463_v33 = vadd.f32 %v1438_v47, %v1425_v25 }
 0x192   : > { %1493 = vst [vmem:[%s2543_s4 + $0x30] sm:$0xff] %v1477_v14  ;;  %1494 = vst [vmem:[%s2543_s4 + $0x38] sm:$0xff] %v1478_v24  ;;  %v1464_v34 = vadd.f32 %v1442_v49, %v1426_v26  ;;  %v1465_v35 = vadd.f32 %v1446_v54, %v1427_v27  ;;  %v1466_v36 = vadd.f32 %v1450_v56, %v1428_v28 }
 0x193   : > { %v1467_v37 = vadd.f32 %v1438_v47, %v1429_v29  ;;  %v1468_v38 = vadd.f32 %v1442_v49, %v1430_v30  ;;  %v1469_v39 = vadd.f32 %v1446_v54, %v1431_v31  ;;  %v1470_v40 = vadd.f32 %v1450_v56, %v1432_v32 }
 0x194   : > { %v1479_v41 = vmax.f32 %v1463_v33, 0.0  ;;  %v1480_v42 = vmax.f32 %v1464_v34, 0.0  ;;  %v1481_v43 = vmax.f32 %v1465_v35, 0.0  ;;  %v1482_v44 = vmax.f32 %v1466_v36, 0.0 }
 0x195   : > { %v1483_v45 = vmax.f32 %v1467_v37, 0.0  ;;  %v1484_v50 = vmax.f32 %v1468_v38, 0.0  ;;  %v1485_v51 = vmax.f32 %v1469_v39, 0.0  ;;  %v1486_v52 = vmax.f32 %v1470_v40, 0.0 }
 0x196   : > { %1495 = vst [vmem:[%s2543_s4 + $0x40] sm:$0xff] %v1479_v41  ;;  %1496 = vst [vmem:[%s2543_s4 + $0x48] sm:$0xff] %v1480_v42 }
 0x197   : > { %1497 = vst [vmem:[%s2543_s4 + $0x50] sm:$0xff] %v1481_v43  ;;  %1498 = vst [vmem:[%s2543_s4 + $0x58] sm:$0xff] %v1482_v44 }
 0x198   : > { %1499 = vst [vmem:[%s2543_s4 + $0x60] sm:$0xff] %v1483_v45  ;;  %1500 = vst [vmem:[%s2543_s4 + $0x68] sm:$0xff] %v1484_v50 }
 0x199   : > { %1501 = vst [vmem:[%s2543_s4 + $0x70] sm:$0xff] %v1485_v51  ;;  %1502 = vst [vmem:[%s2543_s4 + $0x78] sm:$0xff] %v1486_v52 }
 0x19a PF: > { %s14_s19 = sadd.s32 1, %s2026_s19   ;;  %s2544_s15 = smov %s2014_s16 }
 0x19b   : > { %p11_p12 = scmp.ge.s32.totalorder %s14_s19, 11   ;;  %s2545_s16 = smov %s2089_s23 }
 0x19c   : > { %s2546_s17 = smov %s2022_s18  ;;  %s2547_s18 = smov %s2549_s20 }
 0x19d   :  { %13 = sbr.rel (!%p11_p12) target bundleno = 3 (0x3), region = 105 }

// kernel: feature_embedder_forward.8
= control target key start
LH: loop header
LB: loop body
LE: loop exit
PB: predicated region body
PF: predicated region fallthrough
CT: control target
= control target key end

     0   :  { %s2159_s18 = smov 0   ;;  %s2161_s19 = smov 0   ;;  %s2740_s0 = inlined_call_operand.vmem [shape: bf16[32,4608], index: 0, kind: input, shape index: {}]   ;;  %s2741_s1 = inlined_call_operand.vmem [shape: bf16[4608,512], index: 1, kind: input, shape index: {}]   ;;  %s2742_s2 = inlined_call_operand.vmem [shape: f32[1,512], index: 2, kind: input, shape index: {}]   ;;  %s2743_s3 = inlined_call_operand.vmem [shape: f32[1,512], index: 3, kind: input, shape index: {}]   ;;  %s2744_s4 = inlined_call_operand.vmem [shape: f32[32,512], index: 4, kind: input, shape index: {}]   ;;  %s2745_s5 = inlined_call_operand.vmem [shape: f32[32,512], index: 5, kind: output, shape index: {}]  }
   0x1   :  { %s2163_s20 = smov 0   ;;  %s2165_s21 = smov 0  }
   0x2   :  { %s2167_s22 = smov 0  }
   0x3 LB: > { %s24_s23 = sadd.s32 1, %s2122_s21  ;;  %p43_p1 = scmp.ne.s32.totalorder %s2114_s19, %s2110_s18  ;;  %s2126_s22 = sphi %s2167_s22, %s15_s22   ;;  %s2122_s21 = sphi %s2165_s21, %s2749_s21   ;;  %s2118_s20 = sphi %s2163_s20, %s2748_s20   ;;  %s2114_s19 = sphi %s2161_s19, %s2747_s19   ;;  %s2110_s18 = sphi %s2159_s18, %s2746_s18  }
   0x4   : > { %p25_p0 = scmp.ge.s32.totalorder %s24_s23, 9  ;;  %p44_p2 = scmp.eq.s32.totalorder %s2126_s22, 0 }
   0x5   : > { %s36_s25 = sadd.s32 1, %s2114_s19  ;;  %p1690_p5 = scmp.ge.s32.totalorder %s2126_s22, 9 }
   0x6   : > { %s2751_s23 = smov (%p25_p0, %s24_s23), 0  ;;  %p45_p3 = por %p44_p2, %p43_p1 }
   0x7   : > { %s32_s24 = ssub.s32 %s2122_s21, %s2751_s23  ;;  %205 = sbr.rel (%p1690_p5) target bundleno = 20 (0x14), region = 28 }
   0x8   : > { %p34_p4 = scmp.eq.s32.totalorder %s32_s24, 0 }
   0xa   : > { %s2194_s26 = scalar_select %p34_p4, %s2114_s19, %s36_s25  }
   0xc   : > { %208 = sbr.rel (!%p45_p3) target bundleno = 20 (0x14), region = 32  ;;  %s210_s27 = sand.u32 (%p45_p3), 1, %s2114_s19  }
   0xd   : > { %s1841_s28 = sshll.u32 (%p45_p3), %s2122_s21, 4  ;;  %s1691_s29 = sshll.u32 (%p45_p3), %s210_s27, 6 }
   0xe   : > { %s218_s7 = scalar_lea.vmem (%p45_p3), %s2740_s0, %s1841_s28  ;;  %s212_s8 = scalar_lea.vmem (%p45_p3), [#allocation2], %s1691_s29 }
   0xf   : > { %v231_v0 = vld [vmem:[%s218_s7] sm:$0xff] (%p45_p3)  ;;  %v233_v1 = vld [vmem:[%s218_s7 + $0x8] sm:$0xff] (%p45_p3)  ;;  %v235_v2 = vld [vmem:[%s218_s7 + $0x90] sm:$0xff] (%p45_p3) }
  0x10   : > { %232 = vst [vmem:[%s212_s8] sm:$0xff] (%p45_p3), %v231_v0  ;;  %234 = vst [vmem:[%s212_s8 + $0x8] sm:$0xff] (%p45_p3), %v233_v1  ;;  %v237_v3 = vld [vmem:[%s218_s7 + $0x98] sm:$0xff] (%p45_p3)  ;;  %v239_v4 = vld [vmem:[%s218_s7 + $0x120] sm:$0xff] (%p45_p3) }
  0x11   : > { %236 = vst [vmem:[%s212_s8 + $0x10] sm:$0xff] %v235_v2  ;;  %v241_v5 = vld [vmem:[%s218_s7 + $0x128] sm:$0xff]  ;;  %238 = vst [vmem:[%s212_s8 + $0x18] sm:$0xff] %v237_v3  ;;  %v243_v6 = vld [vmem:[%s218_s7 + $0x1b0] sm:$0xff] }
  0x12   : > { %240 = vst [vmem:[%s212_s8 + $0x20] sm:$0xff] %v239_v4  ;;  %242 = vst [vmem:[%s212_s8 + $0x28] sm:$0xff] %v241_v5  ;;  %v245_v7 = vld [vmem:[%s218_s7 + $0x1b8] sm:$0xff] }
  0x13   : > { %244 = vst [vmem:[%s212_s8 + $0x30] sm:$0xff] %v243_v6  ;;  %246 = vst [vmem:[%s212_s8 + $0x38] sm:$0xff] %v245_v7 }
  0x14 PF: > { %p1694_p6 = scmp.ge.s32.totalorder %s2126_s22, 1  ;;  %p261_p7 = scmp.lt.s32.totalorder %s2126_s22, 10 }
  0x16   : > { %p262_p8 = pnand %p1694_p6, %p261_p7 }
  0x17   : > { %s268_s9 = sand.u32 (!%p262_p8), 1, %s2110_s18   ;;  %s1696_s10 = sshll.u32 (!%p262_p8), %s2118_s20, 6 }
  0x18   : > { %265 = sbr.rel (%p262_p8) target bundleno = 414 (0x19e), region = 59  ;;  %s1695_s11 = sshll.u32 (!%p262_p8), %s268_s9, 6 }
  0x19   : > { %p311_p9 = scmp.lt.s32.totalorder (!%p262_p8), %s1696_s10, 575  ;;  %s2211_s16 = scalar_lea.vmem (!%p262_p8), [#allocation2], %s1695_s11 }
  0x1a   : > { %p1699_p10 = scmp.ne.s32.totalorder (!%p262_p8), %s2118_s20, 0 }
  0x1d   : > { %s2753_s10 = smov (!%p311_p9, %s1696_s10), 575  ;;  %334 = sbr.rel (%p1699_p10) target bundleno = 43 (0x2b), region = 67 }
  0x1e   : > { %s1842_s12 = sshll.u32 %s2753_s10, 4 }
  0x1f   : > { %s2209_s15 = scalar_lea.vmem %s2741_s1, %s1842_s12 }
  0x22   : > { %v2128_v8 = vmov 0.0  }
  0x23   : > { %335 = vst [vmem:[%s2745_s5] sm:$0xff] %v2128_v8  ;;  %336 = vst [vmem:[%s2745_s5 + $0x8] sm:$0xff] %v2128_v8 }
  0x24   : > { %337 = vst [vmem:[%s2745_s5 + $0x10] sm:$0xff] %v2128_v8  ;;  %338 = vst [vmem:[%s2745_s5 + $0x18] sm:$0xff] %v2128_v8 }
  0x25   : > { %339 = vst [vmem:[%s2745_s5 + $0x20] sm:$0xff] %v2128_v8  ;;  %340 = vst [vmem:[%s2745_s5 + $0x28] sm:$0xff] %v2128_v8 }
  0x26   : > { %341 = vst [vmem:[%s2745_s5 + $0x30] sm:$0xff] %v2128_v8  ;;  %342 = vst [vmem:[%s2745_s5 + $0x38] sm:$0xff] %v2128_v8 }
  0x27   : > { %343 = vst [vmem:[%s2745_s5 + $0x40] sm:$0xff] %v2128_v8  ;;  %344 = vst [vmem:[%s2745_s5 + $0x48] sm:$0xff] %v2128_v8 }
  0x28   : > { %345 = vst [vmem:[%s2745_s5 + $0x50] sm:$0xff] %v2128_v8  ;;  %346 = vst [vmem:[%s2745_s5 + $0x58] sm:$0xff] %v2128_v8 }
  0x29   : > { %347 = vst [vmem:[%s2745_s5 + $0x60] sm:$0xff] %v2128_v8  ;;  %348 = vst [vmem:[%s2745_s5 + $0x68] sm:$0xff] %v2128_v8 }
  0x2a   : > { %349 = vst [vmem:[%s2745_s5 + $0x70] sm:$0xff] %v2128_v8  ;;  %350 = vst [vmem:[%s2745_s5 + $0x78] sm:$0xff] %v2128_v8 }
  0x2b PF: > { %v1884_v9 = vld [vmem:[%s2209_s15 + $0xe4] ss:$16 sps:$4 sm:$0xff]   ;;  %v1888_v11 = vld [vmem:[%s2209_s15 + $0xe0] ss:$16 sps:$4 sm:$0xff]   ;;  %v2316_v60 = vld [vmem:[%s2211_s16 + $0xc] ss:$16 sps:$4 sm:$0xff]  }
  0x2c   : > { %v1886_v10 = vld [vmem:[%s2209_s15 + $0x2e4] ss:$16 sps:$4 sm:$0xff]   ;;  %1183 = vmatprep.subr.bf16.mxu0 %v1884_v9  ;;  %v1889_v12 = vld [vmem:[%s2209_s15 + $0x2e0] ss:$16 sps:$4 sm:$0xff]   ;;  %1268 = vmatprep.mubr.bf16.mxu1 %v2316_v60  ;;  %p1836_p11 = scmp.ne.s32.totalorder %s2118_s20, 8 }
  0x2d   : > { %1236 = vmatprep.subr.bf16.mxu1 %v1886_v10  ;;  %v1890_v13 = vld [vmem:[%s2209_s15 + $0xc4] ss:$16 sps:$4 sm:$0xff]   ;;  %1184 = vmatpush1.bf16.msra.mxu0 %v1888_v11  ;;  %v1894_v15 = vld [vmem:[%s2209_s15 + $0xc0] ss:$16 sps:$4 sm:$0xff]   ;;  %v1988_v11 = vld [vmem:[%s2209_s15 + $0xec] ss:$16 sps:$4 sm:$0xff]  }
  0x2e   : > { %1237 = vmatpush1.bf16.msra.mxu1 %v1889_v12  ;;  %v1892_v14 = vld [vmem:[%s2209_s15 + $0x2c4] ss:$16 sps:$4 sm:$0xff]   ;;  %1185 = vmatprep.subr.bf16.mxu0 %v1890_v13  ;;  %v1895_v16 = vld [vmem:[%s2209_s15 + $0x2c0] ss:$16 sps:$4 sm:$0xff]   ;;  %v1991_v12 = vld [vmem:[%s2209_s15 + $0x2ec] ss:$16 sps:$4 sm:$0xff]  }
  0x2f   : > { %1238 = vmatprep.subr.bf16.mxu1 %v1892_v14  ;;  %v1896_v17 = vld [vmem:[%s2209_s15 + $0xa4] ss:$16 sps:$4 sm:$0xff]   ;;  %v1900_v19 = vld [vmem:[%s2209_s15 + $0xa0] ss:$16 sps:$4 sm:$0xff]   ;;  %v2340_v14 = vld [vmem:[%s2211_s16 + $0x8] ss:$16 sps:$4 sm:$0xff]  }
  0x30   : > { %v1898_v18 = vld [vmem:[%s2209_s15 + $0x2a4] ss:$16 sps:$4 sm:$0xff]   ;;  %v1901_v20 = vld [vmem:[%s2209_s15 + $0x2a0] ss:$16 sps:$4 sm:$0xff]  }
  0x31   : > { %1186 = vmatpush1.bf16.msra.mxu0 %v1894_v15  ;;  %v1902_v21 = vld [vmem:[%s2209_s15 + $0x84] ss:$16 sps:$4 sm:$0xff]   ;;  %v1906_v23 = vld [vmem:[%s2209_s15 + $0x80] ss:$16 sps:$4 sm:$0xff]   ;;  %v1986_v15 = vld [vmem:[%s2209_s15 + $0xe8] ss:$16 sps:$4 sm:$0xff]  }
  0x32   : > { %1239 = vmatpush1.bf16.msra.mxu1 %v1895_v16  ;;  %1187 = vmatprep.subr.bf16.mxu0 %v1896_v17  ;;  %v1904_v22 = vld [vmem:[%s2209_s15 + $0x284] ss:$16 sps:$4 sm:$0xff]   ;;  %v1907_v24 = vld [vmem:[%s2209_s15 + $0x280] ss:$16 sps:$4 sm:$0xff]   ;;  %v1989_v16 = vld [vmem:[%s2209_s15 + $0x2e8] ss:$16 sps:$4 sm:$0xff]  }
  0x33   : > { %1240 = vmatprep.subr.bf16.mxu1 %v1898_v18  ;;  %v1908_v25 = vld [vmem:[%s2209_s15 + $0x64] ss:$16 sps:$4 sm:$0xff]   ;;  %v1912_v27 = vld [vmem:[%s2209_s15 + $0x60] ss:$16 sps:$4 sm:$0xff]   ;;  %v1994_v17 = vld [vmem:[%s2209_s15 + $0xcc] ss:$16 sps:$4 sm:$0xff]  }
  0x34   : > { %v1910_v26 = vld [vmem:[%s2209_s15 + $0x264] ss:$16 sps:$4 sm:$0xff]   ;;  %v1913_v28 = vld [vmem:[%s2209_s15 + $0x260] ss:$16 sps:$4 sm:$0xff]   ;;  %v1997_v18 = vld [vmem:[%s2209_s15 + $0x2cc] ss:$16 sps:$4 sm:$0xff]  }
  0x35   : > { %1188 = vmatpush1.bf16.msra.mxu0 %v1900_v19  ;;  %v1914_v29 = vld [vmem:[%s2209_s15 + $0x44] ss:$16 sps:$4 sm:$0xff]   ;;  %v1918_v31 = vld [vmem:[%s2209_s15 + $0x40] ss:$16 sps:$4 sm:$0xff]   ;;  %v1992_v19 = vld [vmem:[%s2209_s15 + $0xc8] ss:$16 sps:$4 sm:$0xff]  }
  0x36   : > { %1241 = vmatpush1.bf16.msra.mxu1 %v1901_v20  ;;  %1189 = vmatprep.subr.bf16.mxu0 %v1902_v21  ;;  %v1916_v30 = vld [vmem:[%s2209_s15 + $0x244] ss:$16 sps:$4 sm:$0xff]   ;;  %v1919_v32 = vld [vmem:[%s2209_s15 + $0x240] ss:$16 sps:$4 sm:$0xff]   ;;  %v1995_v20 = vld [vmem:[%s2209_s15 + $0x2c8] ss:$16 sps:$4 sm:$0xff]  }
  0x37   : > { %1242 = vmatprep.subr.bf16.mxu1 %v1904_v22  ;;  %v1920_v33 = vld [vmem:[%s2209_s15 + $0x24] ss:$16 sps:$4 sm:$0xff]   ;;  %v1924_v35 = vld [vmem:[%s2209_s15 + $0x20] ss:$16 sps:$4 sm:$0xff]   ;;  %v2000_v21 = vld [vmem:[%s2209_s15 + $0xac] ss:$16 sps:$4 sm:$0xff]  }
  0x38   : > { %v1922_v34 = vld [vmem:[%s2209_s15 + $0x224] ss:$16 sps:$4 sm:$0xff]   ;;  %v1925_v36 = vld [vmem:[%s2209_s15 + $0x220] ss:$16 sps:$4 sm:$0xff]   ;;  %v2003_v22 = vld [vmem:[%s2209_s15 + $0x2ac] ss:$16 sps:$4 sm:$0xff]  }
  0x39   : > { %1190 = vmatpush1.bf16.msra.mxu0 %v1906_v23  ;;  %v1926_v37 = vld [vmem:[%s2209_s15 + $0x4] ss:$16 sps:$4 sm:$0xff]   ;;  %v1930_v39 = vld [vmem:[%s2209_s15] ss:$16 sps:$4 sm:$0xff]   ;;  %v1998_v23 = vld [vmem:[%s2209_s15 + $0xa8] ss:$16 sps:$4 sm:$0xff]  }
  0x3a   : > { %1243 = vmatpush1.bf16.msra.mxu1 %v1907_v24  ;;  %1191 = vmatprep.subr.bf16.mxu0 %v1908_v25  ;;  %v1928_v38 = vld [vmem:[%s2209_s15 + $0x204] ss:$16 sps:$4 sm:$0xff]   ;;  %v1931_v40 = vld [vmem:[%s2209_s15 + $0x200] ss:$16 sps:$4 sm:$0xff]   ;;  %v2001_v24 = vld [vmem:[%s2209_s15 + $0x2a8] ss:$16 sps:$4 sm:$0xff]  }
  0x3b   : > { %1244 = vmatprep.subr.bf16.mxu1 %v1910_v26  ;;  %v1932_v41 = vld [vmem:[%s2209_s15 + $0x1e4] ss:$16 sps:$4 sm:$0xff]   ;;  %v1936_v43 = vld [vmem:[%s2209_s15 + $0x1e0] ss:$16 sps:$4 sm:$0xff]   ;;  %v2006_v25 = vld [vmem:[%s2209_s15 + $0x8c] ss:$16 sps:$4 sm:$0xff]  }
  0x3c   : > { %v1934_v42 = vld [vmem:[%s2209_s15 + $0x3e4] ss:$16 sps:$4 sm:$0xff]   ;;  %v1937_v44 = vld [vmem:[%s2209_s15 + $0x3e0] ss:$16 sps:$4 sm:$0xff]   ;;  %v2009_v26 = vld [vmem:[%s2209_s15 + $0x28c] ss:$16 sps:$4 sm:$0xff]  }
  0x3d   : > { %1192 = vmatpush1.bf16.msra.mxu0 %v1912_v27  ;;  %v1938_v45 = vld [vmem:[%s2209_s15 + $0x1c4] ss:$16 sps:$4 sm:$0xff]   ;;  %v1942_v47 = vld [vmem:[%s2209_s15 + $0x1c0] ss:$16 sps:$4 sm:$0xff]   ;;  %v2004_v27 = vld [vmem:[%s2209_s15 + $0x88] ss:$16 sps:$4 sm:$0xff]  }
  0x3e   : > { %1245 = vmatpush1.bf16.msra.mxu1 %v1913_v28  ;;  %1193 = vmatprep.subr.bf16.mxu0 %v1914_v29  ;;  %v1940_v46 = vld [vmem:[%s2209_s15 + $0x3c4] ss:$16 sps:$4 sm:$0xff]   ;;  %v1943_v48 = vld [vmem:[%s2209_s15 + $0x3c0] ss:$16 sps:$4 sm:$0xff]   ;;  %v2007_v28 = vld [vmem:[%s2209_s15 + $0x288] ss:$16 sps:$4 sm:$0xff]  }
  0x3f   : > { %1246 = vmatprep.subr.bf16.mxu1 %v1916_v30  ;;  %v1944_v49 = vld [vmem:[%s2209_s15 + $0x1a4] ss:$16 sps:$4 sm:$0xff]   ;;  %v1948_v51 = vld [vmem:[%s2209_s15 + $0x1a0] ss:$16 sps:$4 sm:$0xff]   ;;  %v2012_v29 = vld [vmem:[%s2209_s15 + $0x6c] ss:$16 sps:$4 sm:$0xff]  }
  0x40   : > { %v1946_v50 = vld [vmem:[%s2209_s15 + $0x3a4] ss:$16 sps:$4 sm:$0xff]   ;;  %v1949_v52 = vld [vmem:[%s2209_s15 + $0x3a0] ss:$16 sps:$4 sm:$0xff]   ;;  %v2015_v30 = vld [vmem:[%s2209_s15 + $0x26c] ss:$16 sps:$4 sm:$0xff]  }
  0x41   : > { %1194 = vmatpush1.bf16.msra.mxu0 %v1918_v31  ;;  %v1950_v53 = vld [vmem:[%s2209_s15 + $0x184] ss:$16 sps:$4 sm:$0xff]   ;;  %v1954_v55 = vld [vmem:[%s2209_s15 + $0x180] ss:$16 sps:$4 sm:$0xff]   ;;  %v2010_v31 = vld [vmem:[%s2209_s15 + $0x68] ss:$16 sps:$4 sm:$0xff]  }
  0x42   : > { %1247 = vmatpush1.bf16.msra.mxu1 %v1919_v32  ;;  %1195 = vmatprep.subr.bf16.mxu0 %v1920_v33  ;;  %v1952_v54 = vld [vmem:[%s2209_s15 + $0x384] ss:$16 sps:$4 sm:$0xff]   ;;  %v1955_v56 = vld [vmem:[%s2209_s15 + $0x380] ss:$16 sps:$4 sm:$0xff]   ;;  %v2013_v32 = vld [vmem:[%s2209_s15 + $0x268] ss:$16 sps:$4 sm:$0xff]  }
  0x43   : > { %1248 = vmatprep.subr.bf16.mxu1 %v1922_v34  ;;  %v1956_v57 = vld [vmem:[%s2209_s15 + $0x164] ss:$16 sps:$4 sm:$0xff]   ;;  %v1960_v61 = vld [vmem:[%s2209_s15 + $0x160] ss:$16 sps:$4 sm:$0xff]   ;;  %v2018_v33 = vld [vmem:[%s2209_s15 + $0x4c] ss:$16 sps:$4 sm:$0xff]  }
  0x44   : > { %v2312_v58 = vld [vmem:[%s2211_s16 + $0x4] ss:$16 sps:$4 sm:$0xff]   ;;  %v1961_v62 = vld [vmem:[%s2209_s15 + $0x360] ss:$16 sps:$4 sm:$0xff]   ;;  %v2021_v34 = vld [vmem:[%s2209_s15 + $0x24c] ss:$16 sps:$4 sm:$0xff]  }
  0x45   : > { %1196 = vmatpush1.bf16.msra.mxu0 %v1924_v35  ;;  %v1958_v59 = vld [vmem:[%s2209_s15 + $0x364] ss:$16 sps:$4 sm:$0xff]   ;;  %1215 = vmatprep.mubr.bf16.mxu0 %v2312_v58  ;;  %v1966_v1 = vld [vmem:[%s2209_s15 + $0x140] ss:$16 sps:$4 sm:$0xff]  }
  0x46   : > { %1249 = vmatpush1.bf16.msra.mxu1 %v1925_v36  ;;  %1197 = vmatprep.subr.bf16.mxu0 %v1926_v37  ;;  %v1962_v63 = vld [vmem:[%s2209_s15 + $0x144] ss:$16 sps:$4 sm:$0xff]   ;;  %v1967_v2 = vld [vmem:[%s2209_s15 + $0x340] ss:$16 sps:$4 sm:$0xff]   ;;  %v2368_v36 = vld [vmem:[%s2211_s16 + $0x2c] ss:$16 sps:$4 sm:$0xff]  }
  0x47   : > { %1250 = vmatprep.subr.bf16.mxu1 %v1928_v38  ;;  %v1964_v0 = vld [vmem:[%s2209_s15 + $0x344] ss:$16 sps:$4 sm:$0xff]   ;;  %v1972_v5 = vld [vmem:[%s2209_s15 + $0x120] ss:$16 sps:$4 sm:$0xff]   ;;  %v2375_v38 = vld [vmem:[%s2211_s16 + $0x28] ss:$16 sps:$4 sm:$0xff]  }
  0x48   : > { %v1968_v3 = vld [vmem:[%s2209_s15 + $0x124] ss:$16 sps:$4 sm:$0xff]   ;;  %v1973_v6 = vld [vmem:[%s2209_s15 + $0x320] ss:$16 sps:$4 sm:$0xff]  }
  0x49   : > { %1198 = vmatpush1.bf16.msra.mxu0 %v1930_v39  ;;  %v1970_v4 = vld [vmem:[%s2209_s15 + $0x324] ss:$16 sps:$4 sm:$0xff]   ;;  %v1978_v9 = vld [vmem:[%s2209_s15 + $0x100] ss:$16 sps:$4 sm:$0xff]   ;;  %v2016_v39 = vld [vmem:[%s2209_s15 + $0x48] ss:$16 sps:$4 sm:$0xff]  }
  0x4a   : > { %1251 = vmatpush1.bf16.msra.mxu1 %v1931_v40  ;;  %1199 = vmatprep.subr.bf16.mxu0 %v1932_v41  ;;  %v1974_v7 = vld [vmem:[%s2209_s15 + $0x104] ss:$16 sps:$4 sm:$0xff]   ;;  %v1979_v10 = vld [vmem:[%s2209_s15 + $0x300] ss:$16 sps:$4 sm:$0xff]   ;;  %v2019_v40 = vld [vmem:[%s2209_s15 + $0x248] ss:$16 sps:$4 sm:$0xff]  }
  0x4b   : > { %1252 = vmatprep.subr.bf16.mxu1 %v1934_v42  ;;  %v1976_v8 = vld [vmem:[%s2209_s15 + $0x304] ss:$16 sps:$4 sm:$0xff]   ;;  %v2337_v13 = vld [vmem:[%s2211_s16] ss:$16 sps:$4 sm:$0xff]   ;;  %v2024_v41 = vld [vmem:[%s2209_s15 + $0x2c] ss:$16 sps:$4 sm:$0xff]  }
  0x4c   : > { %v2365_v35 = vld [vmem:[%s2211_s16 + $0x24] ss:$16 sps:$4 sm:$0xff]   ;;  %v2372_v37 = vld [vmem:[%s2211_s16 + $0x20] ss:$16 sps:$4 sm:$0xff]   ;;  %v2027_v42 = vld [vmem:[%s2209_s15 + $0x22c] ss:$16 sps:$4 sm:$0xff]  }
  0x4d   : > { %1200 = vmatpush2.bf16.msra.mxu0 %v1936_v43  ;;  %v2022_v43 = vld [vmem:[%s2209_s15 + $0x28] ss:$16 sps:$4 sm:$0xff]  }
  0x4e   : > { %1253 = vmatpush2.bf16.msra.mxu1 %v1937_v44  ;;  %1201 = vmatprep.subr.bf16.mxu0 %v1938_v45  ;;  %v2025_v44 = vld [vmem:[%s2209_s15 + $0x228] ss:$16 sps:$4 sm:$0xff]   ;;  %v2030_v45 = vld [vmem:[%s2209_s15 + $0xc] ss:$16 sps:$4 sm:$0xff]  }
  0x4f   : > { %1254 = vmatprep.subr.bf16.mxu1 %v1940_v46  ;;  %v2033_v46 = vld [vmem:[%s2209_s15 + $0x20c] ss:$16 sps:$4 sm:$0xff]  }
  0x51   : > { %1202 = vmatpush2.bf16.msra.mxu0 %v1942_v47  ;;  %v2028_v47 = vld [vmem:[%s2209_s15 + $0x8] ss:$16 sps:$4 sm:$0xff]  }
  0x52   : > { %1255 = vmatpush2.bf16.msra.mxu1 %v1943_v48  ;;  %1203 = vmatprep.subr.bf16.mxu0 %v1944_v49  ;;  %v2031_v48 = vld [vmem:[%s2209_s15 + $0x208] ss:$16 sps:$4 sm:$0xff]   ;;  %v2036_v49 = vld [vmem:[%s2209_s15 + $0x1ec] ss:$16 sps:$4 sm:$0xff]  }
  0x53   : > { %1256 = vmatprep.subr.bf16.mxu1 %v1946_v50  ;;  %v2039_v50 = vld [vmem:[%s2209_s15 + $0x3ec] ss:$16 sps:$4 sm:$0xff]  }
  0x55   : > { %1204 = vmatpush2.bf16.msra.mxu0 %v1948_v51  ;;  %v2034_v51 = vld [vmem:[%s2209_s15 + $0x1e8] ss:$16 sps:$4 sm:$0xff]  }
  0x56   : > { %1257 = vmatpush2.bf16.msra.mxu1 %v1949_v52  ;;  %1205 = vmatprep.subr.bf16.mxu0 %v1950_v53  ;;  %v2037_v52 = vld [vmem:[%s2209_s15 + $0x3e8] ss:$16 sps:$4 sm:$0xff]   ;;  %v2042_v53 = vld [vmem:[%s2209_s15 + $0x1cc] ss:$16 sps:$4 sm:$0xff]  }
  0x57   : > { %1258 = vmatprep.subr.bf16.mxu1 %v1952_v54  ;;  %v2045_v54 = vld [vmem:[%s2209_s15 + $0x3cc] ss:$16 sps:$4 sm:$0xff]  }
  0x59   : > { %1206 = vmatpush2.bf16.msra.mxu0 %v1954_v55  ;;  %v2040_v55 = vld [vmem:[%s2209_s15 + $0x1c8] ss:$16 sps:$4 sm:$0xff]  }
  0x5a   : > { %1259 = vmatpush2.bf16.msra.mxu1 %v1955_v56  ;;  %1207 = vmatprep.subr.bf16.mxu0 %v1956_v57  ;;  %v2043_v56 = vld [vmem:[%s2209_s15 + $0x3c8] ss:$16 sps:$4 sm:$0xff]   ;;  %v2048_v57 = vld [vmem:[%s2209_s15 + $0x1ac] ss:$16 sps:$4 sm:$0xff]  }
  0x5b   : > { %1260 = vmatprep.subr.bf16.mxu1 %v1958_v59  ;;  %v2046_v59 = vld [vmem:[%s2209_s15 + $0x1a8] ss:$16 sps:$4 sm:$0xff]  }
  0x5d   : > { %1208 = vmatpush2.bf16.msra.mxu0 %v1960_v61  ;;  %v2054_v61 = vld [vmem:[%s2209_s15 + $0x18c] ss:$16 sps:$4 sm:$0xff]  }
  0x5e   : > { %1261 = vmatpush2.bf16.msra.mxu1 %v1961_v62  ;;  %1209 = vmatprep.subr.bf16.mxu0 %v1962_v63  ;;  %v2057_v62 = vld [vmem:[%s2209_s15 + $0x38c] ss:$16 sps:$4 sm:$0xff]   ;;  %v2052_v63 = vld [vmem:[%s2209_s15 + $0x188] ss:$16 sps:$4 sm:$0xff]  }
  0x5f   : > { %1262 = vmatprep.subr.bf16.mxu1 %v1964_v0  ;;  %v2055_v0 = vld [vmem:[%s2209_s15 + $0x388] ss:$16 sps:$4 sm:$0xff]  }
  0x61   : > { %1210 = vmatpush2.bf16.msra.mxu0 %v1966_v1  ;;  %v2060_v1 = vld [vmem:[%s2209_s15 + $0x16c] ss:$16 sps:$4 sm:$0xff]  }
  0x62   : > { %1263 = vmatpush2.bf16.msra.mxu1 %v1967_v2  ;;  %1211 = vmatprep.subr.bf16.mxu0 %v1968_v3  ;;  %v2063_v2 = vld [vmem:[%s2209_s15 + $0x36c] ss:$16 sps:$4 sm:$0xff]   ;;  %v2058_v3 = vld [vmem:[%s2209_s15 + $0x168] ss:$16 sps:$4 sm:$0xff]  }
  0x63   : > { %1264 = vmatprep.subr.bf16.mxu1 %v1970_v4  ;;  %v2061_v4 = vld [vmem:[%s2209_s15 + $0x368] ss:$16 sps:$4 sm:$0xff]  }
  0x65   : > { %1212 = vmatpush2.bf16.msra.mxu0 %v1972_v5  ;;  %v2072_v5 = vld [vmem:[%s2209_s15 + $0x14c] ss:$16 sps:$4 sm:$0xff]  }
  0x66   : > { %1265 = vmatpush2.bf16.msra.mxu1 %v1973_v6  ;;  %1213 = vmatprep.subr.bf16.mxu0 %v1974_v7  ;;  %v2075_v6 = vld [vmem:[%s2209_s15 + $0x34c] ss:$16 sps:$4 sm:$0xff]   ;;  %v2070_v7 = vld [vmem:[%s2209_s15 + $0x148] ss:$16 sps:$4 sm:$0xff]  }
  0x67   : > { %1266 = vmatprep.subr.bf16.mxu1 %v1976_v8  ;;  %v2073_v8 = vld [vmem:[%s2209_s15 + $0x348] ss:$16 sps:$4 sm:$0xff]  }
  0x69   : > { %1214 = vmatpush2.bf16.msra.mxu0 %v1978_v9  ;;  %v2078_v9 = vld [vmem:[%s2209_s15 + $0x12c] ss:$16 sps:$4 sm:$0xff]  }
  0x6a   : > { %1267 = vmatpush2.bf16.msra.mxu1 %v1979_v10  ;;  %1289 = vmatprep.subr.bf16.mxu0 %v1988_v11  ;;  %v2081_v10 = vld [vmem:[%s2209_s15 + $0x32c] ss:$16 sps:$4 sm:$0xff]   ;;  %v2076_v11 = vld [vmem:[%s2209_s15 + $0x128] ss:$16 sps:$4 sm:$0xff]  }
  0x6b   : > { %1342 = vmatprep.subr.bf16.mxu1 %v1991_v12  ;;  %v2079_v12 = vld [vmem:[%s2209_s15 + $0x328] ss:$16 sps:$4 sm:$0xff]  }
  0x6c   : > { %1216 = vmatmul.mubr.bf16.vlgmr.msra.gmra.mxu0 %v2337_v13 }
  0x6d   : > { %1269 = vmatmul.mubr.bf16.vlgmr.msra.gmra.mxu1 %v2340_v14  ;;  %1290 = vmatpush1.bf16.msra.mxu0 %v1986_v15  ;;  %v2084_v15 = vld [vmem:[%s2209_s15 + $0x10c] ss:$16 sps:$4 sm:$0xff]  }
  0x6e   : > { %1343 = vmatpush1.bf16.msra.mxu1 %v1989_v16  ;;  %1291 = vmatprep.subr.bf16.mxu0 %v1994_v17  ;;  %v2087_v16 = vld [vmem:[%s2209_s15 + $0x30c] ss:$16 sps:$4 sm:$0xff]   ;;  %v2082_v17 = vld [vmem:[%s2209_s15 + $0x108] ss:$16 sps:$4 sm:$0xff]  }
  0x6f   : > { %1344 = vmatprep.subr.bf16.mxu1 %v1997_v18  ;;  %1225 = vmatprep.mubr.bf16.mxu0 %v2365_v35  ;;  %v2085_v18 = vld [vmem:[%s2209_s15 + $0x308] ss:$16 sps:$4 sm:$0xff]  }
  0x70   : > { %1278 = vmatprep.mubr.bf16.mxu1 %v2368_v36 }
  0x71   : > { %1292 = vmatpush1.bf16.msra.mxu0 %v1992_v19 }
  0x72   : > { %1345 = vmatpush1.bf16.msra.mxu1 %v1995_v20  ;;  %1293 = vmatprep.subr.bf16.mxu0 %v2000_v21  ;;  %v351_v20 = vld [vmem:[%s2745_s5] sm:$0xff] }
  0x73   : > { %1346 = vmatprep.subr.bf16.mxu1 %v2003_v22 }
  0x74   : > { %1226 = vmatmul.mubr.bf16.gmra.mxu0 %v2372_v37 }
  0x75   : > { %1294 = vmatpush1.bf16.msra.mxu0 %v1998_v23  ;;  %1279 = vmatmul.mubr.bf16.gmra.mxu1 %v2375_v38 }
  0x76   : > { %1347 = vmatpush1.bf16.msra.mxu1 %v2001_v24  ;;  %1295 = vmatprep.subr.bf16.mxu0 %v2006_v25 }
  0x77   : > { %1348 = vmatprep.subr.bf16.mxu1 %v2009_v26  ;;  %1321 = vmatprep.mubr.bf16.mxu0 %v2312_v58  ;;  %v2051_v58 = vld [vmem:[%s2209_s15 + $0x3ac] ss:$16 sps:$4 sm:$0xff]  }
  0x78   : > { %1374 = vmatprep.mubr.bf16.mxu1 %v2316_v60  ;;  %v2049_v60 = vld [vmem:[%s2209_s15 + $0x3a8] ss:$16 sps:$4 sm:$0xff]  }
  0x79   : > { %1296 = vmatpush1.bf16.msra.mxu0 %v2004_v27  ;;  %v355_v27 = vld [vmem:[%s2745_s5 + $0x20] sm:$0xff] }
  0x7a   : > { %1349 = vmatpush1.bf16.msra.mxu1 %v2007_v28  ;;  %1297 = vmatprep.subr.bf16.mxu0 %v2012_v29 }
  0x7b   : > { %1350 = vmatprep.subr.bf16.mxu1 %v2015_v30 }
  0x7d   : > { %1298 = vmatpush1.bf16.msra.mxu0 %v2010_v31 }
  0x7e   : > { %1351 = vmatpush1.bf16.msra.mxu1 %v2013_v32  ;;  %1299 = vmatprep.subr.bf16.mxu0 %v2018_v33  ;;  %v356_v32 = vld [vmem:[%s2745_s5 + $0x28] sm:$0xff] }
  0x7f   : > { %1352 = vmatprep.subr.bf16.mxu1 %v2021_v34 }
  0x81   : > { %1300 = vmatpush1.bf16.msra.mxu0 %v2016_v39 }
  0x82   : > { %1353 = vmatpush1.bf16.msra.mxu1 %v2019_v40  ;;  %1301 = vmatprep.subr.bf16.mxu0 %v2024_v41 }
  0x83   : > { %1354 = vmatprep.subr.bf16.mxu1 %v2027_v42  ;;  %v360_v42 = vld [vmem:[%s2745_s5 + $0x48] sm:$0xff] }
  0x85   : > { %1302 = vmatpush1.bf16.msra.mxu0 %v2022_v43 }
  0x86   : > { %1355 = vmatpush1.bf16.msra.mxu1 %v2025_v44  ;;  %1303 = vmatprep.subr.bf16.mxu0 %v2030_v45 }
  0x87   : > { %1356 = vmatprep.subr.bf16.mxu1 %v2033_v46 }
  0x89   : > { %1304 = vmatpush1.bf16.msra.mxu0 %v2028_v47  ;;  %v363_v47 = vld [vmem:[%s2745_s5 + $0x60] sm:$0xff] }
  0x8a   : > { %1357 = vmatpush1.bf16.msra.mxu1 %v2031_v48  ;;  %1305 = vmatprep.subr.bf16.mxu0 %v2036_v49 }
  0x8b   : > { %1358 = vmatprep.subr.bf16.mxu1 %v2039_v50 }
  0x8d   : > { %1306 = vmatpush2.bf16.msra.mxu0 %v2034_v51 }
  0x8e   : > { %1359 = vmatpush2.bf16.msra.mxu1 %v2037_v52  ;;  %1307 = vmatprep.subr.bf16.mxu0 %v2042_v53  ;;  %v364_v52 = vld [vmem:[%s2745_s5 + $0x68] sm:$0xff] }
  0x8f   : > { %1360 = vmatprep.subr.bf16.mxu1 %v2045_v54 }
  0x91   : > { %1308 = vmatpush2.bf16.msra.mxu0 %v2040_v55 }
  0x92   : > { %1361 = vmatpush2.bf16.msra.mxu1 %v2043_v56  ;;  %1309 = vmatprep.subr.bf16.mxu0 %v2048_v57 }
  0x93   : > { %1362 = vmatprep.subr.bf16.mxu1 %v2051_v58  ;;  %v353_v58 = vld [vmem:[%s2745_s5 + $0x10] sm:$0xff] }
  0x95   : > { %1310 = vmatpush2.bf16.msra.mxu0 %v2046_v59 }
  0x96   : > { %1363 = vmatpush2.bf16.msra.mxu1 %v2049_v60  ;;  %1311 = vmatprep.subr.bf16.mxu0 %v2054_v61 }
  0x97   : > { %1364 = vmatprep.subr.bf16.mxu1 %v2057_v62  ;;  %v354_v62 = vld [vmem:[%s2745_s5 + $0x18] sm:$0xff] }
  0x99   : > { %1312 = vmatpush2.bf16.msra.mxu0 %v2052_v63 }
  0x9a   : > { %1365 = vmatpush2.bf16.msra.mxu1 %v2055_v0  ;;  %1313 = vmatprep.subr.bf16.mxu0 %v2060_v1 }
  0x9b   : > { %1366 = vmatprep.subr.bf16.mxu1 %v2063_v2 }
  0x9d   : > { %1314 = vmatpush2.bf16.msra.mxu0 %v2058_v3  ;;  %v357_v3 = vld [vmem:[%s2745_s5 + $0x30] sm:$0xff] }
  0x9e   : > { %1367 = vmatpush2.bf16.msra.mxu1 %v2061_v4  ;;  %1315 = vmatprep.subr.bf16.mxu0 %v2072_v5 }
  0x9f   : > { %1368 = vmatprep.subr.bf16.mxu1 %v2075_v6 }
  0xa1   : > { %1316 = vmatpush2.bf16.msra.mxu0 %v2070_v7 }
  0xa2   : > { %1369 = vmatpush2.bf16.msra.mxu1 %v2073_v8  ;;  %1317 = vmatprep.subr.bf16.mxu0 %v2078_v9  ;;  %v358_v8 = vld [vmem:[%s2745_s5 + $0x38] sm:$0xff] }
  0xa3   : > { %1370 = vmatprep.subr.bf16.mxu1 %v2081_v10 }
  0xa5   : > { %1318 = vmatpush2.bf16.msra.mxu0 %v2076_v11 }
  0xa6   : > { %1371 = vmatpush2.bf16.msra.mxu1 %v2079_v12  ;;  %1319 = vmatprep.subr.bf16.mxu0 %v2084_v15  ;;  %v361_v15 = vld [vmem:[%s2745_s5 + $0x50] sm:$0xff] }
  0xa7   : > { %1372 = vmatprep.subr.bf16.mxu1 %v2087_v16 }
  0xa9   : > { %1320 = vmatpush2.bf16.msra.mxu0 %v2082_v17 }
  0xaa   : > { %1373 = vmatpush2.bf16.msra.mxu1 %v2085_v18 }
  0xac   : > { %1322 = vmatmul.mubr.bf16.vlgmr.msra.gmra.mxu0 %v2337_v13  ;;  %v352_v13 = vld [vmem:[%s2745_s5 + $0x8] sm:$0xff] }
  0xad   : > { %1375 = vmatmul.mubr.bf16.vlgmr.msra.gmra.mxu1 %v2340_v14  ;;  %1331 = vmatprep.mubr.bf16.mxu0 %v2365_v35 }
  0xae   : > { %1384 = vmatprep.mubr.bf16.mxu1 %v2368_v36 }
  0xb4   : > { %1332 = vmatmul.mubr.bf16.gmra.mxu0 %v2372_v37 }
  0xb5   : > { %1385 = vmatmul.mubr.bf16.gmra.mxu1 %v2375_v38  ;;  %v359_v38 = vld [vmem:[%s2745_s5 + $0x40] sm:$0xff] }
 0x12c   : > { %v1217_v19 = vpop.f32.mrf.mxu0 }
 0x12d   : > { %v1270_v21 = vpop.f32.mrf.mxu1 }
 0x12e   : > { %v1271_v22 = vadd.f32 %v1270_v21, %v1217_v19  ;;  %v1219_v23 = vpop.f32.mrf.mxu0 }
 0x12f   : > { %v1272_v14 = vpop.f32.mrf.mxu1 }
 0x130   : > { %v1395_v24 = vadd.f32 %v1271_v22, %v351_v20  ;;  %v1273_v25 = vadd.f32 %v1272_v14, %v1219_v23  ;;  %v1221_v26 = vpop.f32.mrf.mxu0  ;;  %v362_v20 = vld [vmem:[%s2745_s5 + $0x58] sm:$0xff]  ;;  %v365_v14 = vld [vmem:[%s2745_s5 + $0x70] sm:$0xff] }
 0x131   : > { %v1274_v28 = vpop.f32.mrf.mxu1 }
 0x132   : > { %1411 = vst [vmem:[%s2745_s5] sm:$0xff] %v1395_v24  ;;  %v1396_v29 = vadd.f32 %v1273_v25, %v352_v13  ;;  %v1275_v30 = vadd.f32 %v1274_v28, %v1221_v26  ;;  %v1223_v31 = vpop.f32.mrf.mxu0  ;;  %v366_v28 = vld [vmem:[%s2745_s5 + $0x78] sm:$0xff] }
 0x133   : > { %v1276_v33 = vpop.f32.mrf.mxu1 }
 0x134   : > { %1412 = vst [vmem:[%s2745_s5 + $0x8] sm:$0xff] %v1396_v29  ;;  %v1399_v34 = vadd.f32 %v1275_v30, %v355_v27  ;;  %v1277_v35 = vadd.f32 %v1276_v33, %v1223_v31  ;;  %v1227_v37 = vpop.f32.mrf.mxu0 }
 0x135   : > { %v1280_v39 = vpop.f32.mrf.mxu1 }
 0x136   : > { %1415 = vst [vmem:[%s2745_s5 + $0x20] sm:$0xff] %v1399_v34  ;;  %v1400_v36 = vadd.f32 %v1277_v35, %v356_v32  ;;  %v1281_v40 = vadd.f32 %v1280_v39, %v1227_v37  ;;  %v1229_v41 = vpop.f32.mrf.mxu0 }
 0x137   : > { %v1282_v43 = vpop.f32.mrf.mxu1 }
 0x138   : > { %1416 = vst [vmem:[%s2745_s5 + $0x28] sm:$0xff] %v1400_v36  ;;  %v1403_v44 = vadd.f32 %v1281_v40, %v359_v38  ;;  %v1283_v45 = vadd.f32 %v1282_v43, %v1229_v41  ;;  %v1231_v46 = vpop.f32.mrf.mxu0 }
 0x139   : > { %v1284_v48 = vpop.f32.mrf.mxu1 }
 0x13a   : > { %1419 = vst [vmem:[%s2745_s5 + $0x40] sm:$0xff] %v1403_v44  ;;  %v1404_v49 = vadd.f32 %v1283_v45, %v360_v42  ;;  %v1285_v50 = vadd.f32 %v1284_v48, %v1231_v46  ;;  %v1233_v51 = vpop.f32.mrf.mxu0 }
 0x13b   : > { %v1286_v53 = vpop.f32.mrf.mxu1 }
 0x13c   : > { %1420 = vst [vmem:[%s2745_s5 + $0x48] sm:$0xff] %v1404_v49  ;;  %v1407_v54 = vadd.f32 %v1285_v50, %v363_v47  ;;  %v1287_v55 = vadd.f32 %v1286_v53, %v1233_v51 }
 0x13e   : > { %1423 = vst [vmem:[%s2745_s5 + $0x60] sm:$0xff] %v1407_v54  ;;  %v1408_v56 = vadd.f32 %v1287_v55, %v364_v52 }
 0x140   : > { %1424 = vst [vmem:[%s2745_s5 + $0x68] sm:$0xff] %v1408_v56 }
 0x16c   : > { %v1323_v57 = vpop.f32.mrf.mxu0 }
 0x16d   : > { %v1376_v59 = vpop.f32.mrf.mxu1 }
 0x16e   : > { %v1377_v60 = vadd.f32 %v1376_v59, %v1323_v57  ;;  %v1325_v61 = vpop.f32.mrf.mxu0 }
 0x16f   : > { %v1378_v63 = vpop.f32.mrf.mxu1 }
 0x170   : > { %v1397_v0 = vadd.f32 %v1377_v60, %v353_v58  ;;  %v1379_v1 = vadd.f32 %v1378_v63, %v1325_v61  ;;  %v1327_v2 = vpop.f32.mrf.mxu0 }
 0x171   : > { %v1380_v4 = vpop.f32.mrf.mxu1 }
 0x172   : > { %1413 = vst [vmem:[%s2745_s5 + $0x10] sm:$0xff] %v1397_v0  ;;  %v1398_v5 = vadd.f32 %v1379_v1, %v354_v62  ;;  %v1381_v6 = vadd.f32 %v1380_v4, %v1327_v2  ;;  %v1329_v7 = vpop.f32.mrf.mxu0 }
 0x173   : > { %v1382_v9 = vpop.f32.mrf.mxu1 }
 0x174   : > { %1414 = vst [vmem:[%s2745_s5 + $0x18] sm:$0xff] %v1398_v5  ;;  %v1401_v10 = vadd.f32 %v1381_v6, %v357_v3  ;;  %v1383_v11 = vadd.f32 %v1382_v9, %v1329_v7  ;;  %v1333_v12 = vpop.f32.mrf.mxu0 }
 0x175   : > { %v1386_v16 = vpop.f32.mrf.mxu1 }
 0x176   : > { %1417 = vst [vmem:[%s2745_s5 + $0x30] sm:$0xff] %v1401_v10  ;;  %v1402_v17 = vadd.f32 %v1383_v11, %v358_v8  ;;  %v1387_v18 = vadd.f32 %v1386_v16, %v1333_v12  ;;  %v1335_v19 = vpop.f32.mrf.mxu0 }
 0x177   : > { %v1388_v21 = vpop.f32.mrf.mxu1 }
 0x178   : > { %1418 = vst [vmem:[%s2745_s5 + $0x38] sm:$0xff] %v1402_v17  ;;  %v1405_v22 = vadd.f32 %v1387_v18, %v361_v15  ;;  %v1389_v23 = vadd.f32 %v1388_v21, %v1335_v19  ;;  %v1337_v13 = vpop.f32.mrf.mxu0 }
 0x179   : > { %v1390_v24 = vpop.f32.mrf.mxu1 }
 0x17a   : > { %1421 = vst [vmem:[%s2745_s5 + $0x50] sm:$0xff] %v1405_v22  ;;  %v1406_v25 = vadd.f32 %v1389_v23, %v362_v20  ;;  %v1391_v26 = vadd.f32 %v1390_v24, %v1337_v13  ;;  %v1339_v27 = vpop.f32.mrf.mxu0 }
 0x17b   : > { %v1392_v29 = vpop.f32.mrf.mxu1 }
 0x17c   : > { %1422 = vst [vmem:[%s2745_s5 + $0x58] sm:$0xff] %v1406_v25  ;;  %v1409_v30 = vadd.f32 %v1391_v26, %v365_v14  ;;  %v1393_v31 = vadd.f32 %v1392_v29, %v1339_v27  ;;  %1430 = sbr.rel (%p1836_p11) target bundleno = 414 (0x19e), region = 71 }
 0x17e   : > { %1425 = vst [vmem:[%s2745_s5 + $0x70] sm:$0xff] %v1409_v30  ;;  %v1410_v32 = vadd.f32 %v1393_v31, %v366_v28 }
 0x180   : > { %1426 = vst [vmem:[%s2745_s5 + $0x78] sm:$0xff] %v1410_v32 }
 0x181   : > { %v1449_v33 = vlaneseq  ;;  %v1447_v35 = vld [vmem:[%s2742_s2] sm:$0xf]  ;;  %v1432_v39 = vld [vmem:[%s2745_s5 + $0x8] sm:$0xff]  ;;  %v1433_v43 = vld [vmem:[%s2745_s5 + $0x10] sm:$0xff] }
 0x182   : > { %v1485_v36 = vld [vmem:[%s2743_s3] sm:$0xf]  ;;  %v1436_v45 = vld [vmem:[%s2745_s5 + $0x28] sm:$0xff]  ;;  %v1434_v50 = vld [vmem:[%s2745_s5 + $0x18] sm:$0xff] }
 0x183   : > { %v1450_v34 = vshrl.u32 %v1449_v33, 7  ;;  %v1431_v37 = vld [vmem:[%s2745_s5] sm:$0xff]  ;;  %v1437_v51 = vld [vmem:[%s2745_s5 + $0x30] sm:$0xff]  ;;  %v1438_v52 = vld [vmem:[%s2745_s5 + $0x38] sm:$0xff] }
 0x184   : > { %v1435_v44 = vld [vmem:[%s2745_s5 + $0x20] sm:$0xff]  ;;  %v1524_v60 = vld [vmem:[%s2744_s4 + $0x8] sm:$0xff]  ;;  %v1525_v0 = vld [vmem:[%s2744_s4 + $0x10] sm:$0xff] }
 0x185   : > { %v1451_v38 = vsub.s32 0, %v1450_v34  ;;  %v1455_v40 = vsub.s32 1, %v1450_v34  ;;  %v1459_v41 = vsub.s32 2, %v1450_v34  ;;  %v1463_v42 = vsub.s32 3, %v1450_v34  ;;  %v1523_v58 = vld [vmem:[%s2744_s4] sm:$0xff]  ;;  %v1528_v3 = vld [vmem:[%s2744_s4 + $0x28] sm:$0xff] }
 0x186   : > { %v1527_v2 = vld [vmem:[%s2744_s4 + $0x20] sm:$0xff]  ;;  %v1526_v8 = vld [vmem:[%s2744_s4 + $0x18] sm:$0xff]  ;;  %v1529_v11 = vld [vmem:[%s2744_s4 + $0x30] sm:$0xff] }
 0x187   : > { %v2548_v46 = vrot.slane %v1447_v35, %v1451_v38  ;;  %v2550_v47 = vrot.slane %v1485_v36, %v1451_v38  ;;  %v2552_v48 = vrot.slane %v1447_v35, %v1455_v40  ;;  %v2554_v49 = vrot.slane %v1485_v36, %v1455_v40  ;;  %v1530_v12 = vld [vmem:[%s2744_s4 + $0x38] sm:$0xff]  ;;  %v1439_v23 = vld [vmem:[%s2745_s5 + $0x40] sm:$0xff]  ;;  %v1440_v13 = vld [vmem:[%s2745_s5 + $0x48] sm:$0xff] }
 0x188   : > { %v2565_v53 = vrot.slane %v1447_v35, %v1459_v41  ;;  %v2567_v54 = vrot.slane %v1485_v36, %v1459_v41  ;;  %v2569_v55 = vrot.slane %v1447_v35, %v1463_v42  ;;  %v2571_v56 = vrot.slane %v1485_v36, %v1463_v42  ;;  %v1441_v14 = vld [vmem:[%s2745_s5 + $0x50] sm:$0xff]  ;;  %v1442_v28 = vld [vmem:[%s2745_s5 + $0x58] sm:$0xff]  ;;  %v1443_v29 = vld [vmem:[%s2745_s5 + $0x60] sm:$0xff] }
 0x189   : > { %v1469_v57 = vmul.f32 %v2548_v46, %v1431_v37  ;;  %v1470_v59 = vmul.f32 %v2552_v48, %v1432_v39  ;;  %v1473_v61 = vmul.f32 %v2548_v46, %v1435_v44  ;;  %v1474_v62 = vmul.f32 %v2552_v48, %v1436_v45  ;;  %v1444_v30 = vld [vmem:[%s2745_s5 + $0x68] sm:$0xff]  ;;  %v1445_v35 = vld [vmem:[%s2745_s5 + $0x70] sm:$0xff]  ;;  %v1446_v36 = vld [vmem:[%s2745_s5 + $0x78] sm:$0xff] }
 0x18a   : > { %v1471_v63 = vmul.f32 %v2565_v53, %v1433_v43  ;;  %v1472_v1 = vmul.f32 %v2569_v55, %v1434_v50  ;;  %v1475_v4 = vmul.f32 %v2565_v53, %v1437_v51  ;;  %v1476_v5 = vmul.f32 %v2569_v55, %v1438_v52  ;;  %v1531_v42 = vld [vmem:[%s2744_s4 + $0x40] sm:$0xff]  ;;  %v1532_v44 = vld [vmem:[%s2744_s4 + $0x48] sm:$0xff]  ;;  %v1533_v51 = vld [vmem:[%s2744_s4 + $0x50] sm:$0xff] }
 0x18b   : > { %v1507_v6 = vadd.f32 %v2550_v47, %v1469_v57  ;;  %v1508_v7 = vadd.f32 %v2554_v49, %v1470_v59  ;;  %v1511_v9 = vadd.f32 %v2550_v47, %v1473_v61  ;;  %v1512_v10 = vadd.f32 %v2554_v49, %v1474_v62  ;;  %v1534_v52 = vld [vmem:[%s2744_s4 + $0x58] sm:$0xff] }
 0x18c   : > { %v1509_v15 = vadd.f32 %v2567_v54, %v1471_v63  ;;  %v1510_v16 = vadd.f32 %v2571_v56, %v1472_v1  ;;  %v1513_v17 = vadd.f32 %v2567_v54, %v1475_v4  ;;  %v1514_v18 = vadd.f32 %v2571_v56, %v1476_v5 }
 0x18d   : > { %v1539_v19 = vadd.f32 %v1523_v58, %v1507_v6  ;;  %v1540_v20 = vadd.f32 %v1524_v60, %v1508_v7  ;;  %v1543_v21 = vadd.f32 %v1527_v2, %v1511_v9  ;;  %v1544_v22 = vadd.f32 %v1528_v3, %v1512_v10  ;;  %v1535_v58 = vld [vmem:[%s2744_s4 + $0x60] sm:$0xff] }
 0x18e   : > { %v1541_v24 = vadd.f32 %v1525_v0, %v1509_v15  ;;  %v1542_v25 = vadd.f32 %v1526_v8, %v1510_v16  ;;  %v1545_v26 = vadd.f32 %v1529_v11, %v1513_v17  ;;  %v1546_v27 = vadd.f32 %v1530_v12, %v1514_v18 }
 0x18f   : > { %v1555_v31 = vmax.f32 %v1539_v19, 0.0  ;;  %v1556_v32 = vmax.f32 %v1540_v20, 0.0  ;;  %v1559_v33 = vmax.f32 %v1543_v21, 0.0  ;;  %v1560_v34 = vmax.f32 %v1544_v22, 0.0 }
 0x190   : > { %v1557_v37 = vmax.f32 %v1541_v24, 0.0  ;;  %v1558_v38 = vmax.f32 %v1542_v25, 0.0  ;;  %v1561_v39 = vmax.f32 %v1545_v26, 0.0  ;;  %v1562_v40 = vmax.f32 %v1546_v27, 0.0 }
 0x191   : > { %1571 = vst [vmem:[%s2745_s5] sm:$0xff] %v1555_v31  ;;  %1572 = vst [vmem:[%s2745_s5 + $0x8] sm:$0xff] %v1556_v32  ;;  %v1477_v41 = vmul.f32 %v2548_v46, %v1439_v23  ;;  %v1478_v43 = vmul.f32 %v2552_v48, %v1440_v13  ;;  %v1479_v45 = vmul.f32 %v2565_v53, %v1441_v14 }
 0x192   : > { %1575 = vst [vmem:[%s2745_s5 + $0x20] sm:$0xff] %v1559_v33  ;;  %1576 = vst [vmem:[%s2745_s5 + $0x28] sm:$0xff] %v1560_v34  ;;  %v1480_v50 = vmul.f32 %v2569_v55, %v1442_v28  ;;  %v1481_v57 = vmul.f32 %v2548_v46, %v1443_v29  ;;  %v1482_v59 = vmul.f32 %v2552_v48, %v1444_v30  ;;  %v1536_v46 = vld [vmem:[%s2744_s4 + $0x68] sm:$0xff]  ;;  %v1537_v48 = vld [vmem:[%s2744_s4 + $0x70] sm:$0xff] }
 0x193   : > { %1573 = vst [vmem:[%s2745_s5 + $0x10] sm:$0xff] %v1557_v37  ;;  %1574 = vst [vmem:[%s2745_s5 + $0x18] sm:$0xff] %v1558_v38  ;;  %v1483_v60 = vmul.f32 %v2565_v53, %v1445_v35  ;;  %v1484_v61 = vmul.f32 %v2569_v55, %v1446_v36  ;;  %v1515_v62 = vadd.f32 %v2550_v47, %v1477_v41  ;;  %v1538_v53 = vld [vmem:[%s2744_s4 + $0x78] sm:$0xff] }
 0x194   : > { %1577 = vst [vmem:[%s2745_s5 + $0x30] sm:$0xff] %v1561_v39  ;;  %1578 = vst [vmem:[%s2745_s5 + $0x38] sm:$0xff] %v1562_v40  ;;  %v1516_v63 = vadd.f32 %v2554_v49, %v1478_v43  ;;  %v1517_v0 = vadd.f32 %v2567_v54, %v1479_v45  ;;  %v1518_v1 = vadd.f32 %v2571_v56, %v1480_v50 }
 0x195   : > { %v1519_v55 = vadd.f32 %v2550_v47, %v1481_v57  ;;  %v1520_v2 = vadd.f32 %v2554_v49, %v1482_v59  ;;  %v1521_v3 = vadd.f32 %v2567_v54, %v1483_v60  ;;  %v1522_v4 = vadd.f32 %v2571_v56, %v1484_v61 }
 0x196   : > { %v1547_v5 = vadd.f32 %v1531_v42, %v1515_v62  ;;  %v1548_v6 = vadd.f32 %v1532_v44, %v1516_v63  ;;  %v1549_v7 = vadd.f32 %v1533_v51, %v1517_v0  ;;  %v1550_v8 = vadd.f32 %v1534_v52, %v1518_v1 }
 0x197   : > { %v1551_v9 = vadd.f32 %v1535_v58, %v1519_v55  ;;  %v1552_v10 = vadd.f32 %v1536_v46, %v1520_v2  ;;  %v1553_v11 = vadd.f32 %v1537_v48, %v1521_v3  ;;  %v1554_v12 = vadd.f32 %v1538_v53, %v1522_v4 }
 0x198   : > { %v1563_v15 = vmax.f32 %v1547_v5, 0.0  ;;  %v1564_v16 = vmax.f32 %v1548_v6, 0.0  ;;  %v1565_v17 = vmax.f32 %v1549_v7, 0.0  ;;  %v1566_v18 = vmax.f32 %v1550_v8, 0.0 }
 0x199   : > { %v1567_v19 = vmax.f32 %v1551_v9, 0.0  ;;  %v1568_v47 = vmax.f32 %v1552_v10, 0.0  ;;  %v1569_v20 = vmax.f32 %v1553_v11, 0.0  ;;  %v1570_v49 = vmax.f32 %v1554_v12, 0.0 }
 0x19a   : > { %1579 = vst [vmem:[%s2745_s5 + $0x40] sm:$0xff] %v1563_v15  ;;  %1580 = vst [vmem:[%s2745_s5 + $0x48] sm:$0xff] %v1564_v16 }
 0x19b   : > { %1581 = vst [vmem:[%s2745_s5 + $0x50] sm:$0xff] %v1565_v17  ;;  %1582 = vst [vmem:[%s2745_s5 + $0x58] sm:$0xff] %v1566_v18 }
 0x19c   : > { %1583 = vst [vmem:[%s2745_s5 + $0x60] sm:$0xff] %v1567_v19  ;;  %1584 = vst [vmem:[%s2745_s5 + $0x68] sm:$0xff] %v1568_v47 }
 0x19d   : > { %1585 = vst [vmem:[%s2745_s5 + $0x70] sm:$0xff] %v1569_v20  ;;  %1586 = vst [vmem:[%s2745_s5 + $0x78] sm:$0xff] %v1570_v49 }
 0x19e PF: > { %s15_s22 = sadd.s32 1, %s2126_s22   ;;  %s2746_s18 = smov %s2114_s19 }
 0x19f   : > { %p12_p12 = scmp.ge.s32.totalorder %s15_s22, 11   ;;  %s2747_s19 = smov %s2194_s26 }
 0x1a0   : > { %s2748_s20 = smov %s2122_s21  ;;  %s2749_s21 = smov %s2751_s23 }
 0x1a1   :  { %14 = sbr.rel (!%p12_p12) target bundleno = 3 (0x3), region = 112 }

// kernel: feature_embedder_forward.11
= control target key start
LH: loop header
LB: loop body
LE: loop exit
PB: predicated region body
PF: predicated region fallthrough
CT: control target
= control target key end

     0   :  { %v1451_v38 = vmov 1966171168   ;;  %v165_v40 = vlaneseq  ;;  %s1893_s0 = inlined_call_operand.vmem [shape: bf16[2,512], index: 0, kind: input, shape index: {}]   ;;  %s1894_s1 = inlined_call_operand.vmem [shape: bf16[512,512], index: 1, kind: input, shape index: {}]   ;;  %s1895_s2 = inlined_call_operand.vmem [shape: f32[1,512], index: 2, kind: input, shape index: {}]   ;;  %s1896_s3 = inlined_call_operand.vmem [shape: f32[1,512], index: 3, kind: input, shape index: {}]   ;;  %s1897_s4 = inlined_call_operand.hbm [shape: f32[2,512], index: 4, kind: output, shape index: {}]  }
   0x1   :  { %v1237_v0 = vld [vmem:[%s1894_s1 + $0xe4] ss:$16 sps:$4 sm:$0xff]   ;;  %v1241_v2 = vld [vmem:[%s1894_s1 + $0xe0] ss:$16 sps:$4 sm:$0xff]   ;;  %v163_v39 = vunpack.c.l.s4 %v1451_v38 }
   0x2   :  { %v1239_v1 = vld [vmem:[%s1894_s1 + $0x2e4] ss:$16 sps:$4 sm:$0xff]   ;;  %822 = vmatprep.subr.bf16.mxu0 %v1237_v0  ;;  %v1242_v3 = vld [vmem:[%s1894_s1 + $0x2e0] ss:$16 sps:$4 sm:$0xff]   ;;  %v1605_v46 = vshrl.u32 %v165_v40, 7 }
   0x3   :  { %863 = vmatprep.subr.bf16.mxu1 %v1239_v1  ;;  %v1243_v4 = vld [vmem:[%s1894_s1 + $0xc4] ss:$16 sps:$4 sm:$0xff]   ;;  %823 = vmatpush1.bf16.msra.mxu0 %v1241_v2  ;;  %v1247_v6 = vld [vmem:[%s1894_s1 + $0xc0] ss:$16 sps:$4 sm:$0xff]   ;;  %v164_v45 = vunpack.c.0.s8 %v163_v39 }
   0x4   :  { %864 = vmatpush1.bf16.msra.mxu1 %v1242_v3  ;;  %v1245_v5 = vld [vmem:[%s1894_s1 + $0x2c4] ss:$16 sps:$4 sm:$0xff]   ;;  %824 = vmatprep.subr.bf16.mxu0 %v1243_v4  ;;  %v1248_v7 = vld [vmem:[%s1894_s1 + $0x2c0] ss:$16 sps:$4 sm:$0xff]  }
   0x5   :  { %865 = vmatprep.subr.bf16.mxu1 %v1245_v5  ;;  %v1249_v8 = vld [vmem:[%s1894_s1 + $0xa4] ss:$16 sps:$4 sm:$0xff]   ;;  %v1253_v10 = vld [vmem:[%s1894_s1 + $0xa0] ss:$16 sps:$4 sm:$0xff]   ;;  %v167_v51 = vsub.s32 %v164_v45, %v1605_v46 }
   0x6   :  { %v1251_v9 = vld [vmem:[%s1894_s1 + $0x2a4] ss:$16 sps:$4 sm:$0xff]   ;;  %v1254_v11 = vld [vmem:[%s1894_s1 + $0x2a0] ss:$16 sps:$4 sm:$0xff]  }
   0x7   :  { %825 = vmatpush1.bf16.msra.mxu0 %v1247_v6  ;;  %v1255_v12 = vld [vmem:[%s1894_s1 + $0x84] ss:$16 sps:$4 sm:$0xff]   ;;  %v1259_v14 = vld [vmem:[%s1894_s1 + $0x80] ss:$16 sps:$4 sm:$0xff]  }
   0x8   :  { %866 = vmatpush1.bf16.msra.mxu1 %v1248_v7  ;;  %826 = vmatprep.subr.bf16.mxu0 %v1249_v8  ;;  %v1257_v13 = vld [vmem:[%s1894_s1 + $0x284] ss:$16 sps:$4 sm:$0xff]   ;;  %v1260_v15 = vld [vmem:[%s1894_s1 + $0x280] ss:$16 sps:$4 sm:$0xff]  }
   0x9   :  { %867 = vmatprep.subr.bf16.mxu1 %v1251_v9  ;;  %v1261_v16 = vld [vmem:[%s1894_s1 + $0x64] ss:$16 sps:$4 sm:$0xff]   ;;  %v1265_v18 = vld [vmem:[%s1894_s1 + $0x60] ss:$16 sps:$4 sm:$0xff]  }
   0xa   :  { %v1263_v17 = vld [vmem:[%s1894_s1 + $0x264] ss:$16 sps:$4 sm:$0xff]   ;;  %v1266_v19 = vld [vmem:[%s1894_s1 + $0x260] ss:$16 sps:$4 sm:$0xff]  }
   0xb   :  { %827 = vmatpush1.bf16.msra.mxu0 %v1253_v10  ;;  %v1267_v20 = vld [vmem:[%s1894_s1 + $0x44] ss:$16 sps:$4 sm:$0xff]   ;;  %v1271_v22 = vld [vmem:[%s1894_s1 + $0x40] ss:$16 sps:$4 sm:$0xff]  }
   0xc   :  { %868 = vmatpush1.bf16.msra.mxu1 %v1254_v11  ;;  %828 = vmatprep.subr.bf16.mxu0 %v1255_v12  ;;  %v1269_v21 = vld [vmem:[%s1894_s1 + $0x244] ss:$16 sps:$4 sm:$0xff]   ;;  %v1272_v23 = vld [vmem:[%s1894_s1 + $0x240] ss:$16 sps:$4 sm:$0xff]   ;;  %v1335_v11 = vld [vmem:[%s1894_s1 + $0xec] ss:$16 sps:$4 sm:$0xff]  }
   0xd   :  { %869 = vmatprep.subr.bf16.mxu1 %v1257_v13  ;;  %v1273_v24 = vld [vmem:[%s1894_s1 + $0x24] ss:$16 sps:$4 sm:$0xff]   ;;  %v1277_v26 = vld [vmem:[%s1894_s1 + $0x20] ss:$16 sps:$4 sm:$0xff]   ;;  %v1338_v12 = vld [vmem:[%s1894_s1 + $0x2ec] ss:$16 sps:$4 sm:$0xff]  }
   0xe   :  { %v1275_v25 = vld [vmem:[%s1894_s1 + $0x224] ss:$16 sps:$4 sm:$0xff]   ;;  %v1278_v27 = vld [vmem:[%s1894_s1 + $0x220] ss:$16 sps:$4 sm:$0xff]  }
   0xf   :  { %829 = vmatpush1.bf16.msra.mxu0 %v1259_v14  ;;  %v1279_v28 = vld [vmem:[%s1894_s1 + $0x4] ss:$16 sps:$4 sm:$0xff]   ;;  %v1283_v30 = vld [vmem:[%s1894_s1] ss:$16 sps:$4 sm:$0xff]   ;;  %v1333_v14 = vld [vmem:[%s1894_s1 + $0xe8] ss:$16 sps:$4 sm:$0xff]  }
  0x10   :  { %870 = vmatpush1.bf16.msra.mxu1 %v1260_v15  ;;  %830 = vmatprep.subr.bf16.mxu0 %v1261_v16  ;;  %v1281_v29 = vld [vmem:[%s1894_s1 + $0x204] ss:$16 sps:$4 sm:$0xff]   ;;  %v1284_v31 = vld [vmem:[%s1894_s1 + $0x200] ss:$16 sps:$4 sm:$0xff]   ;;  %v1336_v15 = vld [vmem:[%s1894_s1 + $0x2e8] ss:$16 sps:$4 sm:$0xff]  }
  0x11   :  { %871 = vmatprep.subr.bf16.mxu1 %v1263_v17  ;;  %v1285_v32 = vld [vmem:[%s1894_s1 + $0x1e4] ss:$16 sps:$4 sm:$0xff]   ;;  %v1289_v34 = vld [vmem:[%s1894_s1 + $0x1e0] ss:$16 sps:$4 sm:$0xff]   ;;  %v1341_v16 = vld [vmem:[%s1894_s1 + $0xcc] ss:$16 sps:$4 sm:$0xff]  }
  0x12   :  { %v1287_v33 = vld [vmem:[%s1894_s1 + $0x3e4] ss:$16 sps:$4 sm:$0xff]   ;;  %v1290_v35 = vld [vmem:[%s1894_s1 + $0x3e0] ss:$16 sps:$4 sm:$0xff]   ;;  %v1344_v17 = vld [vmem:[%s1894_s1 + $0x2cc] ss:$16 sps:$4 sm:$0xff]  }
  0x13   :  { %831 = vmatpush1.bf16.msra.mxu0 %v1265_v18  ;;  %v1291_v36 = vld [vmem:[%s1894_s1 + $0x1c4] ss:$16 sps:$4 sm:$0xff]   ;;  %v1295_v41 = vld [vmem:[%s1894_s1 + $0x1c0] ss:$16 sps:$4 sm:$0xff]   ;;  %v1339_v18 = vld [vmem:[%s1894_s1 + $0xc8] ss:$16 sps:$4 sm:$0xff]  }
  0x14   :  { %872 = vmatpush1.bf16.msra.mxu1 %v1266_v19  ;;  %832 = vmatprep.subr.bf16.mxu0 %v1267_v20  ;;  %v1293_v37 = vld [vmem:[%s1894_s1 + $0x3c4] ss:$16 sps:$4 sm:$0xff]   ;;  %v1296_v42 = vld [vmem:[%s1894_s1 + $0x3c0] ss:$16 sps:$4 sm:$0xff]   ;;  %v1342_v19 = vld [vmem:[%s1894_s1 + $0x2c8] ss:$16 sps:$4 sm:$0xff]  }
  0x15   :  { %873 = vmatprep.subr.bf16.mxu1 %v1269_v21  ;;  %v1297_v43 = vld [vmem:[%s1894_s1 + $0x1a4] ss:$16 sps:$4 sm:$0xff]   ;;  %v1301_v47 = vld [vmem:[%s1894_s1 + $0x1a0] ss:$16 sps:$4 sm:$0xff]   ;;  %v1347_v20 = vld [vmem:[%s1894_s1 + $0xac] ss:$16 sps:$4 sm:$0xff]  }
  0x16   :  { %v1299_v44 = vld [vmem:[%s1894_s1 + $0x3a4] ss:$16 sps:$4 sm:$0xff]   ;;  %v1302_v48 = vld [vmem:[%s1894_s1 + $0x3a0] ss:$16 sps:$4 sm:$0xff]   ;;  %v1350_v21 = vld [vmem:[%s1894_s1 + $0x2ac] ss:$16 sps:$4 sm:$0xff]  }
  0x17   :  { %833 = vmatpush1.bf16.msra.mxu0 %v1271_v22  ;;  %v1303_v49 = vld [vmem:[%s1894_s1 + $0x184] ss:$16 sps:$4 sm:$0xff]   ;;  %v1104_v52 = vld.sshfl [vmem:[%s1893_s0] sm:$0x33 pattern:$0x75316420] }
  0x18   :  { %874 = vmatpush1.bf16.msra.mxu1 %v1272_v23  ;;  %834 = vmatprep.subr.bf16.mxu0 %v1273_v24  ;;  %v1305_v50 = vld [vmem:[%s1894_s1 + $0x384] ss:$16 sps:$4 sm:$0xff]   ;;  %v1307_v53 = vld [vmem:[%s1894_s1 + $0x180] ss:$16 sps:$4 sm:$0xff]   ;;  %v161_v55 = vcombine.high %v1104_v52, %v1104_v52  ;;  %v1674_v9 = vrot.slane %v1104_v52, %v167_v51  ;;  %v1345_v22 = vld [vmem:[%s1894_s1 + $0xa8] ss:$16 sps:$4 sm:$0xff]  }
  0x19   :  { %875 = vmatprep.subr.bf16.mxu1 %v1275_v25  ;;  %v1308_v54 = vld [vmem:[%s1894_s1 + $0x380] ss:$16 sps:$4 sm:$0xff]   ;;  %v1309_v56 = vld [vmem:[%s1894_s1 + $0x164] ss:$16 sps:$4 sm:$0xff]   ;;  %v1348_v23 = vld [vmem:[%s1894_s1 + $0x2a8] ss:$16 sps:$4 sm:$0xff]  }
  0x1a   :  { %v1311_v57 = vld [vmem:[%s1894_s1 + $0x364] ss:$16 sps:$4 sm:$0xff]   ;;  %v175_v58 = vrot.slane %v161_v55, %v167_v51  ;;  %v1313_v59 = vld [vmem:[%s1894_s1 + $0x160] ss:$16 sps:$4 sm:$0xff]   ;;  %v1687_v13 = vcombine.high %v1674_v9, %v1674_v9  ;;  %v1353_v24 = vld [vmem:[%s1894_s1 + $0x8c] ss:$16 sps:$4 sm:$0xff]  }
  0x1b   :  { %835 = vmatpush1.bf16.msra.mxu0 %v1277_v26  ;;  %v1314_v60 = vld [vmem:[%s1894_s1 + $0x360] ss:$16 sps:$4 sm:$0xff]   ;;  %v1315_v62 = vld [vmem:[%s1894_s1 + $0x144] ss:$16 sps:$4 sm:$0xff]   ;;  %v1356_v25 = vld [vmem:[%s1894_s1 + $0x28c] ss:$16 sps:$4 sm:$0xff]  }
  0x1c   :  { %876 = vmatpush1.bf16.msra.mxu1 %v1278_v27  ;;  %836 = vmatprep.subr.bf16.mxu0 %v1279_v28  ;;  %v177_v61 = vcombine.high %v175_v58, %v175_v58  ;;  %v1317_v63 = vld [vmem:[%s1894_s1 + $0x344] ss:$16 sps:$4 sm:$0xff]   ;;  %v1319_v0 = vld [vmem:[%s1894_s1 + $0x140] ss:$16 sps:$4 sm:$0xff]   ;;  %v1351_v26 = vld [vmem:[%s1894_s1 + $0x88] ss:$16 sps:$4 sm:$0xff]  }
  0x1d   :  { %877 = vmatprep.subr.bf16.mxu1 %v1281_v29  ;;  %854 = vmatprep.mubr.bf16.mxu0 %v175_v58  ;;  %v1320_v1 = vld [vmem:[%s1894_s1 + $0x340] ss:$16 sps:$4 sm:$0xff]   ;;  %v1321_v2 = vld [vmem:[%s1894_s1 + $0x124] ss:$16 sps:$4 sm:$0xff]   ;;  %v1354_v27 = vld [vmem:[%s1894_s1 + $0x288] ss:$16 sps:$4 sm:$0xff]  }
  0x1e   :  { %895 = vmatprep.mubr.bf16.mxu1 %v177_v61  ;;  %v1323_v3 = vld [vmem:[%s1894_s1 + $0x324] ss:$16 sps:$4 sm:$0xff]   ;;  %v1325_v4 = vld [vmem:[%s1894_s1 + $0x120] ss:$16 sps:$4 sm:$0xff]   ;;  %v1359_v28 = vld [vmem:[%s1894_s1 + $0x6c] ss:$16 sps:$4 sm:$0xff]  }
  0x1f   :  { %837 = vmatpush1.bf16.msra.mxu0 %v1283_v30  ;;  %v1326_v5 = vld [vmem:[%s1894_s1 + $0x320] ss:$16 sps:$4 sm:$0xff]   ;;  %v1327_v6 = vld [vmem:[%s1894_s1 + $0x104] ss:$16 sps:$4 sm:$0xff]   ;;  %v1362_v29 = vld [vmem:[%s1894_s1 + $0x26c] ss:$16 sps:$4 sm:$0xff]  }
  0x20   :  { %878 = vmatpush1.bf16.msra.mxu1 %v1284_v31  ;;  %838 = vmatprep.subr.bf16.mxu0 %v1285_v32  ;;  %v1329_v7 = vld [vmem:[%s1894_s1 + $0x304] ss:$16 sps:$4 sm:$0xff]   ;;  %v1331_v8 = vld [vmem:[%s1894_s1 + $0x100] ss:$16 sps:$4 sm:$0xff]   ;;  %v1357_v30 = vld [vmem:[%s1894_s1 + $0x68] ss:$16 sps:$4 sm:$0xff]  }
  0x21   :  { %879 = vmatprep.subr.bf16.mxu1 %v1287_v33  ;;  %v1332_v10 = vld [vmem:[%s1894_s1 + $0x300] ss:$16 sps:$4 sm:$0xff]   ;;  %v1360_v31 = vld [vmem:[%s1894_s1 + $0x268] ss:$16 sps:$4 sm:$0xff]   ;;  %v1365_v32 = vld [vmem:[%s1894_s1 + $0x4c] ss:$16 sps:$4 sm:$0xff]  }
  0x22   :  { %v1368_v33 = vld [vmem:[%s1894_s1 + $0x24c] ss:$16 sps:$4 sm:$0xff]  }
  0x23   :  { %839 = vmatpush2.bf16.msra.mxu0 %v1289_v34  ;;  %v1363_v34 = vld [vmem:[%s1894_s1 + $0x48] ss:$16 sps:$4 sm:$0xff]  }
  0x24   :  { %880 = vmatpush2.bf16.msra.mxu1 %v1290_v35  ;;  %840 = vmatprep.subr.bf16.mxu0 %v1291_v36  ;;  %v1366_v35 = vld [vmem:[%s1894_s1 + $0x248] ss:$16 sps:$4 sm:$0xff]   ;;  %v1371_v36 = vld [vmem:[%s1894_s1 + $0x2c] ss:$16 sps:$4 sm:$0xff]  }
  0x25   :  { %881 = vmatprep.subr.bf16.mxu1 %v1293_v37  ;;  %v1374_v37 = vld [vmem:[%s1894_s1 + $0x22c] ss:$16 sps:$4 sm:$0xff]  }
  0x27   :  { %841 = vmatpush2.bf16.msra.mxu0 %v1295_v41 }
  0x28   :  { %882 = vmatpush2.bf16.msra.mxu1 %v1296_v42  ;;  %842 = vmatprep.subr.bf16.mxu0 %v1297_v43 }
  0x29   :  { %883 = vmatprep.subr.bf16.mxu1 %v1299_v44 }
  0x2b   :  { %843 = vmatpush2.bf16.msra.mxu0 %v1301_v47 }
  0x2c   :  { %884 = vmatpush2.bf16.msra.mxu1 %v1302_v48  ;;  %844 = vmatprep.subr.bf16.mxu0 %v1303_v49 }
  0x2d   :  { %885 = vmatprep.subr.bf16.mxu1 %v1305_v50 }
  0x2f   :  { %845 = vmatpush2.bf16.msra.mxu0 %v1307_v53 }
  0x30   :  { %886 = vmatpush2.bf16.msra.mxu1 %v1308_v54  ;;  %846 = vmatprep.subr.bf16.mxu0 %v1309_v56 }
  0x31   :  { %887 = vmatprep.subr.bf16.mxu1 %v1311_v57 }
  0x33   :  { %847 = vmatpush2.bf16.msra.mxu0 %v1313_v59 }
  0x34   :  { %888 = vmatpush2.bf16.msra.mxu1 %v1314_v60  ;;  %848 = vmatprep.subr.bf16.mxu0 %v1315_v62 }
  0x35   :  { %889 = vmatprep.subr.bf16.mxu1 %v1317_v63 }
  0x37   :  { %849 = vmatpush2.bf16.msra.mxu0 %v1319_v0 }
  0x38   :  { %890 = vmatpush2.bf16.msra.mxu1 %v1320_v1  ;;  %850 = vmatprep.subr.bf16.mxu0 %v1321_v2 }
  0x39   :  { %891 = vmatprep.subr.bf16.mxu1 %v1323_v3 }
  0x3b   :  { %851 = vmatpush2.bf16.msra.mxu0 %v1325_v4 }
  0x3c   :  { %892 = vmatpush2.bf16.msra.mxu1 %v1326_v5  ;;  %852 = vmatprep.subr.bf16.mxu0 %v1327_v6 }
  0x3d   :  { %893 = vmatprep.subr.bf16.mxu1 %v1329_v7 }
  0x3f   :  { %853 = vmatpush2.bf16.msra.mxu0 %v1331_v8 }
  0x40   :  { %894 = vmatpush2.bf16.msra.mxu1 %v1332_v10  ;;  %904 = vmatprep.subr.bf16.mxu0 %v1335_v11 }
  0x41   :  { %945 = vmatprep.subr.bf16.mxu1 %v1338_v12 }
  0x42   :  { %855 = vmatmul.mubr.bf16.vlgmr.msra.gmra.mxu0 %v1674_v9 }
  0x43   :  { %896 = vmatmul.mubr.bf16.vlgmr.msra.gmra.mxu1 %v1687_v13  ;;  %905 = vmatpush1.bf16.msra.mxu0 %v1333_v14 }
  0x44   :  { %946 = vmatpush1.bf16.msra.mxu1 %v1336_v15  ;;  %906 = vmatprep.subr.bf16.mxu0 %v1341_v16 }
  0x45   :  { %947 = vmatprep.subr.bf16.mxu1 %v1344_v17  ;;  %936 = vmatprep.mubr.bf16.mxu0 %v175_v58 }
  0x46   :  { %977 = vmatprep.mubr.bf16.mxu1 %v177_v61 }
  0x47   :  { %907 = vmatpush1.bf16.msra.mxu0 %v1339_v18 }
  0x48   :  { %948 = vmatpush1.bf16.msra.mxu1 %v1342_v19  ;;  %908 = vmatprep.subr.bf16.mxu0 %v1347_v20 }
  0x49   :  { %949 = vmatprep.subr.bf16.mxu1 %v1350_v21 }
  0x4b   :  { %909 = vmatpush1.bf16.msra.mxu0 %v1345_v22 }
  0x4c   :  { %950 = vmatpush1.bf16.msra.mxu1 %v1348_v23  ;;  %910 = vmatprep.subr.bf16.mxu0 %v1353_v24 }
  0x4d   :  { %951 = vmatprep.subr.bf16.mxu1 %v1356_v25 }
  0x4f   :  { %911 = vmatpush1.bf16.msra.mxu0 %v1351_v26 }
  0x50   :  { %952 = vmatpush1.bf16.msra.mxu1 %v1354_v27  ;;  %912 = vmatprep.subr.bf16.mxu0 %v1359_v28 }
  0x51   :  { %953 = vmatprep.subr.bf16.mxu1 %v1362_v29 }
  0x53   :  { %913 = vmatpush1.bf16.msra.mxu0 %v1357_v30 }
  0x54   :  { %954 = vmatpush1.bf16.msra.mxu1 %v1360_v31  ;;  %914 = vmatprep.subr.bf16.mxu0 %v1365_v32 }
  0x55   :  { %955 = vmatprep.subr.bf16.mxu1 %v1368_v33 }
  0x56   :  { %9 = vsyncpa [#allocation3], 0  ;;  %v1369_v38 = vld [vmem:[%s1894_s1 + $0x28] ss:$16 sps:$4 sm:$0xff]   ;;  %v1377_v40 = vld [vmem:[%s1894_s1 + $0xc] ss:$16 sps:$4 sm:$0xff]  }
  0x57   :  { %915 = vmatpush1.bf16.msra.mxu0 %v1363_v34  ;;  %v1372_v39 = vld [vmem:[%s1894_s1 + $0x228] ss:$16 sps:$4 sm:$0xff]   ;;  %v1380_v41 = vld [vmem:[%s1894_s1 + $0x20c] ss:$16 sps:$4 sm:$0xff]   ;;  %v1018_v26 = vsub.s32 0, %v1605_v46  ;;  %v1022_v27 = vsub.s32 1, %v1605_v46 }
  0x58   :  { %956 = vmatpush1.bf16.msra.mxu1 %v1366_v35  ;;  %916 = vmatprep.subr.bf16.mxu0 %v1371_v36  ;;  %v1375_v42 = vld [vmem:[%s1894_s1 + $0x8] ss:$16 sps:$4 sm:$0xff]   ;;  %v1383_v44 = vld [vmem:[%s1894_s1 + $0x1ec] ss:$16 sps:$4 sm:$0xff]   ;;  %v1026_v28 = vsub.s32 2, %v1605_v46 }
  0x59   :  { %957 = vmatprep.subr.bf16.mxu1 %v1374_v37  ;;  %v1378_v43 = vld [vmem:[%s1894_s1 + $0x208] ss:$16 sps:$4 sm:$0xff]   ;;  %v1386_v45 = vld [vmem:[%s1894_s1 + $0x3ec] ss:$16 sps:$4 sm:$0xff]   ;;  %v1014_v30 = vld [vmem:[%s1895_s2] sm:$0xf] }
  0x5a   :  { %v1381_v47 = vld [vmem:[%s1894_s1 + $0x1e8] ss:$16 sps:$4 sm:$0xff]   ;;  %v1389_v49 = vld [vmem:[%s1894_s1 + $0x1cc] ss:$16 sps:$4 sm:$0xff]   ;;  %v1051_v31 = vld [vmem:[%s1896_s3] sm:$0xf]  ;;  %v1019_v32 = vrot.slane %v1014_v30, %v1018_v26  ;;  %v1023_v33 = vrot.slane %v1014_v30, %v1022_v27  ;;  %v1027_v34 = vrot.slane %v1014_v30, %v1026_v28 }
  0x5b   :  { %917 = vmatpush1.bf16.msra.mxu0 %v1369_v38  ;;  %v1384_v48 = vld [vmem:[%s1894_s1 + $0x3e8] ss:$16 sps:$4 sm:$0xff]   ;;  %v1392_v50 = vld [vmem:[%s1894_s1 + $0x3cc] ss:$16 sps:$4 sm:$0xff]   ;;  %v1056_v37 = vrot.slane %v1051_v31, %v1018_v26  ;;  %v1060_v38 = vrot.slane %v1051_v31, %v1022_v27  ;;  %s1453_s2 = smov [#allocation2]  }
  0x5c   :  { %958 = vmatpush1.bf16.msra.mxu1 %v1372_v39  ;;  %918 = vmatprep.subr.bf16.mxu0 %v1377_v40  ;;  %v1387_v51 = vld [vmem:[%s1894_s1 + $0x1c8] ss:$16 sps:$4 sm:$0xff]   ;;  %v1395_v53 = vld [vmem:[%s1894_s1 + $0x1ac] ss:$16 sps:$4 sm:$0xff]   ;;  %v1064_v39 = vrot.slane %v1051_v31, %v1026_v28  ;;  %s1096_s3 = sshll.u32 %s1453_s2, 4  ;;  %s1097_s3 = int_to_ptr.vmem [resolvable:$true] %s1096_s3 }
  0x5d   :  { %959 = vmatprep.subr.bf16.mxu1 %v1380_v41  ;;  %v1390_v52 = vld [vmem:[%s1894_s1 + $0x3c8] ss:$16 sps:$4 sm:$0xff]   ;;  %v1398_v54 = vld [vmem:[%s1894_s1 + $0x3ac] ss:$16 sps:$4 sm:$0xff]   ;;  %s1429_s10 = scalar_lea.vmem %s1097_s3, 128  ;;  %p1434_p1 = scmp.lt.s32.totalorder %s1097_s3, %s1097_s3 }
  0x5e   :  { %v1393_v55 = vld [vmem:[%s1894_s1 + $0x1a8] ss:$16 sps:$4 sm:$0xff]   ;;  %v1401_v57 = vld [vmem:[%s1894_s1 + $0x18c] ss:$16 sps:$4 sm:$0xff]   ;;  %p1430_p0 = scmp.ne.s32.totalorder %s1097_s3, %s1429_s10  ;;  %p1435_p2 = scmp.lt.s32.totalorder %s1429_s10, %s1429_s10 }
  0x5f   :  { %919 = vmatpush1.bf16.msra.mxu0 %v1375_v42  ;;  %v1396_v56 = vld [vmem:[%s1894_s1 + $0x3a8] ss:$16 sps:$4 sm:$0xff]   ;;  %v1404_v58 = vld [vmem:[%s1894_s1 + $0x38c] ss:$16 sps:$4 sm:$0xff]  }
  0x60   :  { %960 = vmatpush1.bf16.msra.mxu1 %v1378_v43  ;;  %920 = vmatprep.subr.bf16.mxu0 %v1383_v44  ;;  %v1399_v59 = vld [vmem:[%s1894_s1 + $0x188] ss:$16 sps:$4 sm:$0xff]   ;;  %v1407_v61 = vld [vmem:[%s1894_s1 + $0x16c] ss:$16 sps:$4 sm:$0xff]   ;;  %v1032_v43 = vcombine.low %v1019_v32, %v1023_v33  ;;  %p1436_p3 = por %p1435_p2, %p1434_p1 }
  0x61   :  { %961 = vmatprep.subr.bf16.mxu1 %v1386_v45  ;;  %v1402_v60 = vld [vmem:[%s1894_s1 + $0x388] ss:$16 sps:$4 sm:$0xff]   ;;  %v1410_v62 = vld [vmem:[%s1894_s1 + $0x36c] ss:$16 sps:$4 sm:$0xff]  }
  0x62   :  { %v1405_v63 = vld [vmem:[%s1894_s1 + $0x168] ss:$16 sps:$4 sm:$0xff]   ;;  %v1413_v1 = vld [vmem:[%s1894_s1 + $0x14c] ss:$16 sps:$4 sm:$0xff]   ;;  %p1437_p4 = pnand %p1436_p3, %p1430_p0 }
  0x63   :  { %921 = vmatpush2.bf16.msra.mxu0 %v1381_v47  ;;  %v1408_v0 = vld [vmem:[%s1894_s1 + $0x368] ss:$16 sps:$4 sm:$0xff]   ;;  %v1416_v2 = vld [vmem:[%s1894_s1 + $0x34c] ss:$16 sps:$4 sm:$0xff]  }
  0x64   :  { %962 = vmatpush2.bf16.msra.mxu1 %v1384_v48  ;;  %922 = vmatprep.subr.bf16.mxu0 %v1389_v49  ;;  %v1411_v3 = vld [vmem:[%s1894_s1 + $0x148] ss:$16 sps:$4 sm:$0xff]   ;;  %v1419_v5 = vld [vmem:[%s1894_s1 + $0x12c] ss:$16 sps:$4 sm:$0xff]  }
  0x65   :  { %963 = vmatprep.subr.bf16.mxu1 %v1392_v50  ;;  %v1414_v4 = vld [vmem:[%s1894_s1 + $0x348] ss:$16 sps:$4 sm:$0xff]   ;;  %v1422_v6 = vld [vmem:[%s1894_s1 + $0x32c] ss:$16 sps:$4 sm:$0xff]  }
  0x66   :  { %v1417_v7 = vld [vmem:[%s1894_s1 + $0x128] ss:$16 sps:$4 sm:$0xff]   ;;  %v1425_v10 = vld [vmem:[%s1894_s1 + $0x10c] ss:$16 sps:$4 sm:$0xff]  }
  0x67   :  { %923 = vmatpush2.bf16.msra.mxu0 %v1387_v51  ;;  %v1420_v8 = vld [vmem:[%s1894_s1 + $0x328] ss:$16 sps:$4 sm:$0xff]   ;;  %v1428_v11 = vld [vmem:[%s1894_s1 + $0x30c] ss:$16 sps:$4 sm:$0xff]   ;;  %v1069_v51 = vcombine.low %v1056_v37, %v1060_v38 }
  0x68   :  { %964 = vmatpush2.bf16.msra.mxu1 %v1390_v52  ;;  %924 = vmatprep.subr.bf16.mxu0 %v1395_v53  ;;  %v1423_v12 = vld [vmem:[%s1894_s1 + $0x108] ss:$16 sps:$4 sm:$0xff]  }
  0x69   :  { %965 = vmatprep.subr.bf16.mxu1 %v1398_v54  ;;  %v1426_v14 = vld [vmem:[%s1894_s1 + $0x308] ss:$16 sps:$4 sm:$0xff]  }
  0x6b   :  { %925 = vmatpush2.bf16.msra.mxu0 %v1393_v55 }
  0x6c   :  { %966 = vmatpush2.bf16.msra.mxu1 %v1396_v56  ;;  %926 = vmatprep.subr.bf16.mxu0 %v1401_v57 }
  0x6d   :  { %967 = vmatprep.subr.bf16.mxu1 %v1404_v58 }
  0x6f   :  { %927 = vmatpush2.bf16.msra.mxu0 %v1399_v59 }
  0x70   :  { %968 = vmatpush2.bf16.msra.mxu1 %v1402_v60  ;;  %928 = vmatprep.subr.bf16.mxu0 %v1407_v61 }
  0x71   :  { %969 = vmatprep.subr.bf16.mxu1 %v1410_v62 }
  0x73   :  { %929 = vmatpush2.bf16.msra.mxu0 %v1405_v63 }
  0x74   :  { %970 = vmatpush2.bf16.msra.mxu1 %v1408_v0  ;;  %930 = vmatprep.subr.bf16.mxu0 %v1413_v1 }
  0x75   :  { %971 = vmatprep.subr.bf16.mxu1 %v1416_v2 }
  0x77   :  { %931 = vmatpush2.bf16.msra.mxu0 %v1411_v3 }
  0x78   :  { %972 = vmatpush2.bf16.msra.mxu1 %v1414_v4  ;;  %932 = vmatprep.subr.bf16.mxu0 %v1419_v5 }
  0x79   :  { %973 = vmatprep.subr.bf16.mxu1 %v1422_v6 }
  0x7b   :  { %933 = vmatpush2.bf16.msra.mxu0 %v1417_v7 }
  0x7c   :  { %974 = vmatpush2.bf16.msra.mxu1 %v1420_v8  ;;  %934 = vmatprep.subr.bf16.mxu0 %v1425_v10 }
  0x7d   :  { %975 = vmatprep.subr.bf16.mxu1 %v1428_v11 }
  0x7f   :  { %935 = vmatpush2.bf16.msra.mxu0 %v1423_v12 }
  0x80   :  { %976 = vmatpush2.bf16.msra.mxu1 %v1426_v14 }
  0x82   :  { %937 = vmatmul.mubr.bf16.vlgmr.msra.gmra.mxu0 %v1674_v9  ;;  %v1030_v9 = vsub.s32 3, %v1605_v46 }
  0x83   :  { %978 = vmatmul.mubr.bf16.vlgmr.msra.gmra.mxu1 %v1687_v13  ;;  %v1452_v13 = vmov 1983009808  }
  0x84   :  { %v993_v29 = vunpack.c.l.s4 %v1452_v13  ;;  %v1031_v35 = vrot.slane %v1014_v30, %v1030_v9  ;;  %v1068_v40 = vrot.slane %v1051_v31, %v1030_v9 }
  0x86   :  { %v994_v36 = vunpack.c.0.s8 %v993_v29  ;;  %v1033_v44 = vcombine.low %v1027_v34, %v1031_v35  ;;  %v1070_v52 = vcombine.low %v1064_v39, %v1068_v40 }
  0x88   :  { %v997_v45 = vsub.s32 %v994_v36, %v1605_v46 }
  0x8a   :  { %v1040_v56 = vrot.slane %v1032_v43, %v997_v45  ;;  %v1047_v57 = vrot.slane %v1033_v44, %v997_v45  ;;  %v1077_v62 = vrot.slane %v1069_v51, %v997_v45  ;;  %v1084_v63 = vrot.slane %v1070_v52, %v997_v45 }
  0x8c   :  { %v1048_v1 = vcombine.low %v1040_v56, %v1047_v57  ;;  %v1085_v46 = vcombine.low %v1077_v62, %v1084_v63 }
 0x102   :  { %v856_v15 = vpop.f32.mrf.mxu0 }
 0x103   :  { %v897_v16 = vpop.f32.mrf.mxu1 }
 0x104   :  { %v898_v17 = vadd.f32 %v897_v16, %v856_v15  ;;  %v858_v18 = vpop.f32.mrf.mxu0 }
 0x105   :  { %v899_v19 = vpop.f32.mrf.mxu1 }
 0x106   :  { %v900_v20 = vadd.f32 %v899_v19, %v858_v18  ;;  %v860_v21 = vpop.f32.mrf.mxu0 }
 0x107   :  { %v901_v22 = vpop.f32.mrf.mxu1 }
 0x108   :  { %v990_v23 = vcombine.low %v898_v17, %v900_v20  ;;  %v861_v24 = vpop.f32.mrf.mxu0 }
 0x109   :  { %v902_v25 = vpop.f32.mrf.mxu1 }
 0x10a   :  { %v998_v60 = vrot.slane %v990_v23, %v997_v45 }
 0x142   :  { %v938_v41 = vpop.f32.mrf.mxu0 }
 0x143   :  { %v979_v42 = vpop.f32.mrf.mxu1 }
 0x144   :  { %v940_v47 = vpop.f32.mrf.mxu0  ;;  %v980_v49 = vadd.f32 %v979_v42, %v938_v41 }
 0x145   :  { %v981_v48 = vpop.f32.mrf.mxu1 }
 0x146   :  { %v982_v50 = vadd.f32 %v981_v48, %v940_v47  ;;  %v942_v53 = vpop.f32.mrf.mxu0 }
 0x147   :  { %v983_v54 = vpop.f32.mrf.mxu1 }
 0x148   :  { %v991_v55 = vcombine.low %v980_v49, %v982_v50  ;;  %v943_v58 = vpop.f32.mrf.mxu0 }
 0x149   :  { %v984_v59 = vpop.f32.mrf.mxu1 }
 0x14a   :  { %v1005_v61 = vrot.slane %v991_v55, %v997_v45 }
 0x14c   :  { %v1006_v0 = vcombine.low %v998_v60, %v1005_v61 }
 0x14e   :  { %v1050_v2 = vmul.f32 %v1048_v1, %v1006_v0 }
 0x150   :  { %v1087_v3 = vadd.f32 %v1085_v46, %v1050_v2 }
 0x152   :  { %v1088_v4 = vmax.f32 %v1087_v3, 0.0 }
 0x154   :  { %1089 = vst [vmem:[#allocation2] sm:$0xff] %v1088_v4 }
 0x155   :  { %1440 = shalt.err (!%p1437_p4)
}
 0x156   :  { %1099 = dma.vmem_to_hbm [thread:$0]  %s1097_s3, 128, %s1897_s4, [#allocation3]  }
 0x157   :  { %1449 = dma.done.wait [#allocation3], 128  }
 0x158   :  { %1450 = vsyncadd [#allocation3], 4294967168 }
 0x159   :  { %1103 = vsyncpa [#allocation3], 1 }

</bundles_post_ra>
